<compile_context>
chip_gen: v7x
topology: tpu7x:2x2x1
jax: 0.10.0
libtpu: 0.0.40
codegen_flags: <defaults>
</compile_context>

<pallas_src>
import math
from functools import partial

import jax
import jax.numpy as jnp
from jax.experimental import pallas as pl
from jax.experimental.pallas import tpu as pltpu


# ----------------------------------------------------------------------------
# Pallas kernels
# ----------------------------------------------------------------------------
def _fc_relu_kernel(z_ref, w_ref, b_ref, o_ref):
    """Linear + bias + ReLU.  z:(B,K) bf16, w:(K,N) bf16, b:(1,N) f32."""
    acc = jnp.dot(z_ref[...], w_ref[...], preferred_element_type=jnp.float32)
    o_ref[...] = jnp.maximum(acc + b_ref[...], 0.0).astype(o_ref.dtype)


def _convt2x_kernel(x_ref, w_ref, b_ref, o_ref, *, Wp, Mv):
    """Stride-2 3x3 ConvTranspose2d + bias + ReLU via parity decomposition.

    x_ref: (1, Hp*Wp, Ci) bf16  -- high-padded input, flattened over (h, w)
    w_ref: (4, Ci, 4*Co) bf16   -- one (Ci, 4*Co) matrix per input shift
                                   (a',b') in {0,1}^2; N packs the 4 output
                                   parities (ee, eo, oe, oo)
    b_ref: (1, 4*Co) f32
    o_ref: (1, Mv, 4*Co) bf16   -- Mv = (H-1)*Wp + W flat rows (with garbage
                                   rows at j == W, dropped by the caller)
    """
    x = x_ref[0]                                        # (Hp*Wp, Ci)
    shifts = ((0, 0), (0, 1), (1, 0), (1, 1))
    acc = None
    for s, (a_sh, b_sh) in enumerate(shifts):
        off = a_sh * Wp + b_sh                          # static Python int
        part = jnp.dot(x[off:off + Mv, :], w_ref[s],
                       preferred_element_type=jnp.float32)
        acc = part if acc is None else acc + part
    acc = jnp.maximum(acc + b_ref[...], 0.0)
    o_ref[0] = acc.astype(o_ref.dtype)


def _conv3x3_sigmoid_kernel(x_ref, w_ref, b_ref, logit_ref, prob_ref, *, Wp, Mv):
    """Stride-1 3x3 Conv2d (pad 1) + bias, with fused sigmoid (Bernoulli probs).

    x_ref: (1, Hp*Wp, Ci) bf16  -- both-side-padded input, flattened over (h, w)
    w_ref: (9, Ci, Co) bf16     -- tap t = kh*3 + kw
    b_ref: (1, Co) f32
    logit_ref / prob_ref: (1, Mv, Co) f32, Mv = (H-1)*Wp + W
    """
    x = x_ref[0]
    acc = None
    for kh in range(3):
        for kw in range(3):
            off = kh * Wp + kw
            part = jnp.dot(x[off:off + Mv, :], w_ref[kh * 3 + kw],
                           preferred_element_type=jnp.float32)
            acc = part if acc is None else acc + part
    acc = acc + b_ref[...]
    logit_ref[0] = acc
    prob_ref[0] = 1.0 / (1.0 + jnp.exp(-acc))           # fused sigmoid (EUP)


# ----------------------------------------------------------------------------
# Layer wrappers (thin JAX glue around one pallas_call each)
# ----------------------------------------------------------------------------
_PARALLEL = pltpu.CompilerParams(dimension_semantics=("parallel",))


def fc_relu(z, w, b):
    """z: (B, K) -> (B, N) bf16.  w: (K, N) bf16, b: (1, N) f32."""
    M, K = z.shape
    N = w.shape[1]
    return pl.pallas_call(
        _fc_relu_kernel,
        out_shape=jax.ShapeDtypeStruct((M, N), jnp.bfloat16),
        in_specs=[pl.BlockSpec(memory_space=pltpu.MemorySpace.VMEM)] * 3,
        out_specs=pl.BlockSpec(memory_space=pltpu.MemorySpace.VMEM),
    )(z.astype(jnp.bfloat16), w, b)


def convt2x_relu(x, w_shift, bias4, output_padding):
    """ConvTranspose2d(k=3, stride=2, pad=1, out_pad=op) + ReLU, NHWC in/out.

    x: (B, H, W, Ci) ; w_shift: (4, Ci, 4*Co) bf16 ; bias4: (1, 4*Co) f32.
    Returns (B, 2H - (1 - op), 2W - (1 - op), Co) bf16.
    """
    B, H, W, Ci = x.shape
    Co4 = w_shift.shape[-1]
    Co = Co4 // 4
    Hp, Wp = H + 1, W + 1
    Mv = (H - 1) * Wp + W

    xp = jnp.pad(x, ((0, 0), (0, 1), (0, 1), (0, 0))).astype(jnp.bfloat16)
    xf = xp.reshape(B, Hp * Wp, Ci)                     # free reshape

    y = pl.pallas_call(
        partial(_convt2x_kernel, Wp=Wp, Mv=Mv),
        out_shape=jax.ShapeDtypeStruct((B, Mv, Co4), jnp.bfloat16),
        grid=(B,),
        in_specs=[
            pl.BlockSpec((1, Hp * Wp, Ci), lambda b: (b, 0, 0)),
            pl.BlockSpec((4, Ci, Co4), lambda b: (0, 0, 0)),
            pl.BlockSpec((1, Co4), lambda b: (0, 0)),
        ],
        out_specs=pl.BlockSpec((1, Mv, Co4), lambda b: (b, 0, 0)),
        compiler_params=_PARALLEL,
    )(xf, w_shift, bias4)

    # Un-flatten, drop garbage column, interleave the 4 parities -> (B, 2H, 2W, Co)
    y = jnp.pad(y, ((0, 0), (0, H * Wp - Mv), (0, 0)))
    y = y.reshape(B, H, Wp, 2, 2, Co)[:, :, :W]          # (B, H, W, 2, 2, Co)
    y = jnp.transpose(y, (0, 1, 3, 2, 4, 5)).reshape(B, 2 * H, 2 * W, Co)
    if output_padding == 0:                              # op=0 == op=1 cropped by 1
        y = y[:, :2 * H - 1, :2 * W - 1, :]
    return y


def conv3x3_logits_probs(x, taps, bias):
    """Conv2d(k=3, stride=1, pad=1), no activation, fused sigmoid.  NHWC."""
    B, H, W, Ci = x.shape
    Co = taps.shape[-1]
    Hp, Wp = H + 2, W + 2
    Mv = (H - 1) * Wp + W

    xp = jnp.pad(x, ((0, 0), (1, 1), (1, 1), (0, 0))).astype(jnp.bfloat16)
    xf = xp.reshape(B, Hp * Wp, Ci)

    logits, probs = pl.pallas_call(
        partial(_conv3x3_sigmoid_kernel, Wp=Wp, Mv=Mv),
        out_shape=(jax.ShapeDtypeStruct((B, Mv, Co), jnp.float32),
                   jax.ShapeDtypeStruct((B, Mv, Co), jnp.float32)),
        grid=(B,),
        in_specs=[
            pl.BlockSpec((1, Hp * Wp, Ci), lambda b: (b, 0, 0)),
            pl.BlockSpec((9, Ci, Co), lambda b: (0, 0, 0)),
            pl.BlockSpec((1, Co), lambda b: (0, 0)),
        ],
        out_specs=(pl.BlockSpec((1, Mv, Co), lambda b: (b, 0, 0)),
                   pl.BlockSpec((1, Mv, Co), lambda b: (b, 0, 0))),
        compiler_params=_PARALLEL,
    )(xf, taps, bias)

    def unflat(y):
        y = jnp.pad(y, ((0, 0), (0, H * Wp - Mv), (0, 0)))
        return y.reshape(B, H, Wp, Co)[:, :, :W, :]      # (B, H, W, Co)

    return unflat(logits), unflat(probs)


# ----------------------------------------------------------------------------
# One-time weight pre-transforms (PyTorch layouts -> matmul-ready layouts)
# ----------------------------------------------------------------------------
def _conv_taps(w):
    """Conv2d weight (Co, Ci, 3, 3) -> (9, Ci, Co), tap index = kh*3 + kw."""
    return jnp.stack([w[:, :, kh, kw].T for kh in range(3) for kw in range(3)],
                     axis=0)


def _convt_shift_weights(w):
    """ConvTranspose2d weight (Ci, Co, 3, 3) -> (4, Ci, 4*Co).

    Index s = 2*a_sh + b_sh selects the input shift (a_sh, b_sh) in {0,1}^2.
    Columns pack the 4 output parities p = 2*a + b (a/b = row/col parity); a
    parity uses kernel row index 1 (a=0, shift 0), 2 (a=1, shift 0), 0 (a=1,
    shift 1) and a zero block otherwise (same for columns).
    """
    Ci, Co = w.shape[0], w.shape[1]

    def k_idx(par, sh):
        if par == 0 and sh == 0:
            return 1
        if par == 1 and sh == 0:
            return 2
        if par == 1 and sh == 1:
            return 0
        return None

    mats = []
    for a_sh in (0, 1):
        for b_sh in (0, 1):
            blocks = []
            for a in (0, 1):
                for b in (0, 1):
                    kh, kw = k_idx(a, a_sh), k_idx(b, b_sh)
                    if kh is None or kw is None:
                        blocks.append(jnp.zeros((Ci, Co), jnp.float32))
                    else:
                        blocks.append(w[:, :, kh, kw])
            mats.append(jnp.concatenate(blocks, axis=1))   # (Ci, 4*Co)
    return jnp.stack(mats, axis=0)                         # (4, Ci, 4*Co)


# ----------------------------------------------------------------------------
# Decoder parameters + forward
# ----------------------------------------------------------------------------
def init_decoder_params(key, in_channels, latent_dim, img_size, n_channels):
    flw = math.ceil(img_size / 2 ** len(n_channels))   # first_layer_width
    fls = flw * flw                                    # first_layer_size
    keys = iter(jax.random.split(key, 64))

    def rnd(shape):
        return jax.random.normal(next(keys), shape, jnp.float32) * 0.05

    C0 = n_channels[0]
    # decoder_input: Linear(latent, C0*fls) + ReLU.  PyTorch weight is (out, in);
    # pre-transpose and permute columns so the output reshapes straight to NHWC.
    w_fc_t = rnd((C0 * fls, latent_dim))
    b_fc_t = rnd((C0 * fls,))
    w_fc = jnp.transpose(w_fc_t).reshape(latent_dim, C0, flw, flw)
    w_fc = jnp.transpose(w_fc, (0, 2, 3, 1)).reshape(latent_dim, fls * C0)
    b_fc = jnp.transpose(b_fc_t.reshape(C0, flw, flw), (1, 2, 0)).reshape(fls * C0)

    params = {
        "fc_w": w_fc.astype(jnp.bfloat16),
        "fc_b": b_fc.reshape(1, -1).astype(jnp.float32),
        "convt": [],                                   # ConvTranspose2d + ReLU stack
    }

    # decoder: ConvTranspose2d(ci, co, 3, stride 2, pad 1, out_pad op) + ReLU
    for i in range(len(n_channels) - 1):
        ci, co = n_channels[i], n_channels[i + 1]
        w_t = rnd((ci, co, 3, 3))                      # PyTorch (Ci, Co, kH, kW)
        b_t = rnd((co,))
        params["convt"].append({
            "w": _convt_shift_weights(w_t).astype(jnp.bfloat16),
            "b": jnp.tile(b_t, 4).reshape(1, -1).astype(jnp.float32),
        })

    # final_layer[0]: ConvTranspose2d(c_last, c_last, 3, 2, 1, 1) + ReLU
    cl = n_channels[-1]
    w_t = rnd((cl, cl, 3, 3))
    b_t = rnd((cl,))
    params["convt"].append({
        "w": _convt_shift_weights(w_t).astype(jnp.bfloat16),
        "b": jnp.tile(b_t, 4).reshape(1, -1).astype(jnp.float32),
    })

    # final_layer[2]: Conv2d(c_last, in_channels, 3, pad 1)  (no activation)
    w_c = rnd((in_channels, cl, 3, 3))                 # PyTorch (Co, Ci, kH, kW)
    b_c = rnd((in_channels,))
    params["final_conv_w"] = _conv_taps(w_c).astype(jnp.bfloat16)
    params["final_conv_b"] = b_c.reshape(1, -1).astype(jnp.float32)
    return params, flw


def decoder_forward(params, z, *, img_size, n_channels, flw):
    B = z.shape[0]
    # decoder_input: Linear + ReLU, reshaped straight to NHWC
    x = fc_relu(z, params["fc_w"], params["fc_b"])
    x = x.reshape(B, flw, flw, n_channels[0])
    # decoder stack + final_layer's ConvTranspose2d (all ConvT+ReLU)
    n_mid = len(n_channels) - 1
    for i, layer in enumerate(params["convt"]):
        if i < n_mid:
            op = 0 if (img_size == 28 and i == 0) else 1
        else:
            op = 1                                      # final_layer ConvTranspose2d
        x = convt2x_relu(x, layer["w"], layer["b"], op)
    # final Conv2d (no activation) with fused sigmoid for Bernoulli probs
    logits, probs = conv3x3_logits_probs(x, params["final_conv_w"],
                                         params["final_conv_b"])
    # single NCHW transpose at the boundary to match the PyTorch interface
    logits = jnp.transpose(logits, (0, 3, 1, 2))
    probs = jnp.transpose(probs, (0, 3, 1, 2))
    # TODO(synk): torch.distributions.Bernoulli has no Pallas equivalent; we
    # return the logits plus in-kernel sigmoid probs instead of a distribution.
    return logits, probs


# ----------------------------------------------------------------------------
if __name__ == "__main__":
    # Small consistent config: img_size=16 -> 3 stride-2 upsamplings 2->4->8->16
    B, latent_dim, in_channels, img_size = 2, 8, 4, 16
    n_channels = [32, 16, 8]

    key = jax.random.PRNGKey(0)
    kp, kz = jax.random.split(key)
    params, flw = init_decoder_params(kp, in_channels, latent_dim,
                                      img_size, n_channels)
    z = jax.random.normal(kz, (B, latent_dim), jnp.float32)

    fwd = jax.jit(partial(decoder_forward, img_size=img_size,
                          n_channels=tuple(n_channels), flw=flw))
    logits, probs = fwd(params, z)
    jax.block_until_ready((logits, probs))

    assert logits.shape == (B, in_channels, img_size, img_size), logits.shape
    assert probs.shape == logits.shape
    assert bool(jnp.all(jnp.isfinite(logits)))
    assert bool(jnp.all((probs >= 0.0) & (probs <= 1.0)))
    print("KERNEL_OK")
</pallas_src>

<mosaic_0001>
module attributes {stable_mosaic.version = 11 : i64} {
  func.func @_fc_relu_kernel(%arg0: memref<2x8xbf16, #tpu.memory_space<vmem>>, %arg1: memref<8x128xbf16, #tpu.memory_space<vmem>>, %arg2: memref<1x128xf32, #tpu.memory_space<vmem>>, %arg3: memref<2x128xbf16, #tpu.memory_space<vmem>>) attributes {dimension_semantics = [], scalar_prefetch = 0 : i64, scratch_operands = 0 : i64, tpu.core_type = #tpu.core_type<tc>} {
    %c0 = arith.constant 0 : index
    %c0_0 = arith.constant 0 : index
    %0 = vector.load %arg0[%c0, %c0_0] : memref<2x8xbf16, #tpu.memory_space<vmem>>, vector<2x8xbf16>
    %c0_1 = arith.constant 0 : index
    %c0_2 = arith.constant 0 : index
    %1 = vector.load %arg1[%c0_1, %c0_2] : memref<8x128xbf16, #tpu.memory_space<vmem>>, vector<8x128xbf16>
    %cst = arith.constant dense<0.000000e+00> : vector<2x128xf32>
    %2 = tpu.matmul %0, %1, %cst {dimension_numbers = #tpu.dot_dimension_numbers<[1], [0], [0], [1], [0, 0, 1, 1], [], []>} : vector<2x8xbf16>, vector<8x128xbf16>, vector<2x128xf32> -> vector<2x128xf32>
    %c0_3 = arith.constant 0 : index
    %c0_4 = arith.constant 0 : index
    %3 = vector.load %arg2[%c0_3, %c0_4] : memref<1x128xf32, #tpu.memory_space<vmem>>, vector<1x128xf32>
    %4 = vector.broadcast %3 : vector<1x128xf32> to vector<2x128xf32>
    %5 = arith.addf %2, %4 : vector<2x128xf32>
    %cst_5 = arith.constant 0.000000e+00 : f32
    %6 = vector.broadcast %cst_5 : f32 to vector<2x128xf32>
    %7 = arith.maximumf %5, %6 : vector<2x128xf32>
    %8 = arith.truncf %7 : vector<2x128xf32> to vector<2x128xbf16>
    %c0_6 = arith.constant 0 : index
    %c0_7 = arith.constant 0 : index
    %9 = vector.load %arg3[%c0_6, %c0_7] : memref<2x128xbf16, #tpu.memory_space<vmem>>, vector<2x128xbf16>
    tpu.vector_store %arg3[%c0_6, %c0_7], %8 {strides = array<i32>} : memref<2x128xbf16, #tpu.memory_space<vmem>>, vector<2x128xbf16>,
    return
  }
}

module attributes {stable_mosaic.version = 11 : i64} {
  func.func @_convt2x_kernel(%arg0: i32, %arg1: memref<1x9x32xbf16, #tpu.memory_space<vmem>>, %arg2: memref<4x32x64xbf16, #tpu.memory_space<vmem>>, %arg3: memref<1x64xf32, #tpu.memory_space<vmem>>, %arg4: memref<1x5x64xbf16, #tpu.memory_space<vmem>>) attributes {dimension_semantics = [#tpu.dimension_semantics<parallel>], iteration_bounds = array<i64: 2>, scalar_prefetch = 0 : i64, scratch_operands = 0 : i64, tpu.core_type = #tpu.core_type<tc>, window_params = [{transform_indices = @transform_0, window_bounds = array<i64: 1, 9, 32>}, {pipeline_mode = #tpu.pipeline_mode<synchronous>, transform_indices = @transform_1, window_bounds = array<i64: 4, 32, 64>}, {pipeline_mode = #tpu.pipeline_mode<synchronous>, transform_indices = @transform_2, window_bounds = array<i64: 1, 64>}, {transform_indices = @transform_3, window_bounds = array<i64: 1, 5, 64>}]} {
    %c0 = arith.constant 0 : index
    %c0_0 = arith.constant 0 : index
    %c0_1 = arith.constant 0 : index
    %0 = vector.load %arg1[%c0, %c0_0, %c0_1] : memref<1x9x32xbf16, #tpu.memory_space<vmem>>, vector<1x9x32xbf16>
    %1 = vector.shape_cast %0 : vector<1x9x32xbf16> to vector<9x32xbf16>
    %2 = vector.extract_strided_slice %1 {offsets = [0, 0], sizes = [5, 32], strides = [1, 1]} : vector<9x32xbf16> to vector<5x32xbf16>
    %c0_2 = arith.constant 0 : index
    %c0_3 = arith.constant 0 : index
    %c0_4 = arith.constant 0 : index
    %3 = vector.load %arg2[%c0_2, %c0_3, %c0_4] : memref<4x32x64xbf16, #tpu.memory_space<vmem>>, vector<1x32x64xbf16>
    %4 = vector.shape_cast %3 : vector<1x32x64xbf16> to vector<32x64xbf16>
    %cst = arith.constant dense<0.000000e+00> : vector<5x64xf32>
    %5 = tpu.matmul %2, %4, %cst {dimension_numbers = #tpu.dot_dimension_numbers<[1], [0], [0], [1], [0, 0, 1, 1], [], []>} : vector<5x32xbf16>, vector<32x64xbf16>, vector<5x64xf32> -> vector<5x64xf32>
    %6 = vector.extract_strided_slice %1 {offsets = [1, 0], sizes = [5, 32], strides = [1, 1]} : vector<9x32xbf16> to vector<5x32xbf16>
    %c1 = arith.constant 1 : index
    %c0_5 = arith.constant 0 : index
    %c0_6 = arith.constant 0 : index
    %7 = vector.load %arg2[%c1, %c0_5, %c0_6] : memref<4x32x64xbf16, #tpu.memory_space<vmem>>, vector<1x32x64xbf16>
    %8 = vector.shape_cast %7 : vector<1x32x64xbf16> to vector<32x64xbf16>
    %cst_7 = arith.constant dense<0.000000e+00> : vector<5x64xf32>
    %9 = tpu.matmul %6, %8, %cst_7 {dimension_numbers = #tpu.dot_dimension_numbers<[1], [0], [0], [1], [0, 0, 1, 1], [], []>} : vector<5x32xbf16>, vector<32x64xbf16>, vector<5x64xf32> -> vector<5x64xf32>
    %10 = arith.addf %5, %9 : vector<5x64xf32>
    %11 = vector.extract_strided_slice %1 {offsets = [3, 0], sizes = [5, 32], strides = [1, 1]} : vector<9x32xbf16> to vector<5x32xbf16>
    %c2 = arith.constant 2 : index
    %c0_8 = arith.constant 0 : index
    %c0_9 = arith.constant 0 : index
    %12 = vector.load %arg2[%c2, %c0_8, %c0_9] : memref<4x32x64xbf16, #tpu.memory_space<vmem>>, vector<1x32x64xbf16>
    %13 = vector.shape_cast %12 : vector<1x32x64xbf16> to vector<32x64xbf16>
    %cst_10 = arith.constant dense<0.000000e+00> : vector<5x64xf32>
    %14 = tpu.matmul %11, %13, %cst_10 {dimension_numbers = #tpu.dot_dimension_numbers<[1], [0], [0], [1], [0, 0, 1, 1], [], []>} : vector<5x32xbf16>, vector<32x64xbf16>, vector<5x64xf32> -> vector<5x64xf32>
    %15 = arith.addf %10, %14 : vector<5x64xf32>
    %16 = vector.extract_strided_slice %1 {offsets = [4, 0], sizes = [5, 32], strides = [1, 1]} : vector<9x32xbf16> to vector<5x32xbf16>
    %c3 = arith.constant 3 : index
    %c0_11 = arith.constant 0 : index
    %c0_12 = arith.constant 0 : index
    %17 = vector.load %arg2[%c3, %c0_11, %c0_12] : memref<4x32x64xbf16, #tpu.memory_space<vmem>>, vector<1x32x64xbf16>
    %18 = vector.shape_cast %17 : vector<1x32x64xbf16> to vector<32x64xbf16>
    %cst_13 = arith.constant dense<0.000000e+00> : vector<5x64xf32>
    %19 = tpu.matmul %16, %18, %cst_13 {dimension_numbers = #tpu.dot_dimension_numbers<[1], [0], [0], [1], [0, 0, 1, 1], [], []>} : vector<5x32xbf16>, vector<32x64xbf16>, vector<5x64xf32> -> vector<5x64xf32>
    %20 = arith.addf %15, %19 : vector<5x64xf32>
    %c0_14 = arith.constant 0 : index
    %c0_15 = arith.constant 0 : index
    %21 = vector.load %arg3[%c0_14, %c0_15] : memref<1x64xf32, #tpu.memory_space<vmem>>, vector<1x64xf32>
    %22 = vector.broadcast %21 : vector<1x64xf32> to vector<5x64xf32>
    %23 = arith.addf %20, %22 : vector<5x64xf32>
    %cst_16 = arith.constant 0.000000e+00 : f32
    %24 = vector.broadcast %cst_16 : f32 to vector<5x64xf32>
    %25 = arith.maximumf %23, %24 : vector<5x64xf32>
    %26 = arith.truncf %25 : vector<5x64xf32> to vector<5x64xbf16>
    %c0_17 = arith.constant 0 : index
    %c0_18 = arith.constant 0 : index
    %c0_19 = arith.constant 0 : index
    %27 = vector.load %arg4[%c0_17, %c0_18, %c0_19] : memref<1x5x64xbf16, #tpu.memory_space<vmem>>, vector<1x5x64xbf16>
    %28 = vector.shape_cast %27 : vector<1x5x64xbf16> to vector<5x64xbf16>
    %29 = vector.shape_cast %26 : vector<5x64xbf16> to vector<1x5x64xbf16>
    tpu.vector_store %arg4[%c0_17, %c0_18, %c0_19], %29 {strides = array<i32>} : memref<1x5x64xbf16, #tpu.memory_space<vmem>>, vector<1x5x64xbf16>,
    return
  }
  func.func @transform_0(%arg0: i32) -> (i32, i32, i32) {
    %c0_i32 = arith.constant 0 : i32
    %c0_i32_0 = arith.constant 0 : i32
    %c0_i32_1 = arith.constant 0 : i32
    return %arg0, %c0_i32, %c0_i32_0 : i32, i32, i32
  }
  func.func @transform_1(%arg0: i32) -> (i32, i32, i32) {
    %c0_i32 = arith.constant 0 : i32
    %c0_i32_0 = arith.constant 0 : i32
    %c0_i32_1 = arith.constant 0 : i32
    %c0_i32_2 = arith.constant 0 : i32
    return %c0_i32, %c0_i32_0, %c0_i32_1 : i32, i32, i32
  }
  func.func @transform_2(%arg0: i32) -> (i32, i32) {
    %c0_i32 = arith.constant 0 : i32
    %c0_i32_0 = arith.constant 0 : i32
    %c0_i32_1 = arith.constant 0 : i32
    return %c0_i32, %c0_i32_0 : i32, i32
  }
  func.func @transform_3(%arg0: i32) -> (i32, i32, i32) {
    %c0_i32 = arith.constant 0 : i32
    %c0_i32_0 = arith.constant 0 : i32
    %c0_i32_1 = arith.constant 0 : i32
    return %arg0, %c0_i32, %c0_i32_0 : i32, i32, i32
  }
}

module attributes {stable_mosaic.version = 11 : i64} {
  func.func @_convt2x_kernel(%arg0: i32, %arg1: memref<1x25x16xbf16, #tpu.memory_space<vmem>>, %arg2: memref<4x16x32xbf16, #tpu.memory_space<vmem>>, %arg3: memref<1x32xf32, #tpu.memory_space<vmem>>, %arg4: memref<1x19x32xbf16, #tpu.memory_space<vmem>>) attributes {dimension_semantics = [#tpu.dimension_semantics<parallel>], iteration_bounds = array<i64: 2>, scalar_prefetch = 0 : i64, scratch_operands = 0 : i64, tpu.core_type = #tpu.core_type<tc>, window_params = [{transform_indices = @transform_0, window_bounds = array<i64: 1, 25, 16>}, {pipeline_mode = #tpu.pipeline_mode<synchronous>, transform_indices = @transform_1, window_bounds = array<i64: 4, 16, 32>}, {pipeline_mode = #tpu.pipeline_mode<synchronous>, transform_indices = @transform_2, window_bounds = array<i64: 1, 32>}, {transform_indices = @transform_3, window_bounds = array<i64: 1, 19, 32>}]} {
    %c0 = arith.constant 0 : index
    %c0_0 = arith.constant 0 : index
    %c0_1 = arith.constant 0 : index
    %0 = vector.load %arg1[%c0, %c0_0, %c0_1] : memref<1x25x16xbf16, #tpu.memory_space<vmem>>, vector<1x25x16xbf16>
    %1 = vector.shape_cast %0 : vector<1x25x16xbf16> to vector<25x16xbf16>
    %2 = vector.extract_strided_slice %1 {offsets = [0, 0], sizes = [19, 16], strides = [1, 1]} : vector<25x16xbf16> to vector<19x16xbf16>
    %c0_2 = arith.constant 0 : index
    %c0_3 = arith.constant 0 : index
    %c0_4 = arith.constant 0 : index
    %3 = vector.load %arg2[%c0_2, %c0_3, %c0_4] : memref<4x16x32xbf16, #tpu.memory_space<vmem>>, vector<1x16x32xbf16>
    %4 = vector.shape_cast %3 : vector<1x16x32xbf16> to vector<16x32xbf16>
    %cst = arith.constant dense<0.000000e+00> : vector<19x32xf32>
    %5 = tpu.matmul %2, %4, %cst {dimension_numbers = #tpu.dot_dimension_numbers<[1], [0], [0], [1], [0, 0, 1, 1], [], []>} : vector<19x16xbf16>, vector<16x32xbf16>, vector<19x32xf32> -> vector<19x32xf32>
    %6 = vector.extract_strided_slice %1 {offsets = [1, 0], sizes = [19, 16], strides = [1, 1]} : vector<25x16xbf16> to vector<19x16xbf16>
    %c1 = arith.constant 1 : index
    %c0_5 = arith.constant 0 : index
    %c0_6 = arith.constant 0 : index
    %7 = vector.load %arg2[%c1, %c0_5, %c0_6] : memref<4x16x32xbf16, #tpu.memory_space<vmem>>, vector<1x16x32xbf16>
    %8 = vector.shape_cast %7 : vector<1x16x32xbf16> to vector<16x32xbf16>
    %cst_7 = arith.constant dense<0.000000e+00> : vector<19x32xf32>
    %9 = tpu.matmul %6, %8, %cst_7 {dimension_numbers = #tpu.dot_dimension_numbers<[1], [0], [0], [1], [0, 0, 1, 1], [], []>} : vector<19x16xbf16>, vector<16x32xbf16>, vector<19x32xf32> -> vector<19x32xf32>
    %10 = arith.addf %5, %9 : vector<19x32xf32>
    %11 = vector.extract_strided_slice %1 {offsets = [5, 0], sizes = [19, 16], strides = [1, 1]} : vector<25x16xbf16> to vector<19x16xbf16>
    %c2 = arith.constant 2 : index
    %c0_8 = arith.constant 0 : index
    %c0_9 = arith.constant 0 : index
    %12 = vector.load %arg2[%c2, %c0_8, %c0_9] : memref<4x16x32xbf16, #tpu.memory_space<vmem>>, vector<1x16x32xbf16>
    %13 = vector.shape_cast %12 : vector<1x16x32xbf16> to vector<16x32xbf16>
    %cst_10 = arith.constant dense<0.000000e+00> : vector<19x32xf32>
    %14 = tpu.matmul %11, %13, %cst_10 {dimension_numbers = #tpu.dot_dimension_numbers<[1], [0], [0], [1], [0, 0, 1, 1], [], []>} : vector<19x16xbf16>, vector<16x32xbf16>, vector<19x32xf32> -> vector<19x32xf32>
    %15 = arith.addf %10, %14 : vector<19x32xf32>
    %16 = vector.extract_strided_slice %1 {offsets = [6, 0], sizes = [19, 16], strides = [1, 1]} : vector<25x16xbf16> to vector<19x16xbf16>
    %c3 = arith.constant 3 : index
    %c0_11 = arith.constant 0 : index
    %c0_12 = arith.constant 0 : index
    %17 = vector.load %arg2[%c3, %c0_11, %c0_12] : memref<4x16x32xbf16, #tpu.memory_space<vmem>>, vector<1x16x32xbf16>
    %18 = vector.shape_cast %17 : vector<1x16x32xbf16> to vector<16x32xbf16>
    %cst_13 = arith.constant dense<0.000000e+00> : vector<19x32xf32>
    %19 = tpu.matmul %16, %18, %cst_13 {dimension_numbers = #tpu.dot_dimension_numbers<[1], [0], [0], [1], [0, 0, 1, 1], [], []>} : vector<19x16xbf16>, vector<16x32xbf16>, vector<19x32xf32> -> vector<19x32xf32>
    %20 = arith.addf %15, %19 : vector<19x32xf32>
    %c0_14 = arith.constant 0 : index
    %c0_15 = arith.constant 0 : index
    %21 = vector.load %arg3[%c0_14, %c0_15] : memref<1x32xf32, #tpu.memory_space<vmem>>, vector<1x32xf32>
    %22 = vector.broadcast %21 : vector<1x32xf32> to vector<19x32xf32>
    %23 = arith.addf %20, %22 : vector<19x32xf32>
    %cst_16 = arith.constant 0.000000e+00 : f32
    %24 = vector.broadcast %cst_16 : f32 to vector<19x32xf32>
    %25 = arith.maximumf %23, %24 : vector<19x32xf32>
    %26 = arith.truncf %25 : vector<19x32xf32> to vector<19x32xbf16>
    %c0_17 = arith.constant 0 : index
    %c0_18 = arith.constant 0 : index
    %c0_19 = arith.constant 0 : index
    %27 = vector.load %arg4[%c0_17, %c0_18, %c0_19] : memref<1x19x32xbf16, #tpu.memory_space<vmem>>, vector<1x19x32xbf16>
    %28 = vector.shape_cast %27 : vector<1x19x32xbf16> to vector<19x32xbf16>
    %29 = vector.shape_cast %26 : vector<19x32xbf16> to vector<1x19x32xbf16>
    tpu.vector_store %arg4[%c0_17, %c0_18, %c0_19], %29 {strides = array<i32>} : memref<1x19x32xbf16, #tpu.memory_space<vmem>>, vector<1x19x32xbf16>,
    return
  }
  func.func @transform_0(%arg0: i32) -> (i32, i32, i32) {
    %c0_i32 = arith.constant 0 : i32
    %c0_i32_0 = arith.constant 0 : i32
    %c0_i32_1 = arith.constant 0 : i32
    return %arg0, %c0_i32, %c0_i32_0 : i32, i32, i32
  }
  func.func @transform_1(%arg0: i32) -> (i32, i32, i32) {
    %c0_i32 = arith.constant 0 : i32
    %c0_i32_0 = arith.constant 0 : i32
    %c0_i32_1 = arith.constant 0 : i32
    %c0_i32_2 = arith.constant 0 : i32
    return %c0_i32, %c0_i32_0, %c0_i32_1 : i32, i32, i32
  }
  func.func @transform_2(%arg0: i32) -> (i32, i32) {
    %c0_i32 = arith.constant 0 : i32
    %c0_i32_0 = arith.constant 0 : i32
    %c0_i32_1 = arith.constant 0 : i32
    return %c0_i32, %c0_i32_0 : i32, i32
  }
  func.func @transform_3(%arg0: i32) -> (i32, i32, i32) {
    %c0_i32 = arith.constant 0 : i32
    %c0_i32_0 = arith.constant 0 : i32
    %c0_i32_1 = arith.constant 0 : i32
    return %arg0, %c0_i32, %c0_i32_0 : i32, i32, i32
  }
}

module attributes {stable_mosaic.version = 11 : i64} {
  func.func @_convt2x_kernel(%arg0: i32, %arg1: memref<1x81x8xbf16, #tpu.memory_space<vmem>>, %arg2: memref<4x8x32xbf16, #tpu.memory_space<vmem>>, %arg3: memref<1x32xf32, #tpu.memory_space<vmem>>, %arg4: memref<1x71x32xbf16, #tpu.memory_space<vmem>>) attributes {dimension_semantics = [#tpu.dimension_semantics<parallel>], iteration_bounds = array<i64: 2>, scalar_prefetch = 0 : i64, scratch_operands = 0 : i64, tpu.core_type = #tpu.core_type<tc>, window_params = [{transform_indices = @transform_0, window_bounds = array<i64: 1, 81, 8>}, {pipeline_mode = #tpu.pipeline_mode<synchronous>, transform_indices = @transform_1, window_bounds = array<i64: 4, 8, 32>}, {pipeline_mode = #tpu.pipeline_mode<synchronous>, transform_indices = @transform_2, window_bounds = array<i64: 1, 32>}, {transform_indices = @transform_3, window_bounds = array<i64: 1, 71, 32>}]} {
    %c0 = arith.constant 0 : index
    %c0_0 = arith.constant 0 : index
    %c0_1 = arith.constant 0 : index
    %0 = vector.load %arg1[%c0, %c0_0, %c0_1] : memref<1x81x8xbf16, #tpu.memory_space<vmem>>, vector<1x81x8xbf16>
    %1 = vector.shape_cast %0 : vector<1x81x8xbf16> to vector<81x8xbf16>
    %2 = vector.extract_strided_slice %1 {offsets = [0, 0], sizes = [71, 8], strides = [1, 1]} : vector<81x8xbf16> to vector<71x8xbf16>
    %c0_2 = arith.constant 0 : index
    %c0_3 = arith.constant 0 : index
    %c0_4 = arith.constant 0 : index
    %3 = vector.load %arg2[%c0_2, %c0_3, %c0_4] : memref<4x8x32xbf16, #tpu.memory_space<vmem>>, vector<1x8x32xbf16>
    %4 = vector.shape_cast %3 : vector<1x8x32xbf16> to vector<8x32xbf16>
    %cst = arith.constant dense<0.000000e+00> : vector<71x32xf32>
    %5 = tpu.matmul %2, %4, %cst {dimension_numbers = #tpu.dot_dimension_numbers<[1], [0], [0], [1], [0, 0, 1, 1], [], []>} : vector<71x8xbf16>, vector<8x32xbf16>, vector<71x32xf32> -> vector<71x32xf32>
    %6 = vector.extract_strided_slice %1 {offsets = [1, 0], sizes = [71, 8], strides = [1, 1]} : vector<81x8xbf16> to vector<71x8xbf16>
    %c1 = arith.constant 1 : index
    %c0_5 = arith.constant 0 : index
    %c0_6 = arith.constant 0 : index
    %7 = vector.load %arg2[%c1, %c0_5, %c0_6] : memref<4x8x32xbf16, #tpu.memory_space<vmem>>, vector<1x8x32xbf16>
    %8 = vector.shape_cast %7 : vector<1x8x32xbf16> to vector<8x32xbf16>
    %cst_7 = arith.constant dense<0.000000e+00> : vector<71x32xf32>
    %9 = tpu.matmul %6, %8, %cst_7 {dimension_numbers = #tpu.dot_dimension_numbers<[1], [0], [0], [1], [0, 0, 1, 1], [], []>} : vector<71x8xbf16>, vector<8x32xbf16>, vector<71x32xf32> -> vector<71x32xf32>
    %10 = arith.addf %5, %9 : vector<71x32xf32>
    %11 = vector.extract_strided_slice %1 {offsets = [9, 0], sizes = [71, 8], strides = [1, 1]} : vector<81x8xbf16> to vector<71x8xbf16>
    %c2 = arith.constant 2 : index
    %c0_8 = arith.constant 0 : index
    %c0_9 = arith.constant 0 : index
    %12 = vector.load %arg2[%c2, %c0_8, %c0_9] : memref<4x8x32xbf16, #tpu.memory_space<vmem>>, vector<1x8x32xbf16>
    %13 = vector.shape_cast %12 : vector<1x8x32xbf16> to vector<8x32xbf16>
    %cst_10 = arith.constant dense<0.000000e+00> : vector<71x32xf32>
    %14 = tpu.matmul %11, %13, %cst_10 {dimension_numbers = #tpu.dot_dimension_numbers<[1], [0], [0], [1], [0, 0, 1, 1], [], []>} : vector<71x8xbf16>, vector<8x32xbf16>, vector<71x32xf32> -> vector<71x32xf32>
    %15 = arith.addf %10, %14 : vector<71x32xf32>
    %16 = vector.extract_strided_slice %1 {offsets = [10, 0], sizes = [71, 8], strides = [1, 1]} : vector<81x8xbf16> to vector<71x8xbf16>
    %c3 = arith.constant 3 : index
    %c0_11 = arith.constant 0 : index
    %c0_12 = arith.constant 0 : index
    %17 = vector.load %arg2[%c3, %c0_11, %c0_12] : memref<4x8x32xbf16, #tpu.memory_space<vmem>>, vector<1x8x32xbf16>
    %18 = vector.shape_cast %17 : vector<1x8x32xbf16> to vector<8x32xbf16>
    %cst_13 = arith.constant dense<0.000000e+00> : vector<71x32xf32>
    %19 = tpu.matmul %16, %18, %cst_13 {dimension_numbers = #tpu.dot_dimension_numbers<[1], [0], [0], [1], [0, 0, 1, 1], [], []>} : vector<71x8xbf16>, vector<8x32xbf16>, vector<71x32xf32> -> vector<71x32xf32>
    %20 = arith.addf %15, %19 : vector<71x32xf32>
    %c0_14 = arith.constant 0 : index
    %c0_15 = arith.constant 0 : index
    %21 = vector.load %arg3[%c0_14, %c0_15] : memref<1x32xf32, #tpu.memory_space<vmem>>, vector<1x32xf32>
    %22 = vector.broadcast %21 : vector<1x32xf32> to vector<71x32xf32>
    %23 = arith.addf %20, %22 : vector<71x32xf32>
    %cst_16 = arith.constant 0.000000e+00 : f32
    %24 = vector.broadcast %cst_16 : f32 to vector<71x32xf32>
    %25 = arith.maximumf %23, %24 : vector<71x32xf32>
    %26 = arith.truncf %25 : vector<71x32xf32> to vector<71x32xbf16>
    %c0_17 = arith.constant 0 : index
    %c0_18 = arith.constant 0 : index
    %c0_19 = arith.constant 0 : index
    %27 = vector.load %arg4[%c0_17, %c0_18, %c0_19] : memref<1x71x32xbf16, #tpu.memory_space<vmem>>, vector<1x71x32xbf16>
    %28 = vector.shape_cast %27 : vector<1x71x32xbf16> to vector<71x32xbf16>
    %29 = vector.shape_cast %26 : vector<71x32xbf16> to vector<1x71x32xbf16>
    tpu.vector_store %arg4[%c0_17, %c0_18, %c0_19], %29 {strides = array<i32>} : memref<1x71x32xbf16, #tpu.memory_space<vmem>>, vector<1x71x32xbf16>,
    return
  }
  func.func @transform_0(%arg0: i32) -> (i32, i32, i32) {
    %c0_i32 = arith.constant 0 : i32
    %c0_i32_0 = arith.constant 0 : i32
    %c0_i32_1 = arith.constant 0 : i32
    return %arg0, %c0_i32, %c0_i32_0 : i32, i32, i32
  }
  func.func @transform_1(%arg0: i32) -> (i32, i32, i32) {
    %c0_i32 = arith.constant 0 : i32
    %c0_i32_0 = arith.constant 0 : i32
    %c0_i32_1 = arith.constant 0 : i32
    %c0_i32_2 = arith.constant 0 : i32
    return %c0_i32, %c0_i32_0, %c0_i32_1 : i32, i32, i32
  }
  func.func @transform_2(%arg0: i32) -> (i32, i32) {
    %c0_i32 = arith.constant 0 : i32
    %c0_i32_0 = arith.constant 0 : i32
    %c0_i32_1 = arith.constant 0 : i32
    return %c0_i32, %c0_i32_0 : i32, i32
  }
  func.func @transform_3(%arg0: i32) -> (i32, i32, i32) {
    %c0_i32 = arith.constant 0 : i32
    %c0_i32_0 = arith.constant 0 : i32
    %c0_i32_1 = arith.constant 0 : i32
    return %arg0, %c0_i32, %c0_i32_0 : i32, i32, i32
  }
}

module attributes {stable_mosaic.version = 11 : i64} {
  func.func @_conv3x3_sigmoid_kernel(%arg0: i32, %arg1: memref<1x324x8xbf16, #tpu.memory_space<vmem>>, %arg2: memref<9x8x4xbf16, #tpu.memory_space<vmem>>, %arg3: memref<1x4xf32, #tpu.memory_space<vmem>>, %arg4: memref<1x286x4xf32, #tpu.memory_space<vmem>>, %arg5: memref<1x286x4xf32, #tpu.memory_space<vmem>>) attributes {dimension_semantics = [#tpu.dimension_semantics<parallel>], iteration_bounds = array<i64: 2>, scalar_prefetch = 0 : i64, scratch_operands = 0 : i64, tpu.core_type = #tpu.core_type<tc>, window_params = [{transform_indices = @transform_0, window_bounds = array<i64: 1, 324, 8>}, {pipeline_mode = #tpu.pipeline_mode<synchronous>, transform_indices = @transform_1, window_bounds = array<i64: 9, 8, 4>}, {pipeline_mode = #tpu.pipeline_mode<synchronous>, transform_indices = @transform_2, window_bounds = array<i64: 1, 4>}, {transform_indices = @transform_3, window_bounds = array<i64: 1, 286, 4>}, {transform_indices = @transform_4, window_bounds = array<i64: 1, 286, 4>}]} {
    %c0 = arith.constant 0 : index
    %c0_0 = arith.constant 0 : index
    %c0_1 = arith.constant 0 : index
    %0 = vector.load %arg1[%c0, %c0_0, %c0_1] : memref<1x324x8xbf16, #tpu.memory_space<vmem>>, vector<1x324x8xbf16>
    %1 = vector.shape_cast %0 : vector<1x324x8xbf16> to vector<324x8xbf16>
    %2 = vector.extract_strided_slice %1 {offsets = [0, 0], sizes = [286, 8], strides = [1, 1]} : vector<324x8xbf16> to vector<286x8xbf16>
    %c0_2 = arith.constant 0 : index
    %c0_3 = arith.constant 0 : index
    %c0_4 = arith.constant 0 : index
    %3 = vector.load %arg2[%c0_2, %c0_3, %c0_4] : memref<9x8x4xbf16, #tpu.memory_space<vmem>>, vector<1x8x4xbf16>
    %4 = vector.shape_cast %3 : vector<1x8x4xbf16> to vector<8x4xbf16>
    %cst = arith.constant dense<0.000000e+00> : vector<286x4xf32>
    %5 = tpu.matmul %2, %4, %cst {dimension_numbers = #tpu.dot_dimension_numbers<[1], [0], [0], [1], [0, 0, 1, 1], [], []>} : vector<286x8xbf16>, vector<8x4xbf16>, vector<286x4xf32> -> vector<286x4xf32>
    %6 = vector.extract_strided_slice %1 {offsets = [1, 0], sizes = [286, 8], strides = [1, 1]} : vector<324x8xbf16> to vector<286x8xbf16>
    %c1 = arith.constant 1 : index
    %c0_5 = arith.constant 0 : index
    %c0_6 = arith.constant 0 : index
    %7 = vector.load %arg2[%c1, %c0_5, %c0_6] : memref<9x8x4xbf16, #tpu.memory_space<vmem>>, vector<1x8x4xbf16>
    %8 = vector.shape_cast %7 : vector<1x8x4xbf16> to vector<8x4xbf16>
    %cst_7 = arith.constant dense<0.000000e+00> : vector<286x4xf32>
    %9 = tpu.matmul %6, %8, %cst_7 {dimension_numbers = #tpu.dot_dimension_numbers<[1], [0], [0], [1], [0, 0, 1, 1], [], []>} : vector<286x8xbf16>, vector<8x4xbf16>, vector<286x4xf32> -> vector<286x4xf32>
    %10 = arith.addf %5, %9 : vector<286x4xf32>
    %11 = vector.extract_strided_slice %1 {offsets = [2, 0], sizes = [286, 8], strides = [1, 1]} : vector<324x8xbf16> to vector<286x8xbf16>
    %c2 = arith.constant 2 : index
    %c0_8 = arith.constant 0 : index
    %c0_9 = arith.constant 0 : index
    %12 = vector.load %arg2[%c2, %c0_8, %c0_9] : memref<9x8x4xbf16, #tpu.memory_space<vmem>>, vector<1x8x4xbf16>
    %13 = vector.shape_cast %12 : vector<1x8x4xbf16> to vector<8x4xbf16>
    %cst_10 = arith.constant dense<0.000000e+00> : vector<286x4xf32>
    %14 = tpu.matmul %11, %13, %cst_10 {dimension_numbers = #tpu.dot_dimension_numbers<[1], [0], [0], [1], [0, 0, 1, 1], [], []>} : vector<286x8xbf16>, vector<8x4xbf16>, vector<286x4xf32> -> vector<286x4xf32>
    %15 = arith.addf %10, %14 : vector<286x4xf32>
    %16 = vector.extract_strided_slice %1 {offsets = [18, 0], sizes = [286, 8], strides = [1, 1]} : vector<324x8xbf16> to vector<286x8xbf16>
    %c3 = arith.constant 3 : index
    %c0_11 = arith.constant 0 : index
    %c0_12 = arith.constant 0 : index
    %17 = vector.load %arg2[%c3, %c0_11, %c0_12] : memref<9x8x4xbf16, #tpu.memory_space<vmem>>, vector<1x8x4xbf16>
    %18 = vector.shape_cast %17 : vector<1x8x4xbf16> to vector<8x4xbf16>
    %cst_13 = arith.constant dense<0.000000e+00> : vector<286x4xf32>
    %19 = tpu.matmul %16, %18, %cst_13 {dimension_numbers = #tpu.dot_dimension_numbers<[1], [0], [0], [1], [0, 0, 1, 1], [], []>} : vector<286x8xbf16>, vector<8x4xbf16>, vector<286x4xf32> -> vector<286x4xf32>
    %20 = arith.addf %15, %19 : vector<286x4xf32>
    %21 = vector.extract_strided_slice %1 {offsets = [19, 0], sizes = [286, 8], strides = [1, 1]} : vector<324x8xbf16> to vector<286x8xbf16>
    %c4 = arith.constant 4 : index
    %c0_14 = arith.constant 0 : index
    %c0_15 = arith.constant 0 : index
    %22 = vector.load %arg2[%c4, %c0_14, %c0_15] : memref<9x8x4xbf16, #tpu.memory_space<vmem>>, vector<1x8x4xbf16>
    %23 = vector.shape_cast %22 : vector<1x8x4xbf16> to vector<8x4xbf16>
    %cst_16 = arith.constant dense<0.000000e+00> : vector<286x4xf32>
    %24 = tpu.matmul %21, %23, %cst_16 {dimension_numbers = #tpu.dot_dimension_numbers<[1], [0], [0], [1], [0, 0, 1, 1], [], []>} : vector<286x8xbf16>, vector<8x4xbf16>, vector<286x4xf32> -> vector<286x4xf32>
    %25 = arith.addf %20, %24 : vector<286x4xf32>
    %26 = vector.extract_strided_slice %1 {offsets = [20, 0], sizes = [286, 8], strides = [1, 1]} : vector<324x8xbf16> to vector<286x8xbf16>
    %c5 = arith.constant 5 : index
    %c0_17 = arith.constant 0 : index
    %c0_18 = arith.constant 0 : index
    %27 = vector.load %arg2[%c5, %c0_17, %c0_18] : memref<9x8x4xbf16, #tpu.memory_space<vmem>>, vector<1x8x4xbf16>
    %28 = vector.shape_cast %27 : vector<1x8x4xbf16> to vector<8x4xbf16>
    %cst_19 = arith.constant dense<0.000000e+00> : vector<286x4xf32>
    %29 = tpu.matmul %26, %28, %cst_19 {dimension_numbers = #tpu.dot_dimension_numbers<[1], [0], [0], [1], [0, 0, 1, 1], [], []>} : vector<286x8xbf16>, vector<8x4xbf16>, vector<286x4xf32> -> vector<286x4xf32>
    %30 = arith.addf %25, %29 : vector<286x4xf32>
    %31 = vector.extract_strided_slice %1 {offsets = [36, 0], sizes = [286, 8], strides = [1, 1]} : vector<324x8xbf16> to vector<286x8xbf16>
    %c6 = arith.constant 6 : index
    %c0_20 = arith.constant 0 : index
    %c0_21 = arith.constant 0 : index
    %32 = vector.load %arg2[%c6, %c0_20, %c0_21] : memref<9x8x4xbf16, #tpu.memory_space<vmem>>, vector<1x8x4xbf16>
    %33 = vector.shape_cast %32 : vector<1x8x4xbf16> to vector<8x4xbf16>
    %cst_22 = arith.constant dense<0.000000e+00> : vector<286x4xf32>
    %34 = tpu.matmul %31, %33, %cst_22 {dimension_numbers = #tpu.dot_dimension_numbers<[1], [0], [0], [1], [0, 0, 1, 1], [], []>} : vector<286x8xbf16>, vector<8x4xbf16>, vector<286x4xf32> -> vector<286x4xf32>
    %35 = arith.addf %30, %34 : vector<286x4xf32>
    %36 = vector.extract_strided_slice %1 {offsets = [37, 0], sizes = [286, 8], strides = [1, 1]} : vector<324x8xbf16> to vector<286x8xbf16>
    %c7 = arith.constant 7 : index
    %c0_23 = arith.constant 0 : index
    %c0_24 = arith.constant 0 : index
    %37 = vector.load %arg2[%c7, %c0_23, %c0_24] : memref<9x8x4xbf16, #tpu.memory_space<vmem>>, vector<1x8x4xbf16>
    %38 = vector.shape_cast %37 : vector<1x8x4xbf16> to vector<8x4xbf16>
    %cst_25 = arith.constant dense<0.000000e+00> : vector<286x4xf32>
    %39 = tpu.matmul %36, %38, %cst_25 {dimension_numbers = #tpu.dot_dimension_numbers<[1], [0], [0], [1], [0, 0, 1, 1], [], []>} : vector<286x8xbf16>, vector<8x4xbf16>, vector<286x4xf32> -> vector<286x4xf32>
    %40 = arith.addf %35, %39 : vector<286x4xf32>
    %41 = vector.extract_strided_slice %1 {offsets = [38, 0], sizes = [286, 8], strides = [1, 1]} : vector<324x8xbf16> to vector<286x8xbf16>
    %c8 = arith.constant 8 : index
    %c0_26 = arith.constant 0 : index
    %c0_27 = arith.constant 0 : index
    %42 = vector.load %arg2[%c8, %c0_26, %c0_27] : memref<9x8x4xbf16, #tpu.memory_space<vmem>>, vector<1x8x4xbf16>
    %43 = vector.shape_cast %42 : vector<1x8x4xbf16> to vector<8x4xbf16>
    %cst_28 = arith.constant dense<0.000000e+00> : vector<286x4xf32>
    %44 = tpu.matmul %41, %43, %cst_28 {dimension_numbers = #tpu.dot_dimension_numbers<[1], [0], [0], [1], [0, 0, 1, 1], [], []>} : vector<286x8xbf16>, vector<8x4xbf16>, vector<286x4xf32> -> vector<286x4xf32>
    %45 = arith.addf %40, %44 : vector<286x4xf32>
    %c0_29 = arith.constant 0 : index
    %c0_30 = arith.constant 0 : index
    %46 = vector.load %arg3[%c0_29, %c0_30] : memref<1x4xf32, #tpu.memory_space<vmem>>, vector<1x4xf32>
    %47 = vector.broadcast %46 : vector<1x4xf32> to vector<286x4xf32>
    %48 = arith.addf %45, %47 : vector<286x4xf32>
    %c0_31 = arith.constant 0 : index
    %c0_32 = arith.constant 0 : index
    %c0_33 = arith.constant 0 : index
    %49 = vector.load %arg4[%c0_31, %c0_32, %c0_33] : memref<1x286x4xf32, #tpu.memory_space<vmem>>, vector<1x286x4xf32>
    %50 = vector.shape_cast %49 : vector<1x286x4xf32> to vector<286x4xf32>
    %51 = vector.shape_cast %48 : vector<286x4xf32> to vector<1x286x4xf32>
    tpu.vector_store %arg4[%c0_31, %c0_32, %c0_33], %51 {strides = array<i32>} : memref<1x286x4xf32, #tpu.memory_space<vmem>>, vector<1x286x4xf32>,
    %cst_34 = arith.constant 0.000000e+00 : f32
    %52 = vector.broadcast %cst_34 : f32 to vector<286x4xf32>
    %53 = arith.subf %52, %48 : vector<286x4xf32>
    %54 = math.exp %53 : vector<286x4xf32>
    %cst_35 = arith.constant 1.000000e+00 : f32
    %55 = vector.broadcast %cst_35 : f32 to vector<286x4xf32>
    %56 = arith.addf %55, %54 : vector<286x4xf32>
    %cst_36 = arith.constant 1.000000e+00 : f32
    %57 = vector.broadcast %cst_36 : f32 to vector<286x4xf32>
    %58 = arith.divf %57, %56 : vector<286x4xf32>
    %c0_37 = arith.constant 0 : index
    %c0_38 = arith.constant 0 : index
    %c0_39 = arith.constant 0 : index
    %59 = vector.load %arg5[%c0_37, %c0_38, %c0_39] : memref<1x286x4xf32, #tpu.memory_space<vmem>>, vector<1x286x4xf32>
    %60 = vector.shape_cast %59 : vector<1x286x4xf32> to vector<286x4xf32>
    %61 = vector.shape_cast %58 : vector<286x4xf32> to vector<1x286x4xf32>
    tpu.vector_store %arg5[%c0_37, %c0_38, %c0_39], %61 {strides = array<i32>} : memref<1x286x4xf32, #tpu.memory_space<vmem>>, vector<1x286x4xf32>,
    return
  }
  func.func @transform_0(%arg0: i32) -> (i32, i32, i32) {
    %c0_i32 = arith.constant 0 : i32
    %c0_i32_0 = arith.constant 0 : i32
    %c0_i32_1 = arith.constant 0 : i32
    return %arg0, %c0_i32, %c0_i32_0 : i32, i32, i32
  }
  func.func @transform_1(%arg0: i32) -> (i32, i32, i32) {
    %c0_i32 = arith.constant 0 : i32
    %c0_i32_0 = arith.constant 0 : i32
    %c0_i32_1 = arith.constant 0 : i32
    %c0_i32_2 = arith.constant 0 : i32
    return %c0_i32, %c0_i32_0, %c0_i32_1 : i32, i32, i32
  }
  func.func @transform_2(%arg0: i32) -> (i32, i32) {
    %c0_i32 = arith.constant 0 : i32
    %c0_i32_0 = arith.constant 0 : i32
    %c0_i32_1 = arith.constant 0 : i32
    return %c0_i32, %c0_i32_0 : i32, i32
  }
  func.func @transform_3(%arg0: i32) -> (i32, i32, i32) {
    %c0_i32 = arith.constant 0 : i32
    %c0_i32_0 = arith.constant 0 : i32
    %c0_i32_1 = arith.constant 0 : i32
    return %arg0, %c0_i32, %c0_i32_0 : i32, i32, i32
  }
  func.func @transform_4(%arg0: i32) -> (i32, i32, i32) {
    %c0_i32 = arith.constant 0 : i32
    %c0_i32_0 = arith.constant 0 : i32
    %c0_i32_1 = arith.constant 0 : i32
    return %arg0, %c0_i32, %c0_i32_0 : i32, i32, i32
  }
}

</mosaic_0001>

<bundles_post_ra>
// kernel: decoder_forward.5
= control target key start
LH: loop header
LB: loop body
LE: loop exit
PB: predicated region body
PF: predicated region fallthrough
CT: control target
= control target key end

     0   :  { %vm28_vm0 = vcmask 1043456   ;;  %v91_v0 = vmov 0.0   ;;  %vm92_vm1 = vmmov 0   ;;  %vm24_vm2 = vcmask 64512   ;;  %s125_s1 = inlined_call_operand.vmem [shape: bf16[8,128], index: 1, kind: input, shape index: {}]   ;;  %s126_s0 = inlined_call_operand.vmem [shape: bf16[2,8], index: 0, kind: input, shape index: {}]   ;;  %s127_s2 = inlined_call_operand.vmem [shape: f32[1,128], index: 2, kind: input, shape index: {}]   ;;  %s128_s3 = inlined_call_operand.vmem [shape: bf16[2,128], index: 3, kind: output, shape index: {}]  }
   0x1   :  { %83 = vmatprep.subr.bf16.mxu0 %v91_v0  ;;  %v16_v1 = vld [vmem:[%s125_s1] sm:$0xf]  ;;  %85 = vmatprep.mubr.msk.bf16.mxu0 %vm92_vm1, %v91_v0 }
   0x2   :  { %v30_v2 = vsel %vm28_vm0, %v16_v1, 0  ;;  %v15_v3 = vld [vmem:[%s126_s0] sm:$0x1] }
   0x3   :  { %84 = vmatpush3.bf16.msra.mxu0 %v30_v2  ;;  %v79_v4 = vld [vmem:[%s127_s2] ss:$0 sm:$0xff] }
   0x6   :  { %86 = vmatmul.mubr.msk.bf16.vlgmr.msra.gmra.mrb[0].mxu0 %vm24_vm2, %v15_v3 }
  0xd9   :  { %v66_v5 = vpop.f32.mrb[0].mxu0 }
  0xda   :  { %v67_v6 = vadd.f32 %v79_v4, %v66_v5  ;;  %v87_v7 = vpop.f32.mrb[1].mxu0 }
  0xdb   :  { %v69_v8 = vpop.f32.mrb[2].mxu0 }
  0xdc   :  { %v72_v9 = vmax.f32 %v67_v6, 0.0  ;;  %v88_v10 = vpop.f32.mrb[3].mxu0 }
  0xde   :  { %v73_v11 = vpack.c.bf16 %v72_v9, %v72_v9 }
  0xe0   :  { %74 = vst [vmem:[%s128_s3] sm:$0x1] %v73_v11 }

// kernel: decoder_forward.6
= control target key start
LH: loop header
LB: loop body
LE: loop exit
PB: predicated region body
PF: predicated region fallthrough
CT: control target
= control target key end

     0   :  { %s632_s12 = smov 0   ;;  %s688_s0 = inlined_call_operand.vmem [shape: bf16[2,9,32], index: 0, kind: input, shape index: {}]   ;;  %s689_s1 = inlined_call_operand.vmem [shape: bf16[4,32,64], index: 1, kind: input, shape index: {}]   ;;  %s690_s2 = inlined_call_operand.vmem [shape: f32[1,64], index: 2, kind: input, shape index: {}]   ;;  %s691_s3 = inlined_call_operand.vmem [shape: bf16[2,5,64], index: 3, kind: output, shape index: {}]  }
   0x1 LB: > { %s500_s13 = sadd.s32 4294967295, %s608_s12   ;;  %p504_p0 = scmp.ge.s32.totalorder %s608_s12, 1  ;;  %s608_s12 = sphi %s632_s12, %s13_s12  }
   0x2   : > { %p137_p1 = scmp.lt.s32.totalorder %s608_s12, 3 }
   0x4   : > { %p138_p2 = pnand %p504_p0, %p137_p1 }
   0x5   : > { %v592_v0 = vld [vmem:[%s689_s1 + $0x10] sm:$0xff] (!%p138_p2)   ;;  %v610_v1 = vmov (!%p138_p2), 0.0   ;;  %v593_v2 = vld [vmem:[%s689_s1] sm:$0xff] (!%p138_p2)   ;;  %v594_v3 = vld [vmem:[%s689_s1 + $0x18] sm:$0xff] (!%p138_p2)   ;;  %vm611_vm0 = vmmov (!%p138_p2), 0   ;;  %p160_p3 = scmp.lt.s32.totalorder (!%p138_p2), %s500_s13, 1 }
   0x6   : > { %141 = sbr.rel (%p138_p2) target bundleno = 257 (0x101), region = 32  ;;  %550 = vmatprep.subr.bf16.mxu0 (!%p138_p2), %v610_v1  ;;  %558 = vmatprep.subr.bf16.mxu1 (!%p138_p2), %v610_v1  ;;  %v595_v4 = vld [vmem:[%s689_s1 + $0x8] sm:$0xff] (!%p138_p2)   ;;  %vm203_vm1 = vcmask (!%p138_p2), 261120   ;;  %v599_v5 = vld [vmem:[%s689_s1 + $0x30] sm:$0xff] (!%p138_p2)   ;;  %v601_v12 = vld [vmem:[%s689_s1 + $0x38] sm:$0xff] (!%p138_p2)   ;;  %vm441_vm2 = vcmask (!%p138_p2), 518144  }
   0x7   : > { %551 = vmatpush3.bf16.msra.mxu0 (!%p138_p2), %v592_v0  ;;  %562 = vmatprep.mubr.msk.bf16.mxu1 (!%p138_p2), %vm611_vm0, %v610_v1  ;;  %v598_v14 = vld [vmem:[%s689_s1 + $0x20] sm:$0xff] (!%p138_p2)   ;;  %v600_v19 = vld [vmem:[%s689_s1 + $0x28] sm:$0xff] (!%p138_p2)   ;;  %vm442_vm3 = vsmask.f32 (!%p138_p2), 2304 }
   0x8   : > { %559 = vmatpush3.bf16.msra.mxu1 (!%p138_p2), %v593_v2  ;;  %552 = vmatprep.subr.bf16.mxu0 (!%p138_p2), %v610_v1  ;;  %v534_v37 = vld [vmem:[%s690_s2] ss:$0 sm:$0xff] (!%p138_p2)  ;;  %vm443_vm4 = vmand (!%p138_p2), %vm441_vm2, %vm442_vm3 }
   0x9   : > { %560 = vmatprep.subr.bf16.mxu1 (!%p138_p2), %v610_v1  ;;  %554 = vmatprep.mubr.msk.bf16.mxu0 (!%p138_p2), %vm611_vm0, %v610_v1 }
   0xb   : > { %553 = vmatpush3.bf16.msra.mxu0 (!%p138_p2), %v594_v3 }
   0xc   : > { %561 = vmatpush3.bf16.msra.mxu1 (!%p138_p2), %v595_v4  ;;  %566 = vmatprep.subr.bf16.mxu0 (!%p138_p2), %v610_v1 }
   0xd   : > { %s693_s13 = smov (!%p160_p3, %s500_s13), 1  ;;  %574 = vmatprep.subr.bf16.mxu1 %v610_v1 }
   0xe   : > { %s537_s22 = sshll.u32 %s693_s13, 3  ;;  %s507_s7 = sshll.u32 %s693_s13, 2 }
   0xf   : > { %s164_s25 = scalar_lea.vmem %s688_s0, %s537_s22  ;;  %s168_s14 = scalar_lea.vmem %s691_s3, %s507_s7 }
  0x10   : > { %v170_v6 = vld [vmem:[%s164_s25] sm:$0xf]  ;;  %v171_v7 = vld [vmem:[%s164_s25 + $0x4] sm:$0x1] }
  0x11   : > { %v512_v8 = vcombine.low %v170_v6, %v170_v6  ;;  %563 = vmatmul.mubr.msk.bf16.vlgmr.msra.gmra.mrb[0].mxu1 %vm203_vm1, %v170_v6  ;;  %v530_v11 = vcombine.low %v170_v6, %v171_v7  ;;  %v444_v43 = vld [vmem:[%s168_s14] sm:$0x7] }
  0x12   : > { %575 = vmatpush3.bf16.msra.mxu1 %v599_v5  ;;  %578 = vmatprep.mubr.msk.bf16.mxu1 %vm611_vm0, %v610_v1 }
  0x13   : > { %v185_v9 = vshrl.u32 %v512_v8, 16  ;;  %v187_v10 = vshll.u32 %v512_v8, 16  ;;  %576 = vmatprep.subr.bf16.mxu1 %v610_v1  ;;  %v374_v15 = vrot.slane %v530_v11, 2 }
  0x15   : > { %v189_v13 = vrot.slane %v187_v10, 1  ;;  %v307_v17 = vrot.slane %v185_v9, 1  ;;  %v308_v18 = vrot.slane %v187_v10, 2 }
  0x16   : > { %577 = vmatpush3.bf16.msra.mxu1 %v601_v12 }
  0x17   : > { %v190_v16 = vor.u32 %v189_v13, %v185_v9  ;;  %v309_v20 = vor.u32 %v308_v18, %v307_v17 }
  0x19   : > { %555 = vmatmul.mubr.msk.bf16.vlgmr.msra.gmra.mrb[0].mxu0 %vm203_vm1, %v190_v16  ;;  %579 = vmatmul.mubr.msk.bf16.vlgmr.msra.gmra.mrb[4].mxu1 %vm203_vm1, %v374_v15 }
  0x1a   : > { %567 = vmatpush3.bf16.msra.mxu0 %v598_v14  ;;  %570 = vmatprep.mubr.msk.bf16.mxu0 %vm611_vm0, %v610_v1 }
  0x1b   : > { %568 = vmatprep.subr.bf16.mxu0 %v610_v1 }
  0x1e   : > { %569 = vmatpush3.bf16.msra.mxu0 %v600_v19 }
  0x21   : > { %571 = vmatmul.mubr.msk.bf16.vlgmr.msra.gmra.mrb[4].mxu0 %vm203_vm1, %v309_v20 }
  0xe4   : > { %v296_v21 = vpop.f32.mrb[0].mxu1 }
  0xe5   : > { %v564_v22 = vpop.f32.mrb[1].mxu1 }
  0xe6   : > { %v299_v23 = vpop.f32.mrb[2].mxu1 }
  0xe7   : > { %v565_v24 = vpop.f32.mrb[3].mxu1 }
  0xec   : > { %v241_v25 = vpop.f32.mrb[0].mxu0  ;;  %v424_v29 = vpop.f32.mrb[4].mxu1 }
  0xed   : > { %v297_v26 = vadd.f32 %v296_v21, %v241_v25  ;;  %v556_v27 = vpop.f32.mrb[1].mxu0  ;;  %v580_v31 = vpop.f32.mrb[5].mxu1 }
  0xee   : > { %v244_v28 = vpop.f32.mrb[2].mxu0  ;;  %v427_v32 = vpop.f32.mrb[6].mxu1 }
  0xef   : > { %v557_v30 = vpop.f32.mrb[3].mxu0  ;;  %v581_v33 = vpop.f32.mrb[7].mxu1 }
  0xf4   : > { %v359_v34 = vpop.f32.mrb[4].mxu0 }
  0xf5   : > { %v365_v35 = vadd.f32 %v359_v34, %v297_v26  ;;  %v572_v36 = vpop.f32.mrb[5].mxu0 }
  0xf6   : > { %v362_v38 = vpop.f32.mrb[6].mxu0 }
  0xf7   : > { %v430_v39 = vadd.f32 %v424_v29, %v365_v35  ;;  %v573_v40 = vpop.f32.mrb[7].mxu0 }
  0xf9   : > { %v438_v41 = vadd.f32 %v534_v37, %v430_v39 }
  0xfb   : > { %v439_v42 = vmax.f32 %v438_v41, 0.0 }
  0xfd   : > { %v440_v44 = vpack.c.bf16 %v439_v42, %v439_v42 }
  0xff   : > { %v445_v45 = vsel %vm443_vm4, %v440_v44, %v444_v43 }
 0x100   : > { %446 = vst [vmem:[%s168_s14] sm:$0x7] %v445_v45 }
 0x101 PF: > { %s13_s12 = sadd.s32 1, %s608_s12  }
 0x102   : > { %p10_p4 = scmp.ge.s32.totalorder %s13_s12, 4  }
 0x104   :  { %12 = sbr.rel (!%p10_p4) target bundleno = 1 (0x1), region = 65 }

// kernel: decoder_forward.7
= control target key start
LH: loop header
LB: loop body
LE: loop exit
PB: predicated region body
PF: predicated region fallthrough
CT: control target
= control target key end

     0   :  { %s680_s12 = smov 0   ;;  %s724_s0 = inlined_call_operand.vmem [shape: bf16[2,25,16], index: 0, kind: input, shape index: {}]   ;;  %s725_s1 = inlined_call_operand.vmem [shape: bf16[4,16,32], index: 1, kind: input, shape index: {}]   ;;  %s726_s2 = inlined_call_operand.vmem [shape: f32[1,32], index: 2, kind: input, shape index: {}]   ;;  %s727_s3 = inlined_call_operand.vmem [shape: bf16[2,19,32], index: 3, kind: output, shape index: {}]  }
   0x1 LB: > { %s561_s13 = sadd.s32 4294967295, %s658_s12   ;;  %p565_p0 = scmp.ge.s32.totalorder %s658_s12, 1  ;;  %s658_s12 = sphi %s680_s12, %s13_s12  }
   0x2   : > { %p137_p1 = scmp.lt.s32.totalorder %s658_s12, 3 }
   0x4   : > { %p138_p2 = pnand %p565_p0, %p137_p1 }
   0x5   : > { %v645_v0 = vld [vmem:[%s725_s1 + $0x8] sm:$0xff] (!%p138_p2)   ;;  %p161_p3 = scmp.lt.s32.totalorder (!%p138_p2), %s561_s13, 1  ;;  %v646_v1 = vld [vmem:[%s725_s1] sm:$0xff] (!%p138_p2)   ;;  %v649_v2 = vld [vmem:[%s725_s1 + $0x10] sm:$0xff] (!%p138_p2)   ;;  %vm211_vm0 = vcmask (!%p138_p2), 130048   ;;  %vm404_vm1 = vcmask (!%p138_p2), 1044480  }
   0x6   : > { %141 = sbr.rel (%p138_p2) target bundleno = 259 (0x103), region = 32  ;;  %612 = vmatprep.subr.bf16.mxu0 (!%p138_p2), %v645_v0  ;;  %618 = vmatprep.subr.bf16.mxu1 (!%p138_p2), %v646_v1  ;;  %v650_v3 = vld [vmem:[%s725_s1 + $0x18] sm:$0xff] (!%p138_p2)   ;;  %vm189_vm2 = vsmask.f32 (!%p138_p2), 7424  ;;  %vm327_vm3 = vsmask.f32 (!%p138_p2), 5376 }
   0x7   : > { %613 = vmatpush3.bf16.msra.mxu0 (!%p138_p2), %v645_v0  ;;  %619 = vmatpush3.bf16.msra.mxu1 (!%p138_p2), %v646_v1  ;;  %v590_v46 = vld [vmem:[%s726_s2] ss:$0 sm:$0xff] (!%p138_p2)  ;;  %vm500_vm4 = vcmask (!%p138_p2), 254976   ;;  %vm501_vm5 = vsmask.f32 (!%p138_p2), 1280  ;;  %vm497_vm7 = vcmask (!%p138_p2), 257024  }
   0x8   : > { %624 = vmatprep.subr.bf16.mxu0 (!%p138_p2), %v649_v2  ;;  %630 = vmatprep.subr.bf16.mxu1 (!%p138_p2), %v650_v3  ;;  %vm502_vm6 = vmand (!%p138_p2), %vm500_vm4, %vm501_vm5 }
   0xd   : > { %s729_s13 = smov (!%p161_p3, %s561_s13), 1 }
   0xe   : > { %s596_s20 = sshll.u32 %s729_s13, 4  ;;  %s636_s26 = smul.u32 12, %s729_s13 }
   0xf   : > { %s165_s25 = scalar_lea.vmem %s724_s0, %s596_s20 }
  0x10   : > { %v647_v4 = vld [vmem:[%s165_s25] sm:$0xff]   ;;  %v174_v5 = vld [vmem:[%s165_s25 + $0x8] sm:$0xf]  ;;  %v175_v6 = vld [vmem:[%s165_s25 + $0xc] sm:$0x1]  ;;  %s170_s4 = scalar_lea.vmem %s727_s3, %s636_s26 }
  0x11   : > { %620 = vmatprep.mubr.msk.bf16.mxu1 %vm211_vm0, %v647_v4  ;;  %v572_v7 = vcombine.low %v174_v5, %v174_v5  ;;  %v191_v8 = vshrl.u32 %v647_v4, 16  ;;  %v193_v9 = vshll.u32 %v647_v4, 16  ;;  %v586_v10 = vcombine.low %v174_v5, %v175_v6  ;;  %v503_v57 = vld [vmem:[%s170_s4 + $0x8] sm:$0x3] }
  0x12   : > { %v405_v11 = vrot.slane %v647_v4, 3 }
  0x13   : > { %v195_v12 = vrot.slane %v193_v9, 1  ;;  %v198_v13 = vshll.u32 %v572_v7, 16  ;;  %v202_v14 = vshrl.u32 %v572_v7, 16  ;;  %v328_v15 = vrot.slane %v191_v8, 2  ;;  %621 = vmatmul.mubr.msk.bf16.vlgmr.msra.gmra.mrb[0].mxu1 %vm211_vm0, %v572_v7 }
  0x14   : > { %631 = vmatpush3.bf16.msra.mxu1 %v650_v3  ;;  %v406_v16 = vrot.slane %v586_v10, 3  ;;  %v329_v17 = vrot.slane %v193_v9, 3 }
  0x15   : > { %v196_v18 = vor.u32 %v195_v12, %v191_v8  ;;  %v200_v19 = vrot.slane %v198_v13, 1  ;;  %v332_v20 = vrot.slane %v198_v13, 3  ;;  %v331_v21 = vrot.slane %v202_v14, 2 }
  0x16   : > { %v407_v22 = vsel %vm404_vm1, %v405_v11, %v406_v16  ;;  %v330_v23 = vor.u32 %v329_v17, %v328_v15 }
  0x17   : > { %v201_v24 = vsel %vm189_vm2, %v196_v18, %v200_v19  ;;  %v204_v25 = vor.u32 %v202_v14, %v200_v19  ;;  %632 = vmatprep.mubr.msk.bf16.mxu1 %vm211_vm0, %v407_v22  ;;  %v333_v26 = vor.u32 %v332_v20, %v331_v21 }
  0x18   : > { %614 = vmatprep.mubr.msk.bf16.mxu0 %vm211_vm0, %v201_v24 }
  0x19   : > { %615 = vmatmul.mubr.msk.bf16.vlgmr.msra.gmra.mrb[0].mxu0 %vm211_vm0, %v204_v25  ;;  %v334_v27 = vsel %vm327_vm3, %v330_v23, %v333_v26 }
  0x1a   : > { %625 = vmatpush3.bf16.msra.mxu0 %v649_v2  ;;  %626 = vmatprep.mubr.msk.bf16.mxu0 %vm211_vm0, %v334_v27 }
  0x1b   : > { %633 = vmatmul.mubr.msk.bf16.vlgmr.msra.gmra.mrb[4].mxu1 %vm211_vm0, %v406_v16 }
  0x21   : > { %627 = vmatmul.mubr.msk.bf16.vlgmr.msra.gmra.mrb[4].mxu0 %vm211_vm0, %v333_v26 }
  0xe6   : > { %v622_v28 = vpop.f32.mrb[0].mxu1 }
  0xe7   : > { %v310_v29 = vpop.f32.mrb[1].mxu1 }
  0xe8   : > { %v623_v30 = vpop.f32.mrb[2].mxu1 }
  0xe9   : > { %v313_v31 = vpop.f32.mrb[3].mxu1 }
  0xec   : > { %v616_v32 = vpop.f32.mrb[0].mxu0 }
  0xed   : > { %v319_v33 = vadd.f32 %v622_v28, %v616_v32  ;;  %v252_v34 = vpop.f32.mrb[1].mxu0 }
  0xee   : > { %v311_v35 = vadd.f32 %v310_v29, %v252_v34  ;;  %v617_v36 = vpop.f32.mrb[2].mxu0  ;;  %v634_v37 = vpop.f32.mrb[4].mxu1 }
  0xef   : > { %v255_v38 = vpop.f32.mrb[3].mxu0  ;;  %v454_v39 = vpop.f32.mrb[5].mxu1 }
  0xf0   : > { %v314_v40 = vadd.f32 %v313_v31, %v255_v38  ;;  %v635_v41 = vpop.f32.mrb[6].mxu1 }
  0xf1   : > { %v457_v42 = vpop.f32.mrb[7].mxu1 }
  0xf4   : > { %v628_v43 = vpop.f32.mrb[4].mxu0 }
  0xf5   : > { %v397_v44 = vadd.f32 %v628_v43, %v319_v33  ;;  %v381_v45 = vpop.f32.mrb[5].mxu0 }
  0xf6   : > { %v395_v47 = vadd.f32 %v381_v45, %v311_v35  ;;  %v629_v48 = vpop.f32.mrb[6].mxu0 }
  0xf7   : > { %v470_v49 = vadd.f32 %v634_v37, %v397_v44  ;;  %v384_v50 = vpop.f32.mrb[7].mxu0 }
  0xf8   : > { %v468_v51 = vadd.f32 %v454_v39, %v395_v47  ;;  %v396_v52 = vadd.f32 %v384_v50, %v314_v40 }
  0xf9   : > { %v480_v53 = vadd.f32 %v590_v46, %v470_v49 }
  0xfa   : > { %v478_v54 = vadd.f32 %v590_v46, %v468_v51  ;;  %v469_v55 = vadd.f32 %v457_v42, %v396_v52 }
  0xfb   : > { %v483_v56 = vmax.f32 %v480_v53, 0.0 }
  0xfc   : > { %v481_v58 = vmax.f32 %v478_v54, 0.0  ;;  %v479_v59 = vadd.f32 %v590_v46, %v469_v55 }
  0xfd   : > { %v599_v60 = vpack.c.bf16 %v483_v56, %v483_v56 }
  0xfe   : > { %v597_v61 = vpack.c.bf16 %v481_v58, %v481_v58  ;;  %v482_v62 = vmax.f32 %v479_v59, 0.0 }
  0xff   : > { %v504_v63 = vsel %vm502_vm6, %v599_v60, %v503_v57 }
 0x100   : > { %505 = vst [vmem:[%s170_s4 + $0x8] sm:$0x3] %v504_v63  ;;  %498 = vst.msk [vmem:[%s170_s4] sm:$0xf] %vm497_vm7, %v597_v61  ;;  %v598_v0 = vpack.c.bf16 %v482_v62, %v482_v62 }
 0x102   : > { %499 = vst.msk [vmem:[%s170_s4 + $0x4] sm:$0xf] %vm497_vm7, %v598_v0 }
 0x103 PF: > { %s13_s12 = sadd.s32 1, %s658_s12  }
 0x104   : > { %p10_p4 = scmp.ge.s32.totalorder %s13_s12, 4  }
 0x106   :  { %12 = sbr.rel (!%p10_p4) target bundleno = 1 (0x1), region = 65 }

// kernel: decoder_forward.8
= control target key start
LH: loop header
LB: loop body
LE: loop exit
PB: predicated region body
PF: predicated region fallthrough
CT: control target
= control target key end

     0   :  { %s1046_s12 = smov 0   ;;  %s1229_s0 = inlined_call_operand.vmem [shape: bf16[2,81,8], index: 0, kind: input, shape index: {}]   ;;  %s1230_s1 = inlined_call_operand.vmem [shape: bf16[4,8,32], index: 1, kind: input, shape index: {}]   ;;  %s1231_s2 = inlined_call_operand.vmem [shape: f32[1,32], index: 2, kind: input, shape index: {}]   ;;  %s1232_s3 = inlined_call_operand.vmem [shape: bf16[2,71,32], index: 3, kind: output, shape index: {}]  }
   0x1 LB: > { %s819_s13 = sadd.s32 4294967295, %s1022_s12   ;;  %p823_p0 = scmp.ge.s32.totalorder %s1022_s12, 1  ;;  %s1022_s12 = sphi %s1046_s12, %s13_s12  }
   0x2   : > { %p137_p1 = scmp.lt.s32.totalorder %s1022_s12, 3 }
   0x4   : > { %p138_p2 = pnand %p823_p0, %p137_p1 }
   0x5   : > { %v826_v0 = vld [vmem:[%s1230_s1 + $0x4] sm:$0xf] (!%p138_p2)  ;;  %vm265_vm0 = vcmask (!%p138_p2), 1043456   ;;  %v183_v1 = vld [vmem:[%s1230_s1] sm:$0xf] (!%p138_p2)  ;;  %v1024_v2 = vmov (!%p138_p2), 0.0  }
   0x6   : > { %141 = sbr.rel (%p138_p2) target bundleno = 323 (0x143), region = 32  ;;  %905 = vmatprep.subr.bf16.mxu0 (!%p138_p2), %v1024_v2  ;;  %927 = vmatprep.subr.bf16.mxu1 (!%p138_p2), %v1024_v2  ;;  %v267_v3 = vsel (!%p138_p2), %vm265_vm0, %v826_v0, 0  ;;  %v352_v4 = vsel (!%p138_p2), %vm265_vm0, %v183_v1, 0  ;;  %p161_p3 = scmp.lt.s32.totalorder (!%p138_p2), %s819_s13, 1  ;;  %vm1025_vm1 = vmmov (!%p138_p2), 0   ;;  %vm249_vm2 = vcmask (!%p138_p2), 64512  }
   0x7   : > { %906 = vmatpush3.bf16.msra.mxu0 (!%p138_p2), %v267_v3  ;;  %928 = vmatpush3.bf16.msra.mxu1 (!%p138_p2), %v352_v4  ;;  %v853_v5 = vld [vmem:[%s1230_s1 + $0xc] sm:$0xf] (!%p138_p2)  ;;  %v842_v20 = vld [vmem:[%s1230_s1 + $0x8] sm:$0xf] (!%p138_p2)  ;;  %vm209_vm3 = vsmask.f32 (!%p138_p2), 7424 }
   0x8   : > { %929 = vmatprep.mubr.msk.bf16.mxu1 (!%p138_p2), %vm1025_vm1, %v1024_v2  ;;  %907 = vmatprep.mubr.msk.bf16.mxu0 (!%p138_p2), %vm1025_vm1, %v1024_v2  ;;  %v604_v6 = vsel (!%p138_p2), %vm265_vm0, %v853_v5, 0  ;;  %v490_v25 = vsel (!%p138_p2), %vm265_vm0, %v842_v20, 0  ;;  %vm578_vm4 = vcmask (!%p138_p2), 1046528   ;;  %vm749_vm5 = vcmask (!%p138_p2), 257024  }
   0x9   : > { %949 = vmatprep.subr.bf16.mxu0 (!%p138_p2), %v1024_v2  ;;  %971 = vmatprep.subr.bf16.mxu1 (!%p138_p2), %v1024_v2  ;;  %vm759_vm6 = vsmask.f32 (!%p138_p2), 3328 }
   0xa   : > { %vm760_vm7 = vmand (!%p138_p2), %vm749_vm5, %vm759_vm6 }
   0xd   : > { %s1234_s13 = smov (!%p161_p3, %s819_s13), 1 }
   0xe   : > { %s993_s20 = smul.u32 44, %s1234_s13 }
   0xf   : > { %s994_s28 = smul.u32 36, %s1234_s13 }
  0x10   : > { %s1079_s23 = scalar_lea.vmem %s1229_s0, %s993_s20 }
  0x11   : > { %v172_v7 = vld [vmem:[%s1079_s23] sm:$0xf]  ;;  %v173_v8 = vld [vmem:[%s1079_s23 + $0x4] sm:$0xf]  ;;  %v174_v9 = vld [vmem:[%s1079_s23 + $0x8] sm:$0xf]  ;;  %s1192_s4 = scalar_lea.vmem %s1232_s3, %s994_s28 }
  0x12   : > { %v175_v10 = vld [vmem:[%s1079_s23 + $0xc] sm:$0xf]  ;;  %v176_v11 = vld [vmem:[%s1079_s23 + $0x10] sm:$0xf]  ;;  %v827_v12 = vcombine.low %v172_v7, %v173_v8  ;;  %v1088_v13 = vld [vmem:[%s1079_s23 + $0x14] sm:$0xf]  ;;  %v843_v44 = vcombine.low %v173_v8, %v174_v9 }
  0x13   : > { %v828_v14 = vcombine.low %v174_v9, %v175_v10  ;;  %v829_v17 = vcombine.low %v176_v11, %v1088_v13  ;;  %v178_v26 = vld [vmem:[%s1079_s23 + $0x18] sm:$0xf]  ;;  %v179_v27 = vld [vmem:[%s1079_s23 + $0x1c] sm:$0xf]  ;;  %v180_v35 = vld [vmem:[%s1079_s23 + $0x20] sm:$0xf]  ;;  %v844_v46 = vcombine.low %v175_v10, %v176_v11 }
  0x14   : > { %930 = vmatmul.mubr.msk.bf16.vlgmr.msra.gmra.mrb[0].mxu1 %vm249_vm2, %v827_v12  ;;  %v211_v15 = vshrl.u32 %v827_v12, 16  ;;  %v213_v16 = vshll.u32 %v827_v12, 16  ;;  %v830_v31 = vcombine.low %v178_v26, %v179_v27  ;;  %v831_v38 = vcombine.low %v180_v35, %v180_v35  ;;  %v181_v5 = vld [vmem:[%s1079_s23 + $0x24] sm:$0xf] }
  0x15   : > { %v218_v18 = vshll.u32 %v828_v14, 16  ;;  %972 = vmatpush3.bf16.msra.mxu1 %v604_v6  ;;  %933 = vmatprep.mubr.msk.bf16.mxu1 %vm1025_vm1, %v1024_v2  ;;  %v222_v23 = vshrl.u32 %v828_v14, 16  ;;  %v226_v24 = vshll.u32 %v829_v17, 16  ;;  %v230_v33 = vshrl.u32 %v829_v17, 16  ;;  %v182_v6 = vld [vmem:[%s1079_s23 + $0x28] sm:$0x1] }
  0x16   : > { %v215_v19 = vrot.slane %v213_v16, 1  ;;  %v234_v34 = vshll.u32 %v830_v31, 16  ;;  %v238_v40 = vshrl.u32 %v830_v31, 16  ;;  %v242_v41 = vshll.u32 %v831_v38, 16 }
  0x17   : > { %v220_v21 = vrot.slane %v218_v18, 1  ;;  %v228_v30 = vrot.slane %v226_v24, 1  ;;  %v246_v47 = vshrl.u32 %v831_v38, 16  ;;  %v438_v48 = vshll.u32 %v843_v44, 16 }
  0x18   : > { %v216_v22 = vor.u32 %v215_v19, %v211_v15  ;;  %v236_v37 = vrot.slane %v234_v34, 1  ;;  %v244_v43 = vrot.slane %v242_v41, 1  ;;  %v579_v49 = vrot.slane %v843_v44, 1 }
  0x19   : > { %v224_v29 = vor.u32 %v222_v23, %v220_v21  ;;  %v232_v36 = vor.u32 %v230_v33, %v228_v30  ;;  %v580_v50 = vrot.slane %v844_v46, 1  ;;  %v436_v52 = vshrl.u32 %v843_v44, 16 }
  0x1a   : > { %v221_v28 = vsel %vm209_vm3, %v216_v22, %v220_v21  ;;  %v240_v42 = vor.u32 %v238_v40, %v236_v37  ;;  %v248_v51 = vor.u32 %v246_v47, %v244_v43  ;;  %v440_v53 = vrot.slane %v438_v48, 1 }
  0x1b   : > { %908 = vmatmul.mubr.msk.bf16.vlgmr.msra.gmra.mrb[0].mxu0 %vm249_vm2, %v221_v28  ;;  %v229_v32 = vsel %vm209_vm3, %v224_v29, %v228_v30  ;;  %v237_v39 = vsel %vm209_vm3, %v232_v36, %v236_v37  ;;  %v443_v54 = vshll.u32 %v844_v46, 16  ;;  %v581_v55 = vsel %vm578_vm4, %v579_v49, %v580_v50 }
  0x1c   : > { %950 = vmatpush3.bf16.msra.mxu0 %v490_v25  ;;  %911 = vmatprep.mubr.msk.bf16.mxu0 %vm1025_vm1, %v1024_v2  ;;  %v245_v45 = vsel %vm209_vm3, %v240_v42, %v244_v43  ;;  %v845_v56 = vcombine.low %v1088_v13, %v178_v26  ;;  %v441_v57 = vor.u32 %v440_v53, %v436_v52  ;;  %v447_v61 = vshrl.u32 %v844_v46, 16 }
  0x1d   : > { %934 = vmatmul.mubr.msk.bf16.gmra.mrb[4].mxu1 %vm249_vm2, %v828_v14  ;;  %v445_v58 = vrot.slane %v443_v54, 1  ;;  %v846_v0 = vcombine.low %v179_v27, %v180_v35  ;;  %v854_v11 = vcombine.low %v181_v5, %v182_v6  ;;  %v847_v14 = vcombine.low %v181_v5, %v181_v5 }
  0x1e   : > { %937 = vmatprep.mubr.msk.bf16.mxu1 %vm1025_vm1, %v1024_v2  ;;  %v582_v59 = vrot.slane %v845_v56, 1  ;;  %v451_v62 = vshll.u32 %v845_v56, 16  ;;  %v455_v8 = vshrl.u32 %v845_v56, 16 }
  0x1f   : > { %v446_v60 = vsel %vm209_vm3, %v441_v57, %v445_v58  ;;  %v449_v1 = vor.u32 %v447_v61, %v445_v58  ;;  %v584_v4 = vrot.slane %v846_v0, 1  ;;  %v459_v9 = vshll.u32 %v846_v0, 16 }
  0x20   : > { %v583_v63 = vsel %vm578_vm4, %v580_v50, %v582_v59  ;;  %v453_v3 = vrot.slane %v451_v62, 1  ;;  %v586_v15 = vrot.slane %v854_v11, 1  ;;  %v467_v18 = vshll.u32 %v847_v14, 16 }
  0x21   : > { %v585_v10 = vsel %vm578_vm4, %v582_v59, %v584_v4  ;;  %v461_v13 = vrot.slane %v459_v9, 1  ;;  %v471_v23 = vshrl.u32 %v847_v14, 16 }
  0x22   : > { %v454_v7 = vsel %vm209_vm3, %v449_v1, %v453_v3  ;;  %v457_v12 = vor.u32 %v455_v8, %v453_v3  ;;  %v587_v19 = vsel %vm578_vm4, %v584_v4, %v586_v15  ;;  %v469_v21 = vrot.slane %v467_v18, 1 }
  0x23   : > { %912 = vmatmul.mubr.msk.bf16.gmra.mrb[4].mxu0 %vm249_vm2, %v229_v32 }
  0x24   : > { %915 = vmatprep.mubr.msk.bf16.mxu0 %vm1025_vm1, %v1024_v2  ;;  %v462_v16 = vsel %vm209_vm3, %v457_v12, %v461_v13  ;;  %v473_v24 = vor.u32 %v471_v23, %v469_v21 }
  0x25   : > { %938 = vmatmul.mubr.msk.bf16.gmra.mrb[8].mxu1 %vm249_vm2, %v829_v17  ;;  %v463_v17 = vshrl.u32 %v846_v0, 16 }
  0x26   : > { %941 = vmatprep.mubr.msk.bf16.mxu1 %vm1025_vm1, %v1024_v2 }
  0x27   : > { %v465_v20 = vor.u32 %v463_v17, %v461_v13  ;;  %v1184_v17 = vld [vmem:[%s1231_s2] ss:$0 sm:$0xff] }
  0x29   : > { %v470_v22 = vsel %vm209_vm3, %v465_v20, %v469_v21 }
  0x2b   : > { %916 = vmatmul.mubr.msk.bf16.gmra.mrb[8].mxu0 %vm249_vm2, %v237_v39 }
  0x2c   : > { %919 = vmatprep.mubr.msk.bf16.mxu0 %vm1025_vm1, %v1024_v2 }
  0x2d   : > { %942 = vmatmul.mubr.msk.bf16.gmra.mrb[12].mxu1 %vm249_vm2, %v830_v31 }
  0x2e   : > { %945 = vmatprep.mubr.msk.bf16.mxu1 %vm1025_vm1, %v1024_v2 }
  0x33   : > { %920 = vmatmul.mubr.msk.bf16.gmra.mrb[12].mxu0 %vm249_vm2, %v245_v45 }
  0x34   : > { %923 = vmatprep.mubr.msk.bf16.mxu0 %vm1025_vm1, %v1024_v2 }
  0x35   : > { %946 = vmatmul.mubr.msk.bf16.gmra.mrb[16].mxu1 %vm249_vm2, %v831_v38 }
  0x36   : > { %973 = vmatprep.mubr.msk.bf16.mxu1 %vm1025_vm1, %v1024_v2 }
  0x3b   : > { %924 = vmatmul.mubr.msk.bf16.gmra.mrb[16].mxu0 %vm249_vm2, %v248_v51 }
  0x3c   : > { %951 = vmatprep.mubr.msk.bf16.mxu0 %vm1025_vm1, %v1024_v2 }
  0x3d   : > { %974 = vmatmul.mubr.msk.bf16.vlgmr.msra.gmra.mrb[20].mxu1 %vm249_vm2, %v581_v55 }
  0x3e   : > { %977 = vmatprep.mubr.msk.bf16.mxu1 %vm1025_vm1, %v1024_v2 }
  0x43   : > { %952 = vmatmul.mubr.msk.bf16.vlgmr.msra.gmra.mrb[20].mxu0 %vm249_vm2, %v446_v60 }
  0x44   : > { %955 = vmatprep.mubr.msk.bf16.mxu0 %vm1025_vm1, %v1024_v2 }
  0x45   : > { %978 = vmatmul.mubr.msk.bf16.gmra.mrb[24].mxu1 %vm249_vm2, %v583_v63 }
  0x46   : > { %981 = vmatprep.mubr.msk.bf16.mxu1 %vm1025_vm1, %v1024_v2 }
  0x4b   : > { %956 = vmatmul.mubr.msk.bf16.gmra.mrb[24].mxu0 %vm249_vm2, %v454_v7 }
  0x4c   : > { %959 = vmatprep.mubr.msk.bf16.mxu0 %vm1025_vm1, %v1024_v2 }
  0x4d   : > { %982 = vmatmul.mubr.msk.bf16.gmra.mrb[28].mxu1 %vm249_vm2, %v585_v10 }
  0x4e   : > { %985 = vmatprep.mubr.msk.bf16.mxu1 %vm1025_vm1, %v1024_v2 }
  0x53   : > { %960 = vmatmul.mubr.msk.bf16.gmra.mrb[28].mxu0 %vm249_vm2, %v462_v16 }
  0x54   : > { %963 = vmatprep.mubr.msk.bf16.mxu0 %vm1025_vm1, %v1024_v2 }
  0x55   : > { %986 = vmatmul.mubr.msk.bf16.gmra.mrb[32].mxu1 %vm249_vm2, %v587_v19 }
  0x56   : > { %989 = vmatprep.mubr.msk.bf16.mxu1 %vm1025_vm1, %v1024_v2 }
  0x5b   : > { %964 = vmatmul.mubr.msk.bf16.gmra.mrb[32].mxu0 %vm249_vm2, %v470_v22 }
  0x5c   : > { %967 = vmatprep.mubr.msk.bf16.mxu0 %vm1025_vm1, %v1024_v2 }
  0x5d   : > { %990 = vmatmul.mubr.msk.bf16.gmra.mrb[36].mxu1 %vm249_vm2, %v586_v15 }
  0x63   : > { %968 = vmatmul.mubr.msk.bf16.gmra.mrb[36].mxu0 %vm249_vm2, %v473_v24 }
  0xe7   : > { %v388_v25 = vpop.f32.mrb[0].mxu1 }
  0xe8   : > { %v931_v26 = vpop.f32.mrb[1].mxu1 }
  0xe9   : > { %v391_v27 = vpop.f32.mrb[2].mxu1 }
  0xea   : > { %v932_v28 = vpop.f32.mrb[3].mxu1 }
  0xee   : > { %v303_v29 = vpop.f32.mrb[0].mxu0 }
  0xef   : > { %v389_v30 = vadd.f32 %v388_v25, %v303_v29  ;;  %v909_v31 = vpop.f32.mrb[1].mxu0 }
  0xf0   : > { %v306_v32 = vpop.f32.mrb[2].mxu0  ;;  %v396_v33 = vpop.f32.mrb[4].mxu1 }
  0xf1   : > { %v392_v34 = vadd.f32 %v391_v27, %v306_v32  ;;  %v910_v35 = vpop.f32.mrb[3].mxu0  ;;  %v935_v36 = vpop.f32.mrb[5].mxu1 }
  0xf2   : > { %v399_v37 = vpop.f32.mrb[6].mxu1 }
  0xf3   : > { %v936_v38 = vpop.f32.mrb[7].mxu1 }
  0xf6   : > { %v311_v2 = vpop.f32.mrb[4].mxu0 }
  0xf7   : > { %v397_v39 = vadd.f32 %v396_v33, %v311_v2  ;;  %v913_v40 = vpop.f32.mrb[5].mxu0 }
  0xf8   : > { %v314_v41 = vpop.f32.mrb[6].mxu0  ;;  %v404_v42 = vpop.f32.mrb[8].mxu1 }
  0xf9   : > { %v1169_v43 = vadd.f32 %v399_v37, %v314_v41  ;;  %v914_v44 = vpop.f32.mrb[7].mxu0  ;;  %v939_v45 = vpop.f32.mrb[9].mxu1 }
  0xfa   : > { %v407_v46 = vpop.f32.mrb[10].mxu1 }
  0xfb   : > { %v940_v47 = vpop.f32.mrb[11].mxu1 }
  0xfe   : > { %v319_v48 = vpop.f32.mrb[8].mxu0 }
  0xff   : > { %v1171_v49 = vadd.f32 %v404_v42, %v319_v48  ;;  %v917_v50 = vpop.f32.mrb[9].mxu0 }
 0x100   : > { %v322_v51 = vpop.f32.mrb[10].mxu0  ;;  %v412_v52 = vpop.f32.mrb[12].mxu1 }
 0x101   : > { %v1173_v53 = vadd.f32 %v407_v46, %v322_v51  ;;  %v918_v54 = vpop.f32.mrb[11].mxu0  ;;  %v943_v55 = vpop.f32.mrb[13].mxu1 }
 0x102   : > { %v415_v56 = vpop.f32.mrb[14].mxu1 }
 0x103   : > { %v944_v57 = vpop.f32.mrb[15].mxu1 }
 0x106   : > { %v327_v58 = vpop.f32.mrb[12].mxu0 }
 0x107   : > { %v1175_v59 = vadd.f32 %v412_v52, %v327_v58  ;;  %v921_v60 = vpop.f32.mrb[13].mxu0 }
 0x108   : > { %v330_v61 = vpop.f32.mrb[14].mxu0  ;;  %v420_v62 = vpop.f32.mrb[16].mxu1 }
 0x109   : > { %v1177_v63 = vadd.f32 %v415_v56, %v330_v61  ;;  %v922_v0 = vpop.f32.mrb[15].mxu0  ;;  %v947_v1 = vpop.f32.mrb[17].mxu1 }
 0x10a   : > { %v423_v3 = vpop.f32.mrb[18].mxu1 }
 0x10b   : > { %v948_v4 = vpop.f32.mrb[19].mxu1 }
 0x10e   : > { %v335_v5 = vpop.f32.mrb[16].mxu0 }
 0x10f   : > { %v1179_v6 = vadd.f32 %v420_v62, %v335_v5  ;;  %v925_v7 = vpop.f32.mrb[17].mxu0 }
 0x110   : > { %v338_v8 = vpop.f32.mrb[18].mxu0  ;;  %v640_v9 = vpop.f32.mrb[20].mxu1 }
 0x111   : > { %v926_v10 = vpop.f32.mrb[19].mxu0  ;;  %v975_v11 = vpop.f32.mrb[21].mxu1 }
 0x112   : > { %v643_v12 = vpop.f32.mrb[22].mxu1 }
 0x113   : > { %v976_v13 = vpop.f32.mrb[23].mxu1 }
 0x116   : > { %v526_v14 = vpop.f32.mrb[20].mxu0 }
 0x117   : > { %v564_v15 = vadd.f32 %v526_v14, %v389_v30  ;;  %v953_v16 = vpop.f32.mrb[21].mxu0 }
 0x118   : > { %v529_v18 = vpop.f32.mrb[22].mxu0  ;;  %v648_v19 = vpop.f32.mrb[24].mxu1 }
 0x119   : > { %v678_v20 = vadd.f32 %v640_v9, %v564_v15  ;;  %v565_v21 = vadd.f32 %v529_v18, %v392_v34  ;;  %v954_v22 = vpop.f32.mrb[23].mxu0  ;;  %v979_v23 = vpop.f32.mrb[25].mxu1 }
 0x11a   : > { %v651_v24 = vpop.f32.mrb[26].mxu1 }
 0x11b   : > { %v694_v25 = vadd.f32 %v1184_v17, %v678_v20  ;;  %v679_v26 = vadd.f32 %v643_v12, %v565_v21  ;;  %v980_v27 = vpop.f32.mrb[27].mxu1 }
 0x11d   : > { %v703_v28 = vmax.f32 %v694_v25, 0.0  ;;  %v695_v29 = vadd.f32 %v1184_v17, %v679_v26 }
 0x11e   : > { %v534_v30 = vpop.f32.mrb[24].mxu0 }
 0x11f   : > { %v872_v31 = vpack.c.bf16 %v703_v28, %v703_v28  ;;  %v704_v32 = vmax.f32 %v695_v29, 0.0  ;;  %v566_v33 = vadd.f32 %v534_v30, %v397_v39  ;;  %v957_v34 = vpop.f32.mrb[25].mxu0 }
 0x120   : > { %v537_v35 = vpop.f32.mrb[26].mxu0  ;;  %v656_v36 = vpop.f32.mrb[28].mxu1 }
 0x121   : > { %750 = vst.msk [vmem:[%s1192_s4] sm:$0xf] %vm749_vm5, %v872_v31  ;;  %v873_v37 = vpack.c.bf16 %v704_v32, %v704_v32  ;;  %v680_v38 = vadd.f32 %v648_v19, %v566_v33  ;;  %v567_v2 = vadd.f32 %v537_v35, %v1169_v43  ;;  %v958_v40 = vpop.f32.mrb[27].mxu0  ;;  %v983_v41 = vpop.f32.mrb[29].mxu1  ;;  %v761_v33 = vld [vmem:[%s1192_s4 + $0x20] sm:$0xf] }
 0x122   : > { %v659_v42 = vpop.f32.mrb[30].mxu1 }
 0x123   : > { %751 = vst.msk [vmem:[%s1192_s4 + $0x4] sm:$0xf] %vm749_vm5, %v873_v37  ;;  %v696_v44 = vadd.f32 %v1184_v17, %v680_v38  ;;  %v681_v45 = vadd.f32 %v651_v24, %v567_v2  ;;  %v984_v46 = vpop.f32.mrb[31].mxu1 }
 0x125   : > { %v705_v39 = vmax.f32 %v696_v44, 0.0  ;;  %v697_v47 = vadd.f32 %v1184_v17, %v681_v45 }
 0x126   : > { %v542_v48 = vpop.f32.mrb[28].mxu0 }
 0x127   : > { %v874_v50 = vpack.c.bf16 %v705_v39, %v705_v39  ;;  %v706_v51 = vmax.f32 %v697_v47, 0.0  ;;  %v568_v52 = vadd.f32 %v542_v48, %v1171_v49  ;;  %v961_v43 = vpop.f32.mrb[29].mxu0 }
 0x128   : > { %v545_v54 = vpop.f32.mrb[30].mxu0  ;;  %v664_v55 = vpop.f32.mrb[32].mxu1 }
 0x129   : > { %752 = vst.msk [vmem:[%s1192_s4 + $0x8] sm:$0xf] %vm749_vm5, %v874_v50  ;;  %v875_v56 = vpack.c.bf16 %v706_v51, %v706_v51  ;;  %v682_v57 = vadd.f32 %v656_v36, %v568_v52  ;;  %v569_v58 = vadd.f32 %v545_v54, %v1173_v53  ;;  %v962_v60 = vpop.f32.mrb[31].mxu0  ;;  %v987_v61 = vpop.f32.mrb[33].mxu1 }
 0x12a   : > { %v667_v62 = vpop.f32.mrb[34].mxu1 }
 0x12b   : > { %753 = vst.msk [vmem:[%s1192_s4 + $0xc] sm:$0xf] %vm749_vm5, %v875_v56  ;;  %v698_v0 = vadd.f32 %v1184_v17, %v682_v57  ;;  %v683_v1 = vadd.f32 %v659_v42, %v569_v58  ;;  %v988_v3 = vpop.f32.mrb[35].mxu1 }
 0x12d   : > { %v707_v49 = vmax.f32 %v698_v0, 0.0  ;;  %v699_v4 = vadd.f32 %v1184_v17, %v683_v1 }
 0x12e   : > { %v550_v5 = vpop.f32.mrb[32].mxu0 }
 0x12f   : > { %v876_v7 = vpack.c.bf16 %v707_v49, %v707_v49  ;;  %v708_v8 = vmax.f32 %v699_v4, 0.0  ;;  %v570_v9 = vadd.f32 %v550_v5, %v1175_v59  ;;  %v965_v53 = vpop.f32.mrb[33].mxu0 }
 0x130   : > { %v553_v10 = vpop.f32.mrb[34].mxu0  ;;  %v672_v11 = vpop.f32.mrb[36].mxu1 }
 0x131   : > { %754 = vst.msk [vmem:[%s1192_s4 + $0x10] sm:$0xf] %vm749_vm5, %v876_v7  ;;  %v877_v12 = vpack.c.bf16 %v708_v8, %v708_v8  ;;  %v684_v13 = vadd.f32 %v664_v55, %v570_v9  ;;  %v571_v14 = vadd.f32 %v553_v10, %v1177_v63  ;;  %v966_v15 = vpop.f32.mrb[35].mxu0  ;;  %v991_v16 = vpop.f32.mrb[37].mxu1 }
 0x132   : > { %v675_v18 = vpop.f32.mrb[38].mxu1 }
 0x133   : > { %755 = vst.msk [vmem:[%s1192_s4 + $0x14] sm:$0xf] %vm749_vm5, %v877_v12  ;;  %v700_v19 = vadd.f32 %v1184_v17, %v684_v13  ;;  %v685_v20 = vadd.f32 %v667_v62, %v571_v14  ;;  %v992_v59 = vpop.f32.mrb[39].mxu1 }
 0x135   : > { %v709_v21 = vmax.f32 %v700_v19, 0.0  ;;  %v701_v22 = vadd.f32 %v1184_v17, %v685_v20 }
 0x136   : > { %v558_v23 = vpop.f32.mrb[36].mxu0 }
 0x137   : > { %v878_v24 = vpack.c.bf16 %v709_v21, %v709_v21  ;;  %v710_v25 = vmax.f32 %v701_v22, 0.0  ;;  %v572_v63 = vadd.f32 %v558_v23, %v1179_v6  ;;  %v969_v26 = vpop.f32.mrb[37].mxu0 }
 0x138   : > { %v561_v27 = vpop.f32.mrb[38].mxu0 }
 0x139   : > { %756 = vst.msk [vmem:[%s1192_s4 + $0x18] sm:$0xf] %vm749_vm5, %v878_v24  ;;  %v879_v28 = vpack.c.bf16 %v710_v25, %v710_v25  ;;  %v686_v29 = vadd.f32 %v672_v11, %v572_v63  ;;  %v970_v30 = vpop.f32.mrb[39].mxu0 }
 0x13b   : > { %757 = vst.msk [vmem:[%s1192_s4 + $0x1c] sm:$0xf] %vm749_vm5, %v879_v28  ;;  %v702_v31 = vadd.f32 %v1184_v17, %v686_v29 }
 0x13d   : > { %v711_v32 = vmax.f32 %v702_v31, 0.0 }
 0x13f   : > { %v880_v34 = vpack.c.bf16 %v711_v32, %v711_v32 }
 0x141   : > { %v762_v35 = vsel %vm760_vm7, %v880_v34, %v761_v33 }
 0x142   : > { %763 = vst [vmem:[%s1192_s4 + $0x20] sm:$0xf] %v762_v35 }
 0x143 PF: > { %s13_s12 = sadd.s32 1, %s1022_s12  }
 0x144   : > { %p10_p4 = scmp.ge.s32.totalorder %s13_s12, 4  }
 0x146   :  { %12 = sbr.rel (!%p10_p4) target bundleno = 1 (0x1), region = 65 }

// kernel: decoder_forward.9
= control target key start
LH: loop header
LB: loop body
LE: loop exit
PB: predicated region body
PF: predicated region fallthrough
CT: control target
= control target key end

     0   :  { %s4696_s15 = smov 0   ;;  %s5881_s0 = inlined_call_operand.vmem [shape: bf16[2,324,8], index: 0, kind: input, shape index: {}]   ;;  %s5882_s1 = inlined_call_operand.vmem [shape: bf16[9,8,4], index: 1, kind: input, shape index: {}]   ;;  %s5883_s2 = inlined_call_operand.vmem [shape: f32[1,4], index: 2, kind: input, shape index: {}]   ;;  %s5884_s3 = inlined_call_operand.vmem [shape: f32[2,286,4], index: 3, kind: output, shape index: {0}]   ;;  %s5885_s4 = inlined_call_operand.vmem [shape: f32[2,286,4], index: 4, kind: output, shape index: {1}]  }
   0x1 LB: > { %s3471_s16 = sadd.s32 4294967295, %s4669_s15   ;;  %p3475_p0 = scmp.ge.s32.totalorder %s4669_s15, 1  ;;  %s4669_s15 = sphi %s4696_s15, %s15_s15  }
   0x2   : > { %p165_p1 = scmp.lt.s32.totalorder %s4669_s15, 3 }
   0x4   : > { %p166_p2 = pnand %p3475_p0, %p165_p1 }
   0x6   : > { %169 = sbr.rel (%p166_p2) target bundleno = 603 (0x25b), region = 32 }
   0xd   : > { %vm545_vm0 = vcmask 1043456   ;;  %v4707_v0 = vld [vmem:[%s5882_s1 + $0x10] sm:$0xf]  ;;  %v3479_v1 = vld [vmem:[%s5882_s1 + $0x4] sm:$0xf]  ;;  %p196_p3 = scmp.lt.s32.totalorder %s3471_s16, 1 }
   0xe   : > { %4481 = vmatprep.subr.msk.bf16.mxu0 %vm545_vm0, %v4707_v0  ;;  %4477 = vmatprep.subr.msk.bf16.mxu1 %vm545_vm0, %v3479_v1  ;;  %v4717_v2 = vsel %vm545_vm0, %v4707_v0, 0  ;;  %v547_v3 = vsel %vm545_vm0, %v3479_v1, 0  ;;  %v3593_v4 = vld [vmem:[%s5882_s1 + $0x14] sm:$0xf]  ;;  %v253_v5 = vld [vmem:[%s5882_s1] sm:$0xf] }
   0xf   : > { %5914 = vst [vmem:[#allocation2_spill] sm:$0xff] %v4717_v2  ;;  %3998 = vmatpush3.bf16.msra.mxu0 %v4717_v2  ;;  %3846 = vmatpush3.bf16.msra.mxu1 %v547_v3  ;;  %s5946_s16 = smov (!%p196_p3, %s3471_s16), 1  ;;  %vm346_vm1 = vsmask.f32 7424  ;;  %vm1486_vm2 = vsmask.f32 6400 }
  0x10   : > { %4483 = vmatprep.subr.msk.bf16.mxu0 %vm545_vm0, %v3593_v4  ;;  %s4487_s25 = smul.u32 164, %s5946_s16  ;;  %4478 = vmatprep.subr.msk.bf16.mxu1 %vm545_vm0, %v253_v5  ;;  %vm490_vm3 = vcmask 64512   ;;  %v1933_v8 = vsel %vm545_vm0, %v3593_v4, 0  ;;  %v763_v10 = vsel %vm545_vm0, %v253_v5, 0  ;;  %v4782_v36 = vld [vmem:[%s5882_s1 + $0x8] sm:$0xf] }
  0x11   : > { %v4813_v51 = vld [vmem:[%s5882_s1 + $0x18] sm:$0xf]  ;;  %vm1840_vm4 = vcmask 1045504   ;;  %vm2384_vm5 = vsmask.f32 5376  ;;  %vm944_vm6 = vcmask 1046528  }
  0x12   : > { %s4735_s28 = scalar_lea.vmem %s5881_s0, %s4487_s25  ;;  %vm2742_vm7 = vcmask 1044480   ;;  %s4488_s13 = smul.u32 288, %s5946_s16  ;;  %vm3093_vm8 = vcmask 31744   ;;  %vm3129_vm9 = vcmask 29696  }
  0x13   : > { %v4738_v6 = vld [vmem:[%s4735_s28] sm:$0xff]   ;;  %v4741_v7 = vld [vmem:[%s4735_s28 + $0x8] sm:$0xff]   ;;  %v4745_v9 = vld [vmem:[%s4735_s28 + $0x10] sm:$0xff]  }
  0x14   : > { %v348_v11 = vshrl.u32 %v4738_v6, 16  ;;  %v350_v12 = vshll.u32 %v4738_v6, 16  ;;  %v355_v13 = vshll.u32 %v4741_v7, 16  ;;  %v359_v14 = vshrl.u32 %v4741_v7, 16  ;;  %v4759_v17 = vld [vmem:[%s4735_s28 + $0x18] sm:$0xff]   ;;  %v4762_v18 = vld [vmem:[%s4735_s28 + $0x20] sm:$0xff]   ;;  %s5629_s20 = scalar_lea.vmem %s5884_s3, %s4488_s13  ;;  %s5687_s23 = scalar_lea.vmem %s5885_s4, %s4488_s13 }
  0x15   : > { %v4753_v15 = vshll.u32 %v4745_v9, 16  ;;  %v4756_v16 = vshrl.u32 %v4745_v9, 16  ;;  %v4768_v26 = vshll.u32 %v4759_v17, 16  ;;  %v4771_v30 = vshrl.u32 %v4759_v17, 16  ;;  %v4774_v31 = vld [vmem:[%s4735_s28 + $0x28] sm:$0xff]   ;;  %v4791_v41 = vld [vmem:[%s4735_s28 + $0x30] sm:$0xff]  }
  0x16   : > { %v352_v19 = vrot.slane %v350_v12, 1  ;;  %v357_v20 = vrot.slane %v355_v13, 1  ;;  %v1487_v21 = vrot.slane %v359_v14, 1  ;;  %v1488_v22 = vrot.slane %v355_v13, 2  ;;  %v4808_v50 = vld [vmem:[%s4735_s28 + $0x38] sm:$0xff]   ;;  %v4836_v63 = vld [vmem:[%s4735_s28 + $0x40] sm:$0xff]  }
  0x17   : > { %v1490_v23 = vrot.slane %v4756_v16, 1  ;;  %v1491_v24 = vrot.slane %v4753_v15, 2  ;;  %v365_v25 = vrot.slane %v4753_v15, 1  ;;  %v1495_v33 = vrot.slane %v4768_v26, 2 }
  0x18   : > { %v353_v27 = vor.u32 %v352_v19, %v348_v11  ;;  %v361_v28 = vor.u32 %v359_v14, %v357_v20  ;;  %v1489_v29 = vor.u32 %v1488_v22, %v1487_v21  ;;  %v373_v35 = vrot.slane %v4768_v26, 1 }
  0x19   : > { %v1492_v32 = vor.u32 %v1491_v24, %v1490_v23  ;;  %v369_v34 = vor.u32 %v4756_v16, %v365_v25  ;;  %v1494_v39 = vrot.slane %v4771_v30, 1  ;;  %v4788_v40 = vshll.u32 %v4762_v18, 16  ;;  %v4863_v23 = vld [vmem:[%s4735_s28 + $0x48] sm:$0xff]  }
  0x1a   : > { %v358_v37 = vsel %vm346_vm1, %v353_v27, %v357_v20  ;;  %v366_v38 = vsel %vm346_vm1, %v361_v28, %v365_v25  ;;  %v4797_v44 = vshrl.u32 %v4762_v18, 16  ;;  %v377_v45 = vor.u32 %v4771_v30, %v373_v35  ;;  %v4870_v28 = vld [vmem:[%s4735_s28 + $0x50] sm:$0xff]  }
  0x1b   : > { %3847 = vmatprep.mubr.msk.bf16.mxu1 %vm490_vm3, %v358_v37  ;;  %v1493_v42 = vsel %vm1486_vm2, %v1489_v29, %v1492_v32  ;;  %v374_v43 = vsel %vm346_vm1, %v369_v34, %v373_v35  ;;  %v1496_v46 = vor.u32 %v1495_v33, %v1494_v39  ;;  %v1499_v47 = vrot.slane %v4788_v40, 2 }
  0x1c   : > { %3999 = vmatprep.mubr.msk.bf16.mxu0 %vm490_vm3, %v1493_v42  ;;  %3848 = vmatmul.mubr.msk.bf16.vlgmr.msra.gmra.mrb[0].mxu1 %vm490_vm3, %v366_v38  ;;  %v381_v48 = vrot.slane %v4788_v40, 1  ;;  %v4805_v49 = vshll.u32 %v4774_v31, 16  ;;  %v1498_v52 = vrot.slane %v4797_v44, 1  ;;  %v4818_v53 = vshrl.u32 %v4774_v31, 16 }
  0x1d   : > { %3851 = vmatprep.mubr.msk.bf16.mxu1 %vm490_vm3, %v374_v43  ;;  %3884 = vmatpush3.bf16.msra.mxu1 %v763_v10  ;;  %v4821_v54 = vshll.u32 %v4791_v41, 16  ;;  %v4824_v55 = vshrl.u32 %v4791_v41, 16  ;;  %v1497_v56 = vsel %vm1486_vm2, %v1492_v32, %v1496_v46  ;;  %v4840_v3 = vshll.u32 %v4808_v50, 16 }
  0x1e   : > { %v1503_v57 = vrot.slane %v4805_v49, 2  ;;  %v385_v58 = vor.u32 %v4797_v44, %v381_v48  ;;  %4479 = vmatprep.subr.msk.bf16.mxu1 %vm545_vm0, %v4782_v36  ;;  %4000 = vmatmul.mubr.msk.bf16.vlgmr.msra.gmra.mrb[0].mxu0 %vm490_vm3, %v1497_v56  ;;  %v1500_v59 = vor.u32 %v1499_v47, %v1498_v52  ;;  %v1502_v60 = vrot.slane %v4818_v53, 1  ;;  %v4897_v56 = vld [vmem:[%s4735_s28 + $0x58] sm:$0xff]  }
  0x1f   : > { %v389_v61 = vrot.slane %v4805_v49, 1  ;;  %v1506_v62 = vrot.slane %v4824_v55, 1  ;;  %4036 = vmatpush3.bf16.msra.mxu0 %v1933_v8  ;;  %v1507_v1 = vrot.slane %v4821_v54, 2  ;;  %v4843_v4 = vshrl.u32 %v4808_v50, 16 }
  0x20   : > { %v1501_v5 = vsel %vm1486_vm2, %v1496_v46, %v1500_v59  ;;  %v382_v10 = vsel %vm346_vm1, %v377_v45, %v381_v48  ;;  %v1504_v11 = vor.u32 %v1503_v57, %v1502_v60  ;;  %4484 = vmatprep.subr.msk.bf16.mxu0 %vm545_vm0, %v4813_v51  ;;  %v397_v13 = vrot.slane %v4821_v54, 1 }
  0x21   : > { %4003 = vmatprep.mubr.msk.bf16.mxu0 %vm490_vm3, %v1501_v5  ;;  %v390_v8 = vsel %vm346_vm1, %v385_v58, %v389_v61  ;;  %v1508_v12 = vor.u32 %v1507_v1, %v1506_v62  ;;  %v4853_v14 = vshll.u32 %v4836_v63, 16  ;;  %v1510_v20 = vrot.slane %v4843_v4, 1 }
  0x22   : > { %v1505_v19 = vsel %vm1486_vm2, %v1500_v59, %v1504_v11  ;;  %v1511_v21 = vrot.slane %v4840_v3, 2  ;;  %v4860_v22 = vshrl.u32 %v4836_v63, 16  ;;  %v393_v25 = vor.u32 %v4818_v53, %v389_v61 }
  0x23   : > { %v1509_v24 = vsel %vm1486_vm2, %v1504_v11, %v1508_v12  ;;  %v1515_v27 = vrot.slane %v4853_v14, 2  ;;  %v401_v29 = vor.u32 %v4824_v55, %v397_v13  ;;  %v405_v32 = vrot.slane %v4840_v3, 1 }
  0x24   : > { %3852 = vmatmul.mubr.msk.bf16.gmra.mrb[4].mxu1 %vm490_vm3, %v382_v10  ;;  %v1514_v33 = vrot.slane %v4860_v22, 1  ;;  %v1512_v34 = vor.u32 %v1511_v21, %v1510_v20  ;;  %v4878_v35 = vshll.u32 %v4863_v23, 16  ;;  %v4881_v37 = vshrl.u32 %v4863_v23, 16 }
  0x25   : > { %3855 = vmatprep.mubr.msk.bf16.mxu1 %vm490_vm3, %v390_v8  ;;  %v398_v38 = vsel %vm346_vm1, %v393_v25, %v397_v13  ;;  %v4885_v42 = vshll.u32 %v4870_v28, 16  ;;  %v4888_v43 = vshrl.u32 %v4870_v28, 16  ;;  %v406_v45 = vsel %vm346_vm1, %v401_v29, %v405_v32 }
  0x26   : > { %4004 = vmatmul.mubr.msk.bf16.gmra.mrb[4].mxu0 %vm490_vm3, %v1505_v19  ;;  %v1516_v39 = vor.u32 %v1515_v27, %v1514_v33  ;;  %v1513_v46 = vsel %vm1486_vm2, %v1508_v12, %v1512_v34  ;;  %v413_v47 = vrot.slane %v4853_v14, 1  ;;  %v1518_v48 = vrot.slane %v4881_v37, 1  ;;  %v4930_v33 = vld [vmem:[%s4735_s28 + $0x68] sm:$0xff]  }
  0x27   : > { %4007 = vmatprep.mubr.msk.bf16.mxu0 %vm490_vm3, %v1509_v24  ;;  %v1519_v52 = vrot.slane %v4878_v35, 2  ;;  %v409_v58 = vor.u32 %v4843_v4, %v405_v32  ;;  %v1522_v59 = vrot.slane %v4888_v43, 1  ;;  %v1523_v60 = vrot.slane %v4885_v42, 2  ;;  %v4922_v24 = vld [vmem:[%s4735_s28 + $0x60] sm:$0xff]  }
  0x28   : > { %v1517_v57 = vsel %vm1486_vm2, %v1512_v34, %v1516_v39  ;;  %v417_v61 = vor.u32 %v4860_v22, %v413_v47  ;;  %v421_v62 = vrot.slane %v4878_v35, 1  ;;  %v4909_v5 = vshll.u32 %v4897_v56, 16 }
  0x29   : > { %v1520_v1 = vor.u32 %v1519_v52, %v1518_v48  ;;  %v4912_v10 = vshrl.u32 %v4897_v56, 16  ;;  %v414_v11 = vsel %vm346_vm1, %v409_v58, %v413_v47  ;;  %v1524_v8 = vor.u32 %v1523_v60, %v1522_v59  ;;  %v4955_v60 = vld [vmem:[%s4735_s28 + $0x70] sm:$0xff]  }
  0x2a   : > { %5915 = vst [vmem:[#allocation3_spill] sm:$0xff] %v4909_v5  ;;  %v422_v12 = vsel %vm346_vm1, %v417_v61, %v421_v62  ;;  %v429_v19 = vrot.slane %v4885_v42, 1  ;;  %v1527_v21 = vrot.slane %v4909_v5, 2  ;;  %v425_v27 = vor.u32 %v4881_v37, %v421_v62  ;;  %v4958_v61 = vld [vmem:[%s4735_s28 + $0x98] sm:$0xf] }
  0x2b   : > { %v1521_v13 = vsel %vm1486_vm2, %v1516_v39, %v1520_v1  ;;  %v1526_v20 = vrot.slane %v4912_v10, 1  ;;  %v1525_v25 = vsel %vm1486_vm2, %v1520_v1, %v1524_v8  ;;  %v437_v32 = vrot.slane %v4909_v5, 1 }
  0x2c   : > { %3856 = vmatmul.mubr.msk.bf16.gmra.mrb[8].mxu1 %vm490_vm3, %v398_v38  ;;  %v433_v29 = vor.u32 %v4888_v43, %v429_v19  ;;  %v4937_v38 = vshll.u32 %v4922_v24, 16  ;;  %v430_v39 = vsel %vm346_vm1, %v425_v27, %v429_v19  ;;  %v4944_v48 = vshrl.u32 %v4922_v24, 16 }
  0x2d   : > { %3859 = vmatprep.mubr.msk.bf16.mxu1 %vm490_vm3, %v406_v45  ;;  %v4934_v34 = vor.u32 %v1527_v21, %v1526_v20  ;;  %v1841_v45 = vrot.slane %v4741_v7, 2  ;;  %v4947_v52 = vshll.u32 %v4930_v33, 16  ;;  %v441_v1 = vor.u32 %v4912_v10, %v437_v32 }
  0x2e   : > { %4008 = vmatmul.mubr.msk.bf16.gmra.mrb[8].mxu0 %vm490_vm3, %v1513_v46  ;;  %5917 = vst [vmem:[#allocation5_spill] sm:$0xff] %v4937_v38  ;;  %v1842_v46 = vrot.slane %v4745_v9, 2  ;;  %v438_v47 = vsel %vm346_vm1, %v433_v29, %v437_v32  ;;  %5918 = vst [vmem:[#allocation6_spill] sm:$0xff] %v4944_v48  ;;  %v445_v59 = vrot.slane %v4937_v38, 1  ;;  %v1844_v19 = vrot.slane %v4759_v17, 2 }
  0x2f   : > { %4011 = vmatprep.mubr.msk.bf16.mxu0 %vm490_vm3, %v1517_v57  ;;  %5916 = vst [vmem:[#allocation4_spill] sm:$0xff] %v4934_v34  ;;  %5919 = vst [vmem:[#allocation7_spill] sm:$0xff] %v4947_v52  ;;  %v251_v57 = vld [vmem:[%s4735_s28 + $0x9c] sm:$0xf]  ;;  %v1529_v58 = vsel %vm1486_vm2, %v1524_v8, %v4934_v34  ;;  %v453_v8 = vrot.slane %v4947_v52, 1  ;;  %v4975_v20 = vshll.u32 %v4955_v60, 16 }
  0x30   : > { %v1843_v62 = vsel %vm1840_vm4, %v1841_v45, %v1842_v46  ;;  %v446_v21 = vsel %vm346_vm1, %v441_v1, %v445_v59  ;;  %v4980_v27 = vshrl.u32 %v4930_v33, 16  ;;  %v4984_v32 = vshrl.u32 %v4955_v60, 16  ;;  %v4990_v45 = vld [vmem:[%s4735_s28 + $0x90] sm:$0xff]   ;;  %v5015_v34 = vld [vmem:[%s5882_s1 + $0x1c] sm:$0xf] }
  0x31   : > { %5920 = vst [vmem:[#allocation8_spill] sm:$0xff] %v4975_v20  ;;  %5924 = vst [vmem:[#allocation12_spill] sm:$0xff] %v4990_v45  ;;  %v1850_v2 = vrot.slane %v4791_v41, 2 }
  0x32   : > { %5921 = vst [vmem:[#allocation9_spill] sm:$0xff] %v4980_v27  ;;  %5922 = vst [vmem:[#allocation10_spill] sm:$0xff] %v4984_v32  ;;  %v457_v1 = vor.u32 %v4980_v27, %v453_v8 }
  0x34   : > { %3860 = vmatmul.mubr.msk.bf16.gmra.mrb[12].mxu1 %vm490_vm3, %v414_v11  ;;  %v4964_v11 = vcombine.low %v4958_v61, %v251_v57  ;;  %v461_v57 = vrot.slane %v4975_v20, 1 }
  0x35   : > { %3863 = vmatprep.mubr.msk.bf16.mxu1 %vm490_vm3, %v422_v12  ;;  %v449_v12 = vor.u32 %v4944_v48, %v445_v59  ;;  %v2167_v59 = vsel %vm545_vm0, %v4813_v51, 0  ;;  %v5020_v51 = vrot.slane %v4990_v45, 2  ;;  %v2393_v48 = vrot.slane %v4788_v40, 3 }
  0x36   : > { %4012 = vmatmul.mubr.msk.bf16.gmra.mrb[12].mxu0 %vm490_vm3, %v1521_v13  ;;  %v4969_v13 = vld [vmem:[%s4735_s28 + $0x78] sm:$0xff]   ;;  %v1856_v40 = vrot.slane %v4863_v23, 2 }
  0x37   : > { %4015 = vmatprep.mubr.msk.bf16.mxu0 %vm490_vm3, %v1525_v25  ;;  %v1846_v25 = vrot.slane %v4762_v18, 2  ;;  %v454_v29 = vsel %vm346_vm1, %v449_v12, %v453_v8  ;;  %v465_v12 = vor.u32 %v4984_v32, %v461_v57  ;;  %v1848_v8 = vrot.slane %v4774_v31, 2 }
  0x38   : > { %v5032_v20 = vshrl.u32 %v4969_v13, 16 }
  0x3a   : > { %5926 = vst [vmem:[#allocation14_spill] sm:$0xff] %v5032_v20 }
  0x3c   : > { %3864 = vmatmul.mubr.msk.bf16.gmra.mrb[16].mxu1 %vm490_vm3, %v430_v39  ;;  %v4987_v39 = vshll.u32 %v4969_v13, 16 }
  0x3d   : > { %3867 = vmatprep.mubr.msk.bf16.mxu1 %vm490_vm3, %v438_v47  ;;  %v4994_v47 = vsel %vm1840_vm4, %v1842_v46, %v1844_v19  ;;  %v5010_v46 = vld [vmem:[%s4735_s28 + $0x88] sm:$0xff]  }
  0x3e   : > { %4016 = vmatmul.mubr.msk.bf16.gmra.mrb[16].mxu0 %vm490_vm3, %v1529_v58  ;;  %5923 = vst [vmem:[#allocation11_spill] sm:$0xff] %v4987_v39  ;;  %v4998_v58 = vld [vmem:[%s4735_s28 + $0x80] sm:$0xff]  }
  0x3f   : > { %4037 = vmatprep.mubr.msk.bf16.mxu0 %vm490_vm3, %v1843_v62  ;;  %v5004_v62 = vsel %vm1840_vm4, %v1844_v19, %v1846_v25  ;;  %v5898_v19 = vrot.slane %v4964_v11, 2  ;;  %v5044_v32 = vshrl.u32 %v4998_v58, 16 }
  0x41   : > { %5927 = vst [vmem:[#allocation15_spill] sm:$0xff] %v5044_v32 }
  0x44   : > { %3868 = vmatmul.mubr.msk.bf16.gmra.mrb[20].mxu1 %vm490_vm3, %v446_v21  ;;  %v469_v21 = vrot.slane %v4987_v39, 1  ;;  %v462_v39 = vsel %vm346_vm1, %v457_v1, %v461_v57  ;;  %v5047_v57 = vshll.u32 %v5010_v46, 16  ;;  %v5051_v1 = vsel %vm1840_vm4, %v1846_v25, %v1848_v8 }
  0x45   : > { %3871 = vmatprep.mubr.msk.bf16.mxu1 %vm490_vm3, %v454_v29  ;;  %v5027_v29 = vshll.u32 %v4998_v58, 16  ;;  %v2386_v25 = vrot.slane %v4753_v15, 3  ;;  %v2392_v15 = vrot.slane %v4797_v44, 2 }
  0x46   : > { %4038 = vmatmul.mubr.msk.bf16.vlgmr.msra.gmra.mrb[0].mxu0 %vm490_vm3, %v4994_v47  ;;  %v470_v45 = vsel %vm346_vm1, %v465_v12, %v469_v21  ;;  %5928 = vst [vmem:[#allocation16_spill] sm:$0xff] %v5047_v57  ;;  %v473_v12 = vor.u32 %v5032_v20, %v469_v21  ;;  %v485_v38 = vrot.slane %v5047_v57, 1  ;;  %v2389_v21 = vrot.slane %v4768_v26, 3 }
  0x47   : > { %4074 = vmatpush3.bf16.msra.mxu0 %v2167_v59  ;;  %4041 = vmatprep.mubr.msk.bf16.mxu0 %vm490_vm3, %v5004_v62  ;;  %5925 = vst [vmem:[#allocation13_spill] sm:$0xff] %v5027_v29  ;;  %v5040_v59 = vsel %vm1840_vm4, %v5020_v51, %v5898_v19  ;;  %v477_v52 = vrot.slane %v5027_v29, 1  ;;  %v5056_v19 = vsel %vm1840_vm4, %v1848_v8, %v1850_v2  ;;  %v2388_v8 = vrot.slane %v4771_v30, 2 }
  0x48   : > { %4485 = vmatprep.subr.msk.bf16.mxu0 %vm545_vm0, %v5015_v34  ;;  %v1854_v57 = vrot.slane %v4836_v63, 2  ;;  %v5080_v26 = vshrl.u32 %v5010_v46, 16 }
  0x49   : > { %v481_v27 = vor.u32 %v5044_v32, %v477_v52  ;;  %v478_v29 = vsel %vm346_vm1, %v473_v12, %v477_v52  ;;  %v2394_v52 = vor.u32 %v2393_v48, %v2392_v15  ;;  %v2396_v48 = vrot.slane %v4818_v53, 2 }
  0x4a   : > { %v2400_v12 = vrot.slane %v4824_v55, 2  ;;  %v2404_v55 = vrot.slane %v4843_v4, 2  ;;  %v2408_v15 = vrot.slane %v4860_v22, 2  ;;  %v5133_v4 = vld [vmem:[%s5882_s1 + $0xc] sm:$0xf]  ;;  %v2412_v22 = vrot.slane %v4881_v37, 2 }
  0x4b   : > { %v486_v20 = vsel %vm346_vm1, %v481_v27, %v485_v38 }
  0x4c   : > { %3872 = vmatmul.mubr.msk.bf16.gmra.mrb[24].mxu1 %vm490_vm3, %v462_v39  ;;  %v2385_v39 = vrot.slane %v4756_v16, 2  ;;  %v2390_v16 = vor.u32 %v2389_v21, %v2388_v8  ;;  %v1862_v8 = vrot.slane %v4922_v24, 2 }
  0x4d   : > { %3875 = vmatprep.mubr.msk.bf16.mxu1 %vm490_vm3, %v470_v45  ;;  %v1852_v45 = vrot.slane %v4808_v50, 2 }
  0x4e   : > { %4042 = vmatmul.mubr.msk.bf16.gmra.mrb[4].mxu0 %vm490_vm3, %v5051_v1  ;;  %v2387_v32 = vor.u32 %v2386_v25, %v2385_v39  ;;  %v5090_v44 = vsel %vm2384_vm5, %v2390_v16, %v2394_v52  ;;  %v2401_v39 = vrot.slane %v4821_v54, 3  ;;  %v5105_v25 = vsel %vm1840_vm4, %v1854_v57, %v1856_v40 }
  0x4f   : > { %4045 = vmatprep.mubr.msk.bf16.mxu0 %vm490_vm3, %v5056_v19  ;;  %v5077_v5 = vsel %vm1840_vm4, %v1850_v2, %v1852_v45  ;;  %v5087_v27 = vsel %vm1840_vm4, %v1852_v45, %v1854_v57  ;;  %v489_v2 = vor.u32 %v5080_v26, %v485_v38  ;;  %v2405_v57 = vrot.slane %v4840_v3, 3 }
  0x50   : > { %v5083_v30 = vsel %vm2384_vm5, %v2387_v32, %v2390_v16  ;;  %v1858_v32 = vrot.slane %v4870_v28, 2  ;;  %v2402_v53 = vor.u32 %v2401_v39, %v2400_v12  ;;  %v1860_v45 = vrot.slane %v4897_v56, 2 }
  0x51   : > { %v2406_v21 = vor.u32 %v2405_v57, %v2404_v55  ;;  %v1035_v16 = vsel %vm545_vm0, %v4782_v36, 0  ;;  %v2416_v12 = vrot.slane %v4888_v43, 2  ;;  %v2417_v39 = vrot.slane %v4885_v42, 3 }
  0x52   : > { %v5146_v36 = vsel %vm1840_vm4, %v1860_v45, %v1862_v8  ;;  %v1868_v43 = vrot.slane %v4969_v13, 2  ;;  %v1870_v57 = vrot.slane %v4998_v58, 2 }
  0x53   : > { %v5136_v3 = vsel %vm2384_vm5, %v2402_v53, %v2406_v21  ;;  %v5171_v37 = vor.u32 %v2417_v39, %v2416_v12  ;;  %v5338_v39 = vld [vmem:[%s4735_s28 + $0xa0] ss:$0 sps:$4 sm:$0x33]  }
  0x54   : > { %3876 = vmatmul.mubr.msk.bf16.gmra.mrb[28].mxu1 %vm490_vm3, %v478_v29 }
  0x55   : > { %3879 = vmatprep.mubr.msk.bf16.mxu1 %vm490_vm3, %v486_v20  ;;  %v2397_v20 = vrot.slane %v4805_v49, 3  ;;  %v5113_v49 = vsel %vm1840_vm4, %v1856_v40, %v1858_v32 }
  0x56   : > { %4046 = vmatmul.mubr.msk.bf16.gmra.mrb[8].mxu0 %vm490_vm3, %v5077_v5 }
  0x57   : > { %4049 = vmatprep.mubr.msk.bf16.mxu0 %vm490_vm3, %v5087_v27  ;;  %v2398_v29 = vor.u32 %v2397_v20, %v2396_v48  ;;  %v2413_v48 = vrot.slane %v4878_v35, 3  ;;  %v1864_v20 = vrot.slane %v4930_v33, 2 }
  0x59   : > { %v5108_v38 = vsel %vm2384_vm5, %v2394_v52, %v2398_v29  ;;  %v5118_v54 = vsel %vm2384_vm5, %v2398_v29, %v2402_v53  ;;  %v2409_v52 = vrot.slane %v4853_v14, 3  ;;  %v2414_v29 = vor.u32 %v2413_v48, %v2412_v22 }
  0x5a   : > { %v5169_v35 = vsel %vm1840_vm4, %v1862_v8, %v1864_v20  ;;  %v5196_v8 = vsel %vm1840_vm4, %v1868_v43, %v1870_v57  ;;  %v2525_v22 = vsel %vm545_vm0, %v5015_v34, 0  ;;  %v945_v34 = vrot.slane %v4738_v6, 1 }
  0x5b   : > { %v2410_v40 = vor.u32 %v2409_v52, %v2408_v15  ;;  %v5180_v42 = vsel %vm2384_vm5, %v2414_v29, %v5171_v37  ;;  %v5210_v15 = vcombine.low %v4958_v61, %v4958_v61 }
  0x5c   : > { %3880 = vmatmul.mubr.msk.bf16.gmra.mrb[32].mxu1 %vm490_vm3, %v489_v2  ;;  %v5141_v2 = vsel %vm1840_vm4, %v1858_v32, %v1860_v45  ;;  %v1866_v32 = vrot.slane %v4955_v60, 2 }
  0x5d   : > { %3885 = vmatprep.mubr.msk.bf16.mxu1 %vm490_vm3, %v4738_v6  ;;  %v5151_v14 = vsel %vm2384_vm5, %v2406_v21, %v2410_v40  ;;  %v5164_v53 = vsel %vm2384_vm5, %v2410_v40, %v2414_v29  ;;  %v1872_v21 = vrot.slane %v5010_v46, 2  ;;  %v1876_v40 = vrot.slane %v5210_v15, 2 }
  0x5e   : > { %4050 = vmatmul.mubr.msk.bf16.gmra.mrb[12].mxu0 %vm490_vm3, %v5105_v25  ;;  %v5176_v55 = vsel %vm1840_vm4, %v1864_v20, %v1866_v32  ;;  %v5191_v45 = vsel %vm1840_vm4, %v1866_v32, %v1868_v43  ;;  %v950_v6 = vrot.slane %v4759_v17, 1  ;;  %v960_v20 = vrot.slane %v4836_v63, 1 }
  0x5f   : > { %4053 = vmatprep.mubr.msk.bf16.mxu0 %vm490_vm3, %v5113_v49  ;;  %v5216_v52 = vsel %vm1840_vm4, %v1872_v21, %v5020_v51  ;;  %v1877_v61 = vsel %vm1840_vm4, %v5020_v51, %v1876_v40  ;;  %v5241_v51 = vld [vmem:[%s5882_s1 + $0x20] sm:$0xf]  ;;  %v962_v32 = vrot.slane %v4863_v23, 1  ;;  %v2158_v43 = vrot.slane %v5338_v39, 2 }
  0x61   : > { %v5333_v12 = vsel %vm944_vm6, %v960_v20, %v962_v32 }
  0x64   : > { %3886 = vmatmul.mubr.msk.bf16.vlgmr.msra.gmra.mrb[0].mxu1 %vm490_vm3, %v4741_v7 }
  0x65   : > { %3889 = vmatprep.mubr.msk.bf16.mxu1 %vm490_vm3, %v4745_v9  ;;  %3922 = vmatpush3.bf16.msra.mxu1 %v1035_v16  ;;  %v5206_v16 = vsel %vm1840_vm4, %v1870_v57, %v1872_v21 }
  0x66   : > { %4480 = vmatprep.subr.msk.bf16.mxu1 %vm545_vm0, %v5133_v4  ;;  %4054 = vmatmul.mubr.msk.bf16.gmra.mrb[16].mxu0 %vm490_vm3, %v5141_v2 }
  0x67   : > { %4057 = vmatprep.mubr.msk.bf16.mxu0 %vm490_vm3, %v5146_v36 }
  0x6c   : > { %3890 = vmatmul.mubr.msk.bf16.gmra.mrb[4].mxu1 %vm490_vm3, %v4759_v17 }
  0x6d   : > { %3893 = vmatprep.mubr.msk.bf16.mxu1 %vm490_vm3, %v4762_v18 }
  0x6e   : > { %4058 = vmatmul.mubr.msk.bf16.gmra.mrb[20].mxu0 %vm490_vm3, %v5169_v35 }
  0x6f   : > { %4061 = vmatprep.mubr.msk.bf16.mxu0 %vm490_vm3, %v5176_v55 }
  0x74   : > { %3894 = vmatmul.mubr.msk.bf16.gmra.mrb[8].mxu1 %vm490_vm3, %v4774_v31 }
  0x75   : > { %3897 = vmatprep.mubr.msk.bf16.mxu1 %vm490_vm3, %v4791_v41 }
  0x76   : > { %4062 = vmatmul.mubr.msk.bf16.gmra.mrb[24].mxu0 %vm490_vm3, %v5191_v45 }
  0x77   : > { %4065 = vmatprep.mubr.msk.bf16.mxu0 %vm490_vm3, %v5196_v8 }
  0x7c   : > { %3898 = vmatmul.mubr.msk.bf16.gmra.mrb[12].mxu1 %vm490_vm3, %v4808_v50 }
  0x7d   : > { %3901 = vmatprep.mubr.msk.bf16.mxu1 %vm490_vm3, %v4836_v63 }
  0x7e   : > { %4066 = vmatmul.mubr.msk.bf16.gmra.mrb[28].mxu0 %vm490_vm3, %v5206_v16 }
  0x7f   : > { %4069 = vmatprep.mubr.msk.bf16.mxu0 %vm490_vm3, %v5216_v52 }
  0x84   : > { %3902 = vmatmul.mubr.msk.bf16.gmra.mrb[16].mxu1 %vm490_vm3, %v4863_v23 }
  0x85   : > { %3905 = vmatprep.mubr.msk.bf16.mxu1 %vm490_vm3, %v4870_v28 }
  0x86   : > { %4070 = vmatmul.mubr.msk.bf16.gmra.mrb[32].mxu0 %vm490_vm3, %v1877_v61  ;;  %v2835_v61 = vsel %vm545_vm0, %v5241_v51, 0 }
  0x87   : > { %4075 = vmatprep.mubr.msk.bf16.mxu0 %vm490_vm3, %v4994_v47  ;;  %v946_v47 = vrot.slane %v4741_v7, 1 }
  0x8c   : > { %3906 = vmatmul.mubr.msk.bf16.gmra.mrb[20].mxu1 %vm490_vm3, %v4897_v56 }
  0x8d   : > { %3909 = vmatprep.mubr.msk.bf16.mxu1 %vm490_vm3, %v4922_v24 }
  0x8e   : > { %4076 = vmatmul.mubr.msk.bf16.vlgmr.msra.gmra.mrb[0].mxu0 %vm490_vm3, %v5004_v62  ;;  %v947_v62 = vsel %vm944_vm6, %v945_v34, %v946_v47  ;;  %v974_v34 = vrot.slane %v4969_v13, 1 }
  0x8f   : > { %4112 = vmatpush3.bf16.msra.mxu0 %v2525_v22  ;;  %4079 = vmatprep.mubr.msk.bf16.mxu0 %vm490_vm3, %v5051_v1  ;;  %v1266_v1 = vsel %vm545_vm0, %v5133_v4, 0  ;;  %v972_v22 = vrot.slane %v4955_v60, 1 }
  0x90   : > { %4486 = vmatprep.subr.msk.bf16.mxu0 %vm545_vm0, %v5241_v51  ;;  %v976_v51 = vrot.slane %v4998_v58, 1 }
  0x94   : > { %3910 = vmatmul.mubr.msk.bf16.gmra.mrb[24].mxu1 %vm490_vm3, %v4930_v33 }
  0x95   : > { %3913 = vmatprep.mubr.msk.bf16.mxu1 %vm490_vm3, %v4955_v60 }
  0x96   : > { %4080 = vmatmul.mubr.msk.bf16.gmra.mrb[4].mxu0 %vm490_vm3, %v5056_v19 }
  0x97   : > { %4083 = vmatprep.mubr.msk.bf16.mxu0 %vm490_vm3, %v5077_v5  ;;  %v948_v5 = vrot.slane %v4745_v9, 1 }
  0x99   : > { %v5278_v7 = vsel %vm944_vm6, %v946_v47, %v948_v5  ;;  %v5281_v19 = vsel %vm944_vm6, %v948_v5, %v950_v6  ;;  %v5389_v47 = vsel %vm944_vm6, %v972_v22, %v974_v34  ;;  %v2420_v5 = vrot.slane %v4912_v10, 2 }
  0x9c   : > { %3914 = vmatmul.mubr.msk.bf16.gmra.mrb[28].mxu1 %vm490_vm3, %v4969_v13 }
  0x9d   : > { %3917 = vmatprep.mubr.msk.bf16.mxu1 %vm490_vm3, %v4998_v58 }
  0x9e   : > { %4084 = vmatmul.mubr.msk.bf16.gmra.mrb[8].mxu0 %vm490_vm3, %v5087_v27  ;;  %v952_v27 = vrot.slane %v4762_v18, 1 }
  0x9f   : > { %4087 = vmatprep.mubr.msk.bf16.mxu0 %vm490_vm3, %v5105_v25  ;;  %v954_v25 = vrot.slane %v4774_v31, 1 }
  0xa1   : > { %v5301_v4 = vsel %vm944_vm6, %v952_v27, %v954_v25 }
  0xa4   : > { %3918 = vmatmul.mubr.msk.bf16.gmra.mrb[32].mxu1 %vm490_vm3, %v5010_v46 }
  0xa5   : > { %3923 = vmatprep.mubr.msk.bf16.mxu1 %vm490_vm3, %v947_v62 }
  0xa6   : > { %4088 = vmatmul.mubr.msk.bf16.gmra.mrb[12].mxu0 %vm490_vm3, %v5113_v49  ;;  %v5298_v49 = vsel %vm944_vm6, %v950_v6, %v952_v27  ;;  %v5930_v6 = vld [vmem:[#allocation3_spill] sm:$0xff] }
  0xa7   : > { %4091 = vmatprep.mubr.msk.bf16.mxu0 %vm490_vm3, %v5141_v2  ;;  %v958_v2 = vrot.slane %v4808_v50, 1 }
  0xa9   : > { %v5330_v29 = vsel %vm944_vm6, %v958_v2, %v960_v20 }
  0xac   : > { %3924 = vmatmul.mubr.msk.bf16.vlgmr.msra.gmra.mrb[0].mxu1 %vm490_vm3, %v5278_v7 }
  0xad   : > { %3927 = vmatprep.mubr.msk.bf16.mxu1 %vm490_vm3, %v5281_v19  ;;  %3960 = vmatpush3.bf16.msra.mxu1 %v1266_v1  ;;  %v5931_v1 = vld [vmem:[#allocation6_spill] sm:$0xff] }
  0xae   : > { %4482 = vmatprep.subr.msk.bf16.mxu1 %vm545_vm0, %v4707_v0  ;;  %4092 = vmatmul.mubr.msk.bf16.gmra.mrb[16].mxu0 %vm490_vm3, %v5146_v36  ;;  %v956_v0 = vrot.slane %v4791_v41, 1  ;;  %v2424_v27 = vrot.slane %v5931_v1, 2 }
  0xaf   : > { %4095 = vmatprep.mubr.msk.bf16.mxu0 %vm490_vm3, %v5169_v35  ;;  %v964_v35 = vrot.slane %v4870_v28, 1 }
  0xb0   : > { %v5314_v36 = vsel %vm944_vm6, %v954_v25, %v956_v0  ;;  %v5317_v48 = vsel %vm944_vm6, %v956_v0, %v958_v2  ;;  %v5932_v25 = vld [vmem:[#allocation5_spill] sm:$0xff] }
  0xb1   : > { %v5350_v57 = vsel %vm944_vm6, %v962_v32, %v964_v35  ;;  %v2425_v0 = vrot.slane %v5932_v25, 3  ;;  %v5933_v2 = vld [vmem:[#allocation9_spill] sm:$0xff] }
  0xb2   : > { %v2428_v20 = vrot.slane %v5933_v2, 2 }
  0xb4   : > { %3928 = vmatmul.mubr.msk.bf16.gmra.mrb[4].mxu1 %vm490_vm3, %v5298_v49 }
  0xb5   : > { %3931 = vmatprep.mubr.msk.bf16.mxu1 %vm490_vm3, %v5301_v4 }
  0xb6   : > { %4096 = vmatmul.mubr.msk.bf16.gmra.mrb[20].mxu0 %vm490_vm3, %v5176_v55  ;;  %v966_v55 = vrot.slane %v4897_v56, 1 }
  0xb7   : > { %4099 = vmatprep.mubr.msk.bf16.mxu0 %vm490_vm3, %v5191_v45 }
  0xb8   : > { %v5353_v45 = vsel %vm944_vm6, %v964_v35, %v966_v55 }
  0xbc   : > { %3932 = vmatmul.mubr.msk.bf16.gmra.mrb[8].mxu1 %vm490_vm3, %v5314_v36 }
  0xbd   : > { %3935 = vmatprep.mubr.msk.bf16.mxu1 %vm490_vm3, %v5317_v48 }
  0xbe   : > { %4100 = vmatmul.mubr.msk.bf16.gmra.mrb[24].mxu0 %vm490_vm3, %v5196_v8  ;;  %v5929_v8 = vrot.slane %v4964_v11, 2 }
  0xbf   : > { %4103 = vmatprep.mubr.msk.bf16.mxu0 %vm490_vm3, %v5206_v16  ;;  %v970_v16 = vrot.slane %v4930_v33, 1 }
  0xc0   : > { %v2159_v21 = vsel %vm1840_vm4, %v5929_v8, %v2158_v43  ;;  %v5936_v8 = vld [vmem:[#allocation8_spill] sm:$0xff] }
  0xc4   : > { %3936 = vmatmul.mubr.msk.bf16.gmra.mrb[12].mxu1 %vm490_vm3, %v5330_v29 }
  0xc5   : > { %3939 = vmatprep.mubr.msk.bf16.mxu1 %vm490_vm3, %v5333_v12 }
  0xc6   : > { %4104 = vmatmul.mubr.msk.bf16.gmra.mrb[28].mxu0 %vm490_vm3, %v5216_v52 }
  0xc7   : > { %4107 = vmatprep.mubr.msk.bf16.mxu0 %vm490_vm3, %v5040_v59  ;;  %v968_v59 = vrot.slane %v4922_v24, 1 }
  0xc9   : > { %v5368_v52 = vsel %vm944_vm6, %v966_v55, %v968_v59  ;;  %v5371_v40 = vsel %vm944_vm6, %v968_v59, %v970_v16  ;;  %v5937_v59 = vld [vmem:[#allocation2_spill] sm:$0xff] }
  0xcc   : > { %3940 = vmatmul.mubr.msk.bf16.gmra.mrb[16].mxu1 %vm490_vm3, %v5350_v57 }
  0xcd   : > { %3943 = vmatprep.mubr.msk.bf16.mxu1 %vm490_vm3, %v5353_v45 }
  0xce   : > { %4108 = vmatmul.mubr.msk.bf16.gmra.mrb[32].mxu0 %vm490_vm3, %v2159_v21 }
  0xcf   : > { %4113 = vmatprep.mubr.msk.bf16.mxu0 %vm490_vm3, %v5083_v30  ;;  %v5386_v30 = vsel %vm944_vm6, %v970_v16, %v972_v22 }
  0xd4   : > { %3944 = vmatmul.mubr.msk.bf16.gmra.mrb[20].mxu1 %vm490_vm3, %v5368_v52 }
  0xd5   : > { %3947 = vmatprep.mubr.msk.bf16.mxu1 %vm490_vm3, %v5371_v40 }
  0xd6   : > { %4114 = vmatmul.mubr.msk.bf16.vlgmr.msra.gmra.mrb[0].mxu0 %vm490_vm3, %v5090_v44  ;;  %v5397_v44 = vrot.slane %v5010_v46, 1 }
  0xd7   : > { %4150 = vmatpush3.bf16.msra.mxu0 %v2835_v61  ;;  %4117 = vmatprep.mubr.msk.bf16.mxu0 %vm490_vm3, %v5108_v38  ;;  %v5404_v38 = vsel %vm944_vm6, %v974_v34, %v976_v51  ;;  %v5939_v61 = vld [vmem:[#allocation11_spill] sm:$0xff] }
  0xd8   : > { %v5408_v62 = vsel %vm944_vm6, %v976_v51, %v5397_v44  ;;  %v2437_v22 = vrot.slane %v5939_v61, 3 }
  0xdc   : > { %3948 = vmatmul.mubr.msk.bf16.gmra.mrb[24].mxu1 %vm490_vm3, %v5386_v30 }
  0xdd   : > { %3951 = vmatprep.mubr.msk.bf16.mxu1 %vm490_vm3, %v5389_v47 }
  0xde   : > { %4118 = vmatmul.mubr.msk.bf16.gmra.mrb[4].mxu0 %vm490_vm3, %v5118_v54  ;;  %v2421_v54 = vrot.slane %v5930_v6, 3  ;;  %v5941_v6 = vld [vmem:[#allocation13_spill] sm:$0xff] }
  0xdf   : > { %4121 = vmatprep.mubr.msk.bf16.mxu0 %vm490_vm3, %v5136_v3 }
  0xe0   : > { %v2422_v3 = vor.u32 %v2421_v54, %v2420_v5  ;;  %v2441_v54 = vrot.slane %v5941_v6, 3 }
  0xe2   : > { %v2423_v10 = vsel %vm2384_vm5, %v5171_v37, %v2422_v3  ;;  %v2433_v37 = vrot.slane %v5936_v8, 3 }
  0xe4   : > { %3952 = vmatmul.mubr.msk.bf16.gmra.mrb[28].mxu1 %vm490_vm3, %v5404_v38 }
  0xe5   : > { %3955 = vmatprep.mubr.msk.bf16.mxu1 %vm490_vm3, %v5408_v62 }
  0xe6   : > { %4122 = vmatmul.mubr.msk.bf16.gmra.mrb[8].mxu0 %vm490_vm3, %v5151_v14  ;;  %v5934_v14 = vld [vmem:[#allocation7_spill] sm:$0xff] }
  0xe7   : > { %4125 = vmatprep.mubr.msk.bf16.mxu0 %vm490_vm3, %v5164_v53  ;;  %v2429_v32 = vrot.slane %v5934_v14, 3  ;;  %v2426_v53 = vor.u32 %v2425_v0, %v2424_v27  ;;  %v2444_v27 = vrot.slane %v5080_v26, 2  ;;  %v5942_v0 = vld [vmem:[#allocation16_spill] sm:$0xff] }
  0xe9   : > { %v2430_v35 = vor.u32 %v2429_v32, %v2428_v20  ;;  %v2427_v55 = vsel %vm2384_vm5, %v2422_v3, %v2426_v53  ;;  %v5943_v20 = vld [vmem:[#allocation12_spill] sm:$0xff] }
  0xea   : > { %v1555_v32 = vshrl.u32 %v5943_v20, 16 }
  0xeb   : > { %v2431_v21 = vsel %vm2384_vm5, %v2426_v53, %v2430_v35  ;;  %v1558_v53 = vshll.u32 %v5943_v20, 16 }
  0xec   : > { %3956 = vmatmul.mubr.msk.bf16.gmra.mrb[32].mxu1 %vm490_vm3, %v5397_v44 }
  0xed   : > { %3961 = vmatprep.mubr.msk.bf16.mxu1 %vm490_vm3, %v5278_v7  ;;  %v5935_v7 = vld [vmem:[#allocation10_spill] sm:$0xff] }
  0xee   : > { %4126 = vmatmul.mubr.msk.bf16.gmra.mrb[12].mxu0 %vm490_vm3, %v5180_v42  ;;  %v2432_v43 = vrot.slane %v5935_v7, 2  ;;  %v5938_v42 = vld [vmem:[#allocation14_spill] sm:$0xff] }
  0xef   : > { %4129 = vmatprep.mubr.msk.bf16.mxu0 %vm490_vm3, %v2423_v10  ;;  %v2436_v16 = vrot.slane %v5938_v42, 2  ;;  %v2445_v10 = vrot.slane %v5942_v0, 3 }
  0xf1   : > { %v2438_v34 = vor.u32 %v2437_v22, %v2436_v16 }
  0xf4   : > { %3962 = vmatmul.mubr.msk.bf16.vlgmr.msra.gmra.mrb[0].mxu1 %vm490_vm3, %v5281_v19  ;;  %v2434_v19 = vor.u32 %v2433_v37, %v2432_v43  ;;  %v2448_v37 = vrot.slane %v1555_v32, 2 }
  0xf5   : > { %3965 = vmatprep.mubr.msk.bf16.mxu1 %vm490_vm3, %v5298_v49  ;;  %4188 = vmatpush3.bf16.msra.mxu1 %v5937_v59  ;;  %v5940_v49 = vld [vmem:[#allocation15_spill] sm:$0xff] }
  0xf6   : > { %4130 = vmatmul.mubr.msk.bf16.gmra.mrb[16].mxu0 %vm490_vm3, %v2427_v55  ;;  %v2435_v51 = vsel %vm2384_vm5, %v2430_v35, %v2434_v19  ;;  %v2440_v5 = vrot.slane %v5940_v49, 2  ;;  %v2439_v3 = vsel %vm2384_vm5, %v2434_v19, %v2438_v34  ;;  %v2446_v35 = vor.u32 %v2445_v10, %v2444_v27 }
  0xf7   : > { %4133 = vmatprep.mubr.msk.bf16.mxu0 %vm490_vm3, %v2431_v21  ;;  %v2453_v55 = vshrl.u32 %v4964_v11, 16  ;;  %v2449_v21 = vrot.slane %v1558_v53, 3  ;;  %v2462_v19 = vshrl.u32 %v5338_v39, 16  ;;  %v2743_v10 = vrot.slane %v4745_v9, 3 }
  0xf8   : > { %v2748_v9 = vrot.slane %v4774_v31, 3 }
  0xf9   : > { %v2455_v16 = vrot.slane %v2453_v55, 2  ;;  %v1530_v55 = vrot.slane %v5931_v1, 1  ;;  %v1535_v1 = vrot.slane %v5934_v14, 2 }
  0xfc   : > { %3966 = vmatmul.mubr.msk.bf16.gmra.mrb[4].mxu1 %vm490_vm3, %v5301_v4  ;;  %v2442_v4 = vor.u32 %v2441_v54, %v2440_v5 }
  0xfd   : > { %3969 = vmatprep.mubr.msk.bf16.mxu1 %vm490_vm3, %v5314_v36  ;;  %v2456_v36 = vshll.u32 %v4964_v11, 16 }
  0xfe   : > { %4134 = vmatmul.mubr.msk.bf16.gmra.mrb[20].mxu0 %vm490_vm3, %v2435_v51  ;;  %v2443_v43 = vsel %vm2384_vm5, %v2438_v34, %v2442_v4  ;;  %v2447_v59 = vsel %vm2384_vm5, %v2442_v4, %v2446_v35  ;;  %v2465_v34 = vshll.u32 %v5338_v39, 16  ;;  %v2744_v4 = vrot.slane %v4759_v17, 3 }
  0xff   : > { %4137 = vmatprep.mubr.msk.bf16.mxu0 %vm490_vm3, %v2439_v3  ;;  %v2458_v22 = vrot.slane %v2456_v36, 3  ;;  %v1531_v36 = vrot.slane %v5932_v25, 2 }
 0x100   : > { %v2467_v54 = vrot.slane %v2465_v34, 3  ;;  %v1546_v34 = vrot.slane %v5940_v49, 1  ;;  %v2768_v49 = vrot.slane %v4969_v13, 3 }
 0x101   : > { %v2459_v51 = vor.u32 %v2458_v22, %v2455_v16 }
 0x104   : > { %3970 = vmatmul.mubr.msk.bf16.gmra.mrb[8].mxu1 %vm490_vm3, %v5317_v48  ;;  %v2450_v48 = vor.u32 %v2449_v21, %v2448_v37  ;;  %v1532_v37 = vor.u32 %v1531_v36, %v1530_v55  ;;  %v1538_v21 = vrot.slane %v5935_v7, 1  ;;  %v2764_v7 = vrot.slane %v4930_v33, 3 }
 0x105   : > { %3973 = vmatprep.mubr.msk.bf16.mxu1 %vm490_vm3, %v5330_v29  ;;  %v2464_v29 = vrot.slane %v2462_v19, 2 }
 0x106   : > { %4138 = vmatmul.mubr.msk.bf16.gmra.mrb[24].mxu0 %vm490_vm3, %v2443_v43  ;;  %v2451_v5 = vsel %vm2384_vm5, %v2446_v35, %v2450_v48  ;;  %v2460_v3 = vsel %vm2384_vm5, %v2450_v48, %v2459_v51  ;;  %v2746_v35 = vrot.slane %v4762_v18, 3  ;;  %v2752_v18 = vrot.slane %v4808_v50, 3 }
 0x107   : > { %4141 = vmatprep.mubr.msk.bf16.mxu0 %vm490_vm3, %v2447_v59  ;;  %v2468_v27 = vor.u32 %v2467_v54, %v2464_v29  ;;  %v2756_v50 = vrot.slane %v4863_v23, 3  ;;  %v2760_v23 = vrot.slane %v4897_v56, 3  ;;  %v1539_v59 = vrot.slane %v5936_v8, 2 }
 0x108   : > { %v2747_v17 = vsel %vm2742_vm7, %v2744_v4, %v2746_v35  ;;  %v1542_v8 = vrot.slane %v5938_v42, 1  ;;  %v1543_v48 = vrot.slane %v5939_v61, 2  ;;  %v2766_v42 = vrot.slane %v4955_v60, 3 }
 0x109   : > { %v1540_v22 = vor.u32 %v1539_v59, %v1538_v21  ;;  %v1551_v54 = vrot.slane %v5942_v0, 2  ;;  %v2770_v0 = vrot.slane %v4998_v58, 3  ;;  %v2774_v58 = vrot.slane %v5943_v20, 3 }
 0x10a   : > { %v1544_v29 = vor.u32 %v1543_v48, %v1542_v8  ;;  %v2767_v60 = vsel %vm2742_vm7, %v2764_v7, %v2766_v42  ;;  %v2769_v13 = vsel %vm2742_vm7, %v2766_v42, %v2768_v49 }
 0x10c   : > { %3974 = vmatmul.mubr.msk.bf16.gmra.mrb[12].mxu1 %vm490_vm3, %v5333_v12  ;;  %v2469_v12 = vsel %vm2384_vm5, %v2459_v51, %v2468_v27  ;;  %v1547_v51 = vrot.slane %v5941_v6, 2  ;;  %v1545_v61 = vsel %vm1486_vm2, %v1540_v22, %v1544_v29  ;;  %v1550_v6 = vrot.slane %v5080_v26, 1 }
 0x10d   : > { %3977 = vmatprep.mubr.msk.bf16.mxu1 %vm490_vm3, %v5350_v57  ;;  %v2745_v57 = vsel %vm2742_vm7, %v2743_v10, %v2744_v4  ;;  %v1557_v27 = vrot.slane %v1555_v32, 1  ;;  %v1560_v10 = vrot.slane %v1558_v53, 2  ;;  %v2772_v53 = vrot.slane %v5010_v46, 3 }
 0x10e   : > { %4142 = vmatmul.mubr.msk.bf16.gmra.mrb[28].mxu0 %vm490_vm3, %v2451_v5  ;;  %v1548_v33 = vor.u32 %v1547_v51, %v1546_v34  ;;  %v1552_v4 = vor.u32 %v1551_v54, %v1550_v6 }
 0x10f   : > { %4145 = vmatprep.mubr.msk.bf16.mxu0 %vm490_vm3, %v2460_v3  ;;  %v1561_v26 = vor.u32 %v1560_v10, %v1557_v27 }
 0x110   : > { %v1549_v3 = vsel %vm1486_vm2, %v1544_v29, %v1548_v33  ;;  %v1553_v32 = vsel %vm1486_vm2, %v1548_v33, %v1552_v4 }
 0x114   : > { %3978 = vmatmul.mubr.msk.bf16.gmra.mrb[16].mxu1 %vm490_vm3, %v5353_v45  ;;  %v2749_v45 = vsel %vm2742_vm7, %v2746_v35, %v2748_v9  ;;  %v2771_v35 = vsel %vm2742_vm7, %v2768_v49, %v2770_v0 }
 0x115   : > { %3981 = vmatprep.mubr.msk.bf16.mxu1 %vm490_vm3, %v5368_v52  ;;  %v2750_v52 = vrot.slane %v4791_v41, 3  ;;  %v2754_v41 = vrot.slane %v4836_v63, 3  ;;  %v2758_v63 = vrot.slane %v4870_v28, 3 }
 0x116   : > { %4146 = vmatmul.mubr.msk.bf16.gmra.mrb[32].mxu0 %vm490_vm3, %v2469_v12  ;;  %v1564_v12 = vshll.u32 %v5210_v15, 16  ;;  %v2776_v15 = vrot.slane %v4964_v11, 3 }
 0x117   : > { %4151 = vmatprep.mubr.msk.bf16.mxu0 %vm490_vm3, %v2745_v57  ;;  %v2751_v31 = vsel %vm2742_vm7, %v2748_v9, %v2750_v52  ;;  %v2757_v43 = vsel %vm2742_vm7, %v2754_v41, %v2756_v50  ;;  %v2759_v16 = vsel %vm2742_vm7, %v2756_v50, %v2758_v63  ;;  %v2761_v28 = vsel %vm2742_vm7, %v2758_v63, %v2760_v23 }
 0x118   : > { %v1562_v57 = vsel %vm1486_vm2, %v1552_v4, %v1561_v26  ;;  %v2773_v9 = vsel %vm2742_vm7, %v2770_v0, %v2772_v53 }
 0x11c   : > { %3982 = vmatmul.mubr.msk.bf16.gmra.mrb[20].mxu1 %vm490_vm3, %v5371_v40  ;;  %v2753_v40 = vsel %vm2742_vm7, %v2750_v52, %v2752_v18  ;;  %v2777_v52 = vsel %vm2742_vm7, %v2774_v58, %v2776_v15 }
 0x11d   : > { %3985 = vmatprep.mubr.msk.bf16.mxu1 %vm490_vm3, %v5386_v30  ;;  %v1257_v30 = vrot.slane %v5943_v20, 1 }
 0x11e   : > { %4152 = vmatmul.mubr.msk.bf16.vlgmr.msra.gmra.mrb[0].mxu0 %vm490_vm3, %v2747_v17  ;;  %v1566_v17 = vrot.slane %v1564_v12, 2 }
 0x11f   : > { %4155 = vmatprep.mubr.msk.bf16.mxu0 %vm490_vm3, %v2749_v45  ;;  %v2775_v45 = vsel %vm2742_vm7, %v2772_v53, %v2774_v58 }
 0x120   : > { %v1567_v46 = vsel %vm1486_vm2, %v1561_v26, %v1566_v17 }
 0x124   : > { %3986 = vmatmul.mubr.msk.bf16.gmra.mrb[24].mxu1 %vm490_vm3, %v5389_v47  ;;  %v1258_v47 = vsel %vm944_vm6, %v5397_v44, %v1257_v30  ;;  %v1534_v44 = vrot.slane %v5933_v2, 1  ;;  %v2762_v2 = vrot.slane %v4922_v24, 3 }
 0x125   : > { %3989 = vmatprep.mubr.msk.bf16.mxu1 %vm490_vm3, %v5404_v38  ;;  %v2755_v38 = vsel %vm2742_vm7, %v2752_v18, %v2754_v41  ;;  %v2778_v18 = vrot.slane %v5338_v39, 3 }
 0x126   : > { %4156 = vmatmul.mubr.msk.bf16.gmra.mrb[4].mxu0 %vm490_vm3, %v2751_v31  ;;  %v1536_v56 = vor.u32 %v1535_v1, %v1534_v44  ;;  %v2763_v5 = vsel %vm2742_vm7, %v2760_v23, %v2762_v2  ;;  %v2765_v24 = vsel %vm2742_vm7, %v2762_v2, %v2764_v7 }
 0x127   : > { %4159 = vmatprep.mubr.msk.bf16.mxu0 %vm490_vm3, %v2753_v40  ;;  %v2779_v31 = vsel %vm2742_vm7, %v2776_v15, %v2778_v18 }
 0x128   : > { %v1537_v14 = vsel %vm1486_vm2, %v1532_v37, %v1536_v56  ;;  %v1541_v19 = vsel %vm1486_vm2, %v1536_v56, %v1540_v22 }
 0x12c   : > { %3990 = vmatmul.mubr.msk.bf16.gmra.mrb[28].mxu1 %vm490_vm3, %v5408_v62  ;;  %v5944_v62 = vld [vmem:[#allocation4_spill] sm:$0xff] }
 0x12d   : > { %3993 = vmatprep.mubr.msk.bf16.mxu1 %vm490_vm3, %v1258_v47  ;;  %v1533_v25 = vsel %vm1486_vm2, %v5944_v62, %v1532_v37 }
 0x12e   : > { %4160 = vmatmul.mubr.msk.bf16.gmra.mrb[8].mxu0 %vm490_vm3, %v2755_v38 }
 0x12f   : > { %4163 = vmatprep.mubr.msk.bf16.mxu0 %vm490_vm3, %v2757_v43 }
 0x134   : > { %3994 = vmatmul.mubr.msk.bf16.gmra.mrb[32].mxu1 %vm490_vm3, %v1257_v30 }
 0x135   : > { %4019 = vmatprep.mubr.msk.bf16.mxu1 %vm490_vm3, %v1533_v25 }
 0x136   : > { %4164 = vmatmul.mubr.msk.bf16.gmra.mrb[12].mxu0 %vm490_vm3, %v2759_v16  ;;  %v5622_v16 = vld [vmem:[%s5883_s2] ss:$0 sm:$0xff] }
 0x137   : > { %4167 = vmatprep.mubr.msk.bf16.mxu0 %vm490_vm3, %v2761_v28 }
 0x13c   : > { %4020 = vmatmul.mubr.msk.bf16.vlgmr.msra.gmra.mrb[20].mxu1 %vm490_vm3, %v1537_v14 }
 0x13d   : > { %4023 = vmatprep.mubr.msk.bf16.mxu1 %vm490_vm3, %v1541_v19 }
 0x13e   : > { %4168 = vmatmul.mubr.msk.bf16.gmra.mrb[16].mxu0 %vm490_vm3, %v2763_v5 }
 0x13f   : > { %4171 = vmatprep.mubr.msk.bf16.mxu0 %vm490_vm3, %v2765_v24 }
 0x144   : > { %4024 = vmatmul.mubr.msk.bf16.gmra.mrb[24].mxu1 %vm490_vm3, %v1545_v61 }
 0x145   : > { %4027 = vmatprep.mubr.msk.bf16.mxu1 %vm490_vm3, %v1549_v3 }
 0x146   : > { %4172 = vmatmul.mubr.msk.bf16.gmra.mrb[20].mxu0 %vm490_vm3, %v2767_v60 }
 0x147   : > { %4175 = vmatprep.mubr.msk.bf16.mxu0 %vm490_vm3, %v2769_v13 }
 0x14c   : > { %4028 = vmatmul.mubr.msk.bf16.gmra.mrb[28].mxu1 %vm490_vm3, %v1553_v32 }
 0x14d   : > { %4031 = vmatprep.mubr.msk.bf16.mxu1 %vm490_vm3, %v1562_v57 }
 0x14e   : > { %4176 = vmatmul.mubr.msk.bf16.gmra.mrb[24].mxu0 %vm490_vm3, %v2771_v35 }
 0x14f   : > { %4179 = vmatprep.mubr.msk.bf16.mxu0 %vm490_vm3, %v2773_v9 }
 0x154   : > { %4032 = vmatmul.mubr.msk.bf16.gmra.mrb[32].mxu1 %vm490_vm3, %v1567_v46 }
 0x156   : > { %4180 = vmatmul.mubr.msk.bf16.gmra.mrb[28].mxu0 %vm490_vm3, %v2775_v45 }
 0x157   : > { %4183 = vmatprep.mubr.msk.bf16.mxu0 %vm490_vm3, %v2777_v52 }
 0x15e   : > { %4184 = vmatmul.mubr.msk.bf16.gmra.mrb[32].mxu0 %vm490_vm3, %v2779_v31 }
 0x1c7   : > { %v3963_v20 = vpop.f32.mrb[0].mxu1 }
 0x1c8   : > { %v1302_v40 = vpop.f32.mrb[1].mxu1 }
 0x1c9   : > { %v3964_v30 = vpop.f32.mrb[2].mxu1 }
 0x1ca   : > { %v1305_v11 = vpop.f32.mrb[3].mxu1 }
 0x1cf   : > { %v3967_v41 = vpop.f32.mrb[4].mxu1 }
 0x1d0   : > { %v1318_v50 = vpop.f32.mrb[5].mxu1 }
 0x1d1   : > { %v3968_v47 = vpop.f32.mrb[6].mxu1 }
 0x1d2   : > { %v1321_v55 = vpop.f32.mrb[7].mxu1 }
 0x1d7   : > { %v5594_v36 = vpop.f32.mrb[8].mxu1 }
 0x1d8   : > { %v5596_v38 = vpop.f32.mrb[9].mxu1 }
 0x1d9   : > { %v5598_v43 = vpop.f32.mrb[10].mxu1 }
 0x1da   : > { %v5600_v39 = vpop.f32.mrb[11].mxu1 }
 0x1df   : > { %v5602_v37 = vpop.f32.mrb[12].mxu1 }
 0x1e0   : > { %v5604_v63 = vpop.f32.mrb[13].mxu1 }
 0x1e1   : > { %v5606_v23 = vpop.f32.mrb[14].mxu1 }
 0x1e2   : > { %v5608_v44 = vpop.f32.mrb[15].mxu1 }
 0x1e7   : > { %v5610_v1 = vpop.f32.mrb[16].mxu1 }
 0x1e8   : > { %v5612_v62 = vpop.f32.mrb[17].mxu1 }
 0x1e9   : > { %v5614_v25 = vpop.f32.mrb[18].mxu1 }
 0x1ea   : > { %v5616_v21 = vpop.f32.mrb[19].mxu1 }
 0x1f1   : > { %v4153_v59 = vpop.f32.mrb[0].mxu0 }
 0x1f2   : > { %v4189_v28 = vadd.f32 %v4153_v59, %v3963_v20  ;;  %v2871_v56 = vpop.f32.mrb[1].mxu0 }
 0x1f3   : > { %v4190_v22 = vadd.f32 %v2871_v56, %v1302_v40  ;;  %v4154_v2 = vpop.f32.mrb[2].mxu0 }
 0x1f4   : > { %v3059_v14 = vadd.f32 %v4189_v28, %v5622_v16  ;;  %v4191_v7 = vadd.f32 %v4154_v2, %v3964_v30  ;;  %v2874_v8 = vpop.f32.mrb[3].mxu0 }
 0x1f5   : > { %v3057_v48 = vadd.f32 %v4190_v22, %v5622_v16  ;;  %v4192_v19 = vadd.f32 %v2874_v8, %v1305_v11 }
 0x1f6   : > { %3096 = vst.msk [vmem:[%s5629_s20 + $0x10] sm:$0xff] %vm3093_vm8, %v3059_v14  ;;  %v3133_v34 = vsub.f32 0.0, %v3059_v14  ;;  %v3060_v51 = vadd.f32 %v4191_v7, %v5622_v16 }
 0x1f7   : > { %3094 = vst.msk [vmem:[%s5629_s20] sm:$0xff] %vm3093_vm8, %v3057_v48  ;;  %v3131_v5 = vsub.f32 0.0, %v3057_v48  ;;  %v3058_v24 = vadd.f32 %v4192_v19, %v5622_v16 }
 0x1f8   : > { %v3171_v29 = vmul.f32 1.442695, %v3133_v34  ;;  %3097 = vst.msk [vmem:[%s5629_s20 + $0x18] sm:$0xff] %vm3093_vm8, %v3060_v51  ;;  %v3134_v33 = vsub.f32 0.0, %v3060_v51 }
 0x1f9   : > { %v3167_v42 = vmul.f32 1.442695, %v3131_v5  ;;  %3095 = vst.msk [vmem:[%s5629_s20 + $0x8] sm:$0xff] %vm3093_vm8, %v3058_v24  ;;  %v3132_v61 = vsub.f32 0.0, %v3058_v24  ;;  %v4157_v49 = vpop.f32.mrb[4].mxu0 }
 0x1fa   : > { %4519 = vpow2.f32 %v3171_v29  ;;  %v3173_v6 = vmul.f32 1.442695, %v3134_v33  ;;  %v4193_v54 = vadd.f32 %v4157_v49, %v3967_v41  ;;  %v2887_v3 = vpop.f32.mrb[5].mxu0 }
 0x1fb   : > { %4521 = vpow2.f32 %v3167_v42  ;;  %v3169_v27 = vmul.f32 1.442695, %v3132_v61  ;;  %v4194_v10 = vadd.f32 %v2887_v3, %v1318_v50  ;;  %v4158_v60 = vpop.f32.mrb[6].mxu0 }
 0x1fc   : > { %4523 = vpow2.f32 %v3173_v6  ;;  %v3063_v13 = vadd.f32 %v4193_v54, %v5622_v16  ;;  %v4195_v4 = vadd.f32 %v4158_v60, %v3968_v47  ;;  %v2890_v26 = vpop.f32.mrb[7].mxu0 }
 0x1fd   : > { %4525 = vpow2.f32 %v3169_v27  ;;  %v3061_v0 = vadd.f32 %v4194_v10, %v5622_v16  ;;  %v4196_v32 = vadd.f32 %v2890_v26, %v1321_v55 }
 0x1fe   : > { %3100 = vst.msk [vmem:[%s5629_s20 + $0x30] sm:$0xff] %vm3093_vm8, %v3063_v13  ;;  %v3137_v53 = vsub.f32 0.0, %v3063_v13  ;;  %v3064_v12 = vadd.f32 %v4195_v4, %v5622_v16 }
 0x1ff   : > { %3098 = vst.msk [vmem:[%s5629_s20 + $0x20] sm:$0xff] %vm3093_vm8, %v3061_v0  ;;  %v3135_v57 = vsub.f32 0.0, %v3061_v0  ;;  %v3062_v35 = vadd.f32 %v4196_v32, %v5622_v16 }
 0x200   : > { %v3179_v9 = vmul.f32 1.442695, %v3137_v53  ;;  %3101 = vst.msk [vmem:[%s5629_s20 + $0x38] sm:$0xff] %vm3093_vm8, %v3064_v12  ;;  %v3138_v17 = vsub.f32 0.0, %v3064_v12 }
 0x201   : > { %v3175_v58 = vmul.f32 1.442695, %v3135_v57  ;;  %3099 = vst.msk [vmem:[%s5629_s20 + $0x28] sm:$0xff] %vm3093_vm8, %v3062_v35  ;;  %v3136_v46 = vsub.f32 0.0, %v3062_v35  ;;  %v4161_v15 = vpop.f32.mrb[8].mxu0 }
 0x202   : > { %4527 = vpow2.f32 %v3179_v9  ;;  %v3181_v45 = vmul.f32 1.442695, %v3138_v17  ;;  %v4197_v52 = vadd.f32 %v4161_v15, %v5594_v36  ;;  %v2903_v18 = vpop.f32.mrb[9].mxu0 }
 0x203   : > { %4529 = vpow2.f32 %v3175_v58  ;;  %v3177_v31 = vmul.f32 1.442695, %v3136_v46  ;;  %v4198_v20 = vadd.f32 %v2903_v18, %v5596_v38  ;;  %v4162_v40 = vpop.f32.mrb[10].mxu0 }
 0x204   : > { %v4520_v30 = vpop.eup %4519  ;;  %4531 = vpow2.f32 %v3181_v45  ;;  %v3067_v11 = vadd.f32 %v4197_v52, %v5622_v16  ;;  %v4199_v41 = vadd.f32 %v4162_v40, %v5598_v43  ;;  %v2906_v50 = vpop.f32.mrb[11].mxu0 }
 0x205   : > { %v4522_v47 = vpop.eup %4521  ;;  %v3241_v55 = vadd.f32 1.0, %v4520_v30  ;;  %4533 = vpow2.f32 %v3177_v31  ;;  %v3065_v36 = vadd.f32 %v4198_v20, %v5622_v16  ;;  %v4200_v59 = vadd.f32 %v2906_v50, %v5600_v39 }
 0x206   : > { %v4524_v28 = vpop.eup %4523  ;;  %v3239_v56 = vadd.f32 1.0, %v4522_v47  ;;  %3104 = vst.msk [vmem:[%s5629_s20 + $0x50] sm:$0xff] %vm3093_vm8, %v3067_v11  ;;  %v3141_v38 = vsub.f32 0.0, %v3067_v11  ;;  %v3068_v22 = vadd.f32 %v4199_v41, %v5622_v16 }
 0x207   : > { %v4526_v2 = vpop.eup %4525  ;;  %4535 = vrcp.f32 %v3241_v55  ;;  %v3242_v43 = vadd.f32 1.0, %v4524_v28  ;;  %3102 = vst.msk [vmem:[%s5629_s20 + $0x40] sm:$0xff] %vm3093_vm8, %v3065_v36  ;;  %v3139_v14 = vsub.f32 0.0, %v3065_v36  ;;  %v3066_v7 = vadd.f32 %v4200_v59, %v5622_v16 }
 0x208   : > { %4537 = vrcp.f32 %v3239_v56  ;;  %v3240_v8 = vadd.f32 1.0, %v4526_v2  ;;  %v3187_v48 = vmul.f32 1.442695, %v3141_v38  ;;  %3105 = vst.msk [vmem:[%s5629_s20 + $0x58] sm:$0xff] %vm3093_vm8, %v3068_v22  ;;  %v3142_v39 = vsub.f32 0.0, %v3068_v22 }
 0x209   : > { %4539 = vrcp.f32 %v3242_v43  ;;  %v3183_v19 = vmul.f32 1.442695, %v3139_v14  ;;  %3103 = vst.msk [vmem:[%s5629_s20 + $0x48] sm:$0xff] %vm3093_vm8, %v3066_v7  ;;  %v3140_v34 = vsub.f32 0.0, %v3066_v7  ;;  %v4165_v51 = vpop.f32.mrb[12].mxu0 }
 0x20a   : > { %4541 = vrcp.f32 %v3240_v8  ;;  %v3189_v5 = vmul.f32 1.442695, %v3142_v39  ;;  %v4201_v24 = vadd.f32 %v4165_v51, %v5602_v37  ;;  %v2919_v29 = vpop.f32.mrb[13].mxu0 }
 0x20b   : > { %4543 = vpow2.f32 %v3187_v48  ;;  %v3185_v33 = vmul.f32 1.442695, %v3140_v34  ;;  %v4202_v42 = vadd.f32 %v2919_v29, %v5604_v63  ;;  %v4166_v61 = vpop.f32.mrb[14].mxu0 }
 0x20c   : > { %v4528_v49 = vpop.eup %4527  ;;  %4545 = vpow2.f32 %v3183_v19  ;;  %v3071_v6 = vadd.f32 %v4201_v24, %v5622_v16  ;;  %v4203_v54 = vadd.f32 %v4166_v61, %v5606_v23  ;;  %v2922_v3 = vpop.f32.mrb[15].mxu0 }
 0x20d   : > { %v4530_v27 = vpop.eup %4529  ;;  %v3245_v10 = vadd.f32 1.0, %v4528_v49  ;;  %4547 = vpow2.f32 %v3189_v5  ;;  %v3069_v37 = vadd.f32 %v4202_v42, %v5622_v16  ;;  %v4204_v60 = vadd.f32 %v2922_v3, %v5608_v44 }
 0x20e   : > { %v4532_v13 = vpop.eup %4531  ;;  %v3243_v4 = vadd.f32 1.0, %v4530_v27  ;;  %4549 = vpow2.f32 %v3185_v33  ;;  %3108 = vst.msk [vmem:[%s5629_s20 + $0x70] sm:$0xff] %vm3093_vm8, %v3071_v6  ;;  %v3145_v63 = vsub.f32 0.0, %v3071_v6  ;;  %v3072_v26 = vadd.f32 %v4203_v54, %v5622_v16 }
 0x20f   : > { %v5680_v0 = vpop.f32.mrb[20].mxu1  ;;  %v4534_v23 = vpop.eup %4533  ;;  %4551 = vrcp.f32 %v3245_v10  ;;  %v3246_v44 = vadd.f32 1.0, %v4532_v13  ;;  %3106 = vst.msk [vmem:[%s5629_s20 + $0x60] sm:$0xff] %vm3093_vm8, %v3069_v37  ;;  %v3143_v32 = vsub.f32 0.0, %v3069_v37  ;;  %v3070_v53 = vadd.f32 %v4204_v60, %v5622_v16 }
 0x210   : > { %v5692_v12 = vpop.f32.mrb[21].mxu1  ;;  %4553 = vrcp.f32 %v3243_v4  ;;  %v3244_v57 = vadd.f32 1.0, %v4534_v23  ;;  %v3195_v35 = vmul.f32 1.442695, %v3145_v63  ;;  %3109 = vst.msk [vmem:[%s5629_s20 + $0x78] sm:$0xff] %vm3093_vm8, %v3072_v26  ;;  %v3146_v9 = vsub.f32 0.0, %v3072_v26 }
 0x211   : > { %v5696_v17 = vpop.f32.mrb[22].mxu1  ;;  %v4536_v58 = vpop.eup %4535  ;;  %4555 = vrcp.f32 %v3246_v44  ;;  %v3191_v46 = vmul.f32 1.442695, %v3143_v32  ;;  %3107 = vst.msk [vmem:[%s5629_s20 + $0x68] sm:$0xff] %vm3093_vm8, %v3070_v53  ;;  %v3144_v15 = vsub.f32 0.0, %v3070_v53 }
 0x212   : > { %v4169_v45 = vpop.f32.mrb[16].mxu0  ;;  %v5700_v52 = vpop.f32.mrb[23].mxu1  ;;  %3349 = vst.msk [vmem:[%s5687_s23 + $0x10] sm:$0xff] %vm3093_vm8, %v4536_v58  ;;  %4557 = vrcp.f32 %v3244_v57  ;;  %v3197_v31 = vmul.f32 1.442695, %v3146_v9 }
 0x213   : > { %v4538_v18 = vpop.eup %4537  ;;  %v4205_v20 = vadd.f32 %v4169_v45, %v5610_v1  ;;  %v2935_v40 = vpop.f32.mrb[17].mxu0  ;;  %4559 = vpow2.f32 %v3195_v35  ;;  %v3193_v11 = vmul.f32 1.442695, %v3144_v15 }
 0x214   : > { %v4540_v30 = vpop.eup %4539  ;;  %3347 = vst.msk [vmem:[%s5687_s23] sm:$0xff] %vm3093_vm8, %v4538_v18  ;;  %v4206_v41 = vadd.f32 %v2935_v40, %v5612_v62  ;;  %v4170_v50 = vpop.f32.mrb[18].mxu0  ;;  %4561 = vpow2.f32 %v3191_v46 }
 0x215   : > { %v4542_v47 = vpop.eup %4541  ;;  %3350 = vst.msk [vmem:[%s5687_s23 + $0x18] sm:$0xff] %vm3093_vm8, %v4540_v30  ;;  %v3075_v55 = vadd.f32 %v4205_v20, %v5622_v16  ;;  %v4207_v36 = vadd.f32 %v4170_v50, %v5614_v25  ;;  %v2938_v1 = vpop.f32.mrb[19].mxu0  ;;  %4563 = vpow2.f32 %v3197_v31 }
 0x216   : > { %v4544_v59 = vpop.eup %4543  ;;  %3348 = vst.msk [vmem:[%s5687_s23 + $0x8] sm:$0xff] %vm3093_vm8, %v4542_v47  ;;  %v3073_v28 = vadd.f32 %v4206_v41, %v5622_v16  ;;  %v4208_v62 = vadd.f32 %v2938_v1, %v5616_v21  ;;  %4565 = vpow2.f32 %v3193_v11 }
 0x217   : > { %v4546_v56 = vpop.eup %4545  ;;  %v3249_v38 = vadd.f32 1.0, %v4544_v59  ;;  %3112 = vst.msk [vmem:[%s5629_s20 + $0x90] sm:$0xff] %vm3093_vm8, %v3075_v55  ;;  %v3149_v22 = vsub.f32 0.0, %v3075_v55  ;;  %v3076_v2 = vadd.f32 %v4207_v36, %v5622_v16  ;;  %v5719_v25 = vpop.f32.mrb[24].mxu1 }
 0x218   : > { %v4548_v43 = vpop.eup %4547  ;;  %v3247_v14 = vadd.f32 1.0, %v4546_v56  ;;  %3110 = vst.msk [vmem:[%s5629_s20 + $0x80] sm:$0xff] %vm3093_vm8, %v3073_v28  ;;  %v3147_v7 = vsub.f32 0.0, %v3073_v28  ;;  %v3074_v8 = vadd.f32 %v4208_v62, %v5622_v16  ;;  %v5724_v21 = vpop.f32.mrb[25].mxu1 }
 0x219   : > { %v4550_v48 = vpop.eup %4549  ;;  %4567 = vrcp.f32 %v3249_v38  ;;  %v3250_v39 = vadd.f32 1.0, %v4548_v43  ;;  %v3203_v19 = vmul.f32 1.442695, %v3149_v22  ;;  %3113 = vst.msk [vmem:[%s5629_s20 + $0x98] sm:$0xff] %vm3093_vm8, %v3076_v2  ;;  %v3150_v34 = vsub.f32 0.0, %v3076_v2  ;;  %v5728_v51 = vpop.f32.mrb[26].mxu1 }
 0x21a   : > { %v4552_v5 = vpop.eup %4551  ;;  %4569 = vrcp.f32 %v3247_v14  ;;  %v3248_v24 = vadd.f32 1.0, %v4550_v48  ;;  %v3199_v29 = vmul.f32 1.442695, %v3147_v7  ;;  %3111 = vst.msk [vmem:[%s5629_s20 + $0x88] sm:$0xff] %vm3093_vm8, %v3074_v8  ;;  %v3148_v33 = vsub.f32 0.0, %v3074_v8  ;;  %v4173_v42 = vpop.f32.mrb[20].mxu0 }
 0x21b   : > { %v5732_v61 = vpop.f32.mrb[27].mxu1  ;;  %v4554_v49 = vpop.eup %4553  ;;  %3353 = vst.msk [vmem:[%s5687_s23 + $0x30] sm:$0xff] %vm3093_vm8, %v4552_v5  ;;  %4571 = vrcp.f32 %v3250_v39  ;;  %v3205_v6 = vmul.f32 1.442695, %v3150_v34  ;;  %v4209_v54 = vadd.f32 %v4173_v42, %v5680_v0 }
 0x21c   : > { %v2951_v3 = vpop.f32.mrb[21].mxu0  ;;  %v4556_v27 = vpop.eup %4555  ;;  %3351 = vst.msk [vmem:[%s5687_s23 + $0x20] sm:$0xff] %vm3093_vm8, %v4554_v49  ;;  %4573 = vrcp.f32 %v3248_v24  ;;  %v3201_v10 = vmul.f32 1.442695, %v3148_v33 }
 0x21d   : > { %v4210_v37 = vadd.f32 %v2951_v3, %v5692_v12  ;;  %v4174_v60 = vpop.f32.mrb[22].mxu0  ;;  %v4558_v13 = vpop.eup %4557  ;;  %3354 = vst.msk [vmem:[%s5687_s23 + $0x38] sm:$0xff] %vm3093_vm8, %v4556_v27  ;;  %4575 = vpow2.f32 %v3203_v19  ;;  %v3079_v4 = vadd.f32 %v4209_v54, %v5622_v16 }
 0x21e   : > { %v4211_v63 = vadd.f32 %v4174_v60, %v5696_v17  ;;  %v2954_v26 = vpop.f32.mrb[23].mxu0  ;;  %v4560_v0 = vpop.eup %4559  ;;  %3352 = vst.msk [vmem:[%s5687_s23 + $0x28] sm:$0xff] %vm3093_vm8, %v4558_v13  ;;  %4577 = vpow2.f32 %v3199_v29 }
 0x21f   : > { %v3077_v23 = vadd.f32 %v4210_v37, %v5622_v16  ;;  %v4212_v44 = vadd.f32 %v2954_v26, %v5700_v52  ;;  %v4562_v32 = vpop.eup %4561  ;;  %v3253_v53 = vadd.f32 1.0, %v4560_v0  ;;  %4579 = vpow2.f32 %v3205_v6  ;;  %3116 = vst.msk [vmem:[%s5629_s20 + $0xb0] sm:$0xff] %vm3093_vm8, %v3079_v4  ;;  %v5751_v35 = vpop.f32.mrb[28].mxu1 }
 0x220   : > { %v3153_v12 = vsub.f32 0.0, %v3079_v4  ;;  %v3080_v57 = vadd.f32 %v4211_v63, %v5622_v16  ;;  %v4564_v9 = vpop.eup %4563  ;;  %v3251_v17 = vadd.f32 1.0, %v4562_v32  ;;  %4581 = vpow2.f32 %v3201_v10  ;;  %v5756_v15 = vpop.f32.mrb[29].mxu1 }
 0x221   : > { %3114 = vst.msk [vmem:[%s5629_s20 + $0xa0] sm:$0xff] %vm3093_vm8, %v3077_v23  ;;  %v3151_v58 = vsub.f32 0.0, %v3077_v23  ;;  %v3078_v46 = vadd.f32 %v4212_v44, %v5622_v16  ;;  %v4566_v45 = vpop.eup %4565  ;;  %4583 = vrcp.f32 %v3253_v53  ;;  %v3254_v52 = vadd.f32 1.0, %v4564_v9  ;;  %v5760_v20 = vpop.f32.mrb[30].mxu1 }
 0x222   : > { %v3211_v18 = vmul.f32 1.442695, %v3153_v12  ;;  %3117 = vst.msk [vmem:[%s5629_s20 + $0xb8] sm:$0xff] %vm3093_vm8, %v3080_v57  ;;  %v3154_v31 = vsub.f32 0.0, %v3080_v57  ;;  %4585 = vrcp.f32 %v3251_v17  ;;  %v3252_v40 = vadd.f32 1.0, %v4566_v45  ;;  %v4177_v41 = vpop.f32.mrb[24].mxu0 }
 0x223   : > { %v3207_v30 = vmul.f32 1.442695, %v3151_v58  ;;  %3115 = vst.msk [vmem:[%s5629_s20 + $0xa8] sm:$0xff] %vm3093_vm8, %v3078_v46  ;;  %v3152_v11 = vsub.f32 0.0, %v3078_v46  ;;  %v5764_v50 = vpop.f32.mrb[31].mxu1  ;;  %v4568_v47 = vpop.eup %4567  ;;  %4587 = vrcp.f32 %v3254_v52  ;;  %v4213_v36 = vadd.f32 %v4177_v41, %v5719_v25 }
 0x224   : > { %v3213_v55 = vmul.f32 1.442695, %v3154_v31  ;;  %v2967_v1 = vpop.f32.mrb[25].mxu0  ;;  %v4570_v59 = vpop.eup %4569  ;;  %3357 = vst.msk [vmem:[%s5687_s23 + $0x50] sm:$0xff] %vm3093_vm8, %v4568_v47  ;;  %4589 = vrcp.f32 %v3252_v40 }
 0x225   : > { %v3209_v28 = vmul.f32 1.442695, %v3152_v11  ;;  %v4214_v62 = vadd.f32 %v2967_v1, %v5724_v21  ;;  %v4178_v56 = vpop.f32.mrb[26].mxu0  ;;  %v4572_v38 = vpop.eup %4571  ;;  %3355 = vst.msk [vmem:[%s5687_s23 + $0x40] sm:$0xff] %vm3093_vm8, %v4570_v59  ;;  %4591 = vpow2.f32 %v3211_v18  ;;  %v3083_v22 = vadd.f32 %v4213_v36, %v5622_v16 }
 0x226   : > { %v4215_v2 = vadd.f32 %v4178_v56, %v5728_v51  ;;  %v2970_v25 = vpop.f32.mrb[27].mxu0  ;;  %v4574_v43 = vpop.eup %4573  ;;  %3358 = vst.msk [vmem:[%s5687_s23 + $0x58] sm:$0xff] %vm3093_vm8, %v4572_v38  ;;  %4593 = vpow2.f32 %v3207_v30 }
 0x227   : > { %v3081_v14 = vadd.f32 %v4214_v62, %v5622_v16  ;;  %v4216_v7 = vadd.f32 %v2970_v25, %v5732_v61  ;;  %v4576_v8 = vpop.eup %4575  ;;  %3356 = vst.msk [vmem:[%s5687_s23 + $0x48] sm:$0xff] %vm3093_vm8, %v4574_v43  ;;  %4595 = vpow2.f32 %v3213_v55  ;;  %3120 = vst.msk [vmem:[%s5629_s20 + $0xd0] sm:$0xff] %vm3093_vm8, %v3083_v22  ;;  %v3157_v21 = vsub.f32 0.0, %v3083_v22  ;;  %v5783_v39 = vpop.f32.mrb[32].mxu1 }
 0x228   : > { %v3084_v48 = vadd.f32 %v4215_v2, %v5622_v16  ;;  %v4578_v19 = vpop.eup %4577  ;;  %v3257_v34 = vadd.f32 1.0, %v4576_v8  ;;  %4597 = vpow2.f32 %v3209_v28  ;;  %v5788_v24 = vpop.f32.mrb[33].mxu1 }
 0x229   : > { %3118 = vst.msk [vmem:[%s5629_s20 + $0xc0] sm:$0xff] %vm3093_vm8, %v3081_v14  ;;  %v3155_v51 = vsub.f32 0.0, %v3081_v14  ;;  %v3082_v5 = vadd.f32 %v4216_v7, %v5622_v16  ;;  %v4580_v29 = vpop.eup %4579  ;;  %v3255_v33 = vadd.f32 1.0, %v4578_v19  ;;  %v5792_v61 = vpop.f32.mrb[34].mxu1  ;;  %v3219_v54 = vmul.f32 1.442695, %v3157_v21 }
 0x22a   : > { %3121 = vst.msk [vmem:[%s5629_s20 + $0xd8] sm:$0xff] %vm3093_vm8, %v3084_v48  ;;  %v3158_v42 = vsub.f32 0.0, %v3084_v48  ;;  %v4582_v49 = vpop.eup %4581  ;;  %4599 = vrcp.f32 %v3257_v34  ;;  %v3258_v6 = vadd.f32 1.0, %v4580_v29  ;;  %v4181_v27 = vpop.f32.mrb[28].mxu0 }
 0x22b   : > { %3119 = vst.msk [vmem:[%s5629_s20 + $0xc8] sm:$0xff] %vm3093_vm8, %v3082_v5  ;;  %v3156_v3 = vsub.f32 0.0, %v3082_v5  ;;  %v5796_v10 = vpop.f32.mrb[35].mxu1  ;;  %v4584_v37 = vpop.eup %4583  ;;  %4601 = vrcp.f32 %v3255_v33  ;;  %v3256_v60 = vadd.f32 1.0, %v4582_v49  ;;  %v3215_v13 = vmul.f32 1.442695, %v3155_v51 }
 0x22c   : > { %v4217_v4 = vadd.f32 %v4181_v27, %v5751_v35  ;;  %v2983_v63 = vpop.f32.mrb[29].mxu0  ;;  %v4586_v26 = vpop.eup %4585  ;;  %3361 = vst.msk [vmem:[%s5687_s23 + $0x70] sm:$0xff] %vm3093_vm8, %v4584_v37  ;;  %4603 = vrcp.f32 %v3258_v6  ;;  %v3221_v0 = vmul.f32 1.442695, %v3158_v42 }
 0x22d   : > { %v4218_v23 = vadd.f32 %v2983_v63, %v5756_v15  ;;  %v4182_v44 = vpop.f32.mrb[30].mxu0  ;;  %v4588_v32 = vpop.eup %4587  ;;  %3359 = vst.msk [vmem:[%s5687_s23 + $0x60] sm:$0xff] %vm3093_vm8, %v4586_v26  ;;  %4605 = vrcp.f32 %v3256_v60  ;;  %v3217_v53 = vmul.f32 1.442695, %v3156_v3 }
 0x22e   : > { %v3087_v12 = vadd.f32 %v4217_v4, %v5622_v16  ;;  %v4219_v57 = vadd.f32 %v4182_v44, %v5760_v20  ;;  %v2986_v35 = vpop.f32.mrb[31].mxu0  ;;  %v4590_v9 = vpop.eup %4589  ;;  %3362 = vst.msk [vmem:[%s5687_s23 + $0x78] sm:$0xff] %vm3093_vm8, %v4588_v32  ;;  %4607 = vpow2.f32 %v3219_v54 }
 0x22f   : > { %v3085_v17 = vadd.f32 %v4218_v23, %v5622_v16  ;;  %v4220_v58 = vadd.f32 %v2986_v35, %v5764_v50  ;;  %v4592_v46 = vpop.eup %4591  ;;  %3360 = vst.msk [vmem:[%s5687_s23 + $0x68] sm:$0xff] %vm3093_vm8, %v4590_v9  ;;  %4609 = vpow2.f32 %v3215_v13 }
 0x230   : > { %3124 = vst.msk [vmem:[%s5629_s20 + $0xf0] sm:$0xff] %vm3093_vm8, %v3087_v12  ;;  %v3161_v15 = vsub.f32 0.0, %v3087_v12  ;;  %v3088_v45 = vadd.f32 %v4219_v57, %v5622_v16  ;;  %v4594_v52 = vpop.eup %4593  ;;  %v3261_v18 = vadd.f32 1.0, %v4592_v46  ;;  %4611 = vpow2.f32 %v3221_v0 }
 0x231   : > { %3122 = vst.msk [vmem:[%s5629_s20 + $0xe0] sm:$0xff] %vm3093_vm8, %v3085_v17  ;;  %v3159_v31 = vsub.f32 0.0, %v3085_v17  ;;  %v3086_v20 = vadd.f32 %v4220_v58, %v5622_v16  ;;  %v4596_v40 = vpop.eup %4595  ;;  %v3259_v30 = vadd.f32 1.0, %v4594_v52  ;;  %4613 = vpow2.f32 %v3217_v53  ;;  %v4185_v36 = vpop.f32.mrb[32].mxu0 }
 0x232   : > { %3125 = vst.msk [vmem:[%s5629_s20 + $0xf8] sm:$0xff] %vm3093_vm8, %v3088_v45  ;;  %v3162_v11 = vsub.f32 0.0, %v3088_v45  ;;  %v4598_v41 = vpop.eup %4597  ;;  %4615 = vrcp.f32 %v3261_v18  ;;  %v3262_v50 = vadd.f32 1.0, %v4596_v40  ;;  %v3227_v47 = vmul.f32 1.442695, %v3161_v15  ;;  %v2999_v62 = vpop.f32.mrb[33].mxu0 }
 0x233   : > { %3123 = vst.msk [vmem:[%s5629_s20 + $0xe8] sm:$0xff] %vm3093_vm8, %v3086_v20  ;;  %v3160_v55 = vsub.f32 0.0, %v3086_v20  ;;  %4617 = vrcp.f32 %v3259_v30  ;;  %v3260_v1 = vadd.f32 1.0, %v4598_v41  ;;  %v3223_v59 = vmul.f32 1.442695, %v3159_v31  ;;  %v4186_v2 = vpop.f32.mrb[34].mxu0 }
 0x234   : > { %v4221_v28 = vadd.f32 %v4185_v36, %v5783_v39  ;;  %v4600_v56 = vpop.eup %4599  ;;  %4619 = vrcp.f32 %v3262_v50  ;;  %v3229_v38 = vmul.f32 1.442695, %v3162_v11  ;;  %v4222_v22 = vadd.f32 %v2999_v62, %v5788_v24  ;;  %v3002_v8 = vpop.f32.mrb[35].mxu0 }
 0x235   : > { %v4602_v25 = vpop.eup %4601  ;;  %3365 = vst.msk [vmem:[%s5687_s23 + $0x90] sm:$0xff] %vm3093_vm8, %v4600_v56  ;;  %4621 = vrcp.f32 %v3260_v1  ;;  %v3225_v43 = vmul.f32 1.442695, %v3160_v55  ;;  %v4223_v7 = vadd.f32 %v4186_v2, %v5792_v61  ;;  %v4224_v39 = vadd.f32 %v3002_v8, %v5796_v10 }
 0x236   : > { %v3091_v14 = vadd.f32 %v4221_v28, %v5622_v16  ;;  %v4604_v21 = vpop.eup %4603  ;;  %3363 = vst.msk [vmem:[%s5687_s23 + $0x80] sm:$0xff] %vm3093_vm8, %v4602_v25  ;;  %4623 = vpow2.f32 %v3227_v47  ;;  %v3089_v48 = vadd.f32 %v4222_v22, %v5622_v16 }
 0x237   : > { %v4606_v19 = vpop.eup %4605  ;;  %3366 = vst.msk [vmem:[%s5687_s23 + $0x98] sm:$0xff] %vm3093_vm8, %v4604_v21  ;;  %4625 = vpow2.f32 %v3223_v59  ;;  %v3092_v51 = vadd.f32 %v4223_v7, %v5622_v16  ;;  %v3090_v29 = vadd.f32 %v4224_v39, %v5622_v16 }
 0x238   : > { %3128 = vst.msk [vmem:[%s5629_s20 + $0x110] sm:$0xff] %vm3093_vm8, %v3091_v14  ;;  %v3165_v34 = vsub.f32 0.0, %v3091_v14  ;;  %v4608_v5 = vpop.eup %4607  ;;  %3364 = vst.msk [vmem:[%s5687_s23 + $0x88] sm:$0xff] %vm3093_vm8, %v4606_v19  ;;  %4627 = vpow2.f32 %v3229_v38  ;;  %v3163_v24 = vsub.f32 0.0, %v3089_v48 }
 0x239   : > { %3126 = vst.msk [vmem:[%s5629_s20 + $0x100] sm:$0xff] %vm3093_vm8, %v3089_v48  ;;  %v4610_v33 = vpop.eup %4609  ;;  %v3265_v42 = vadd.f32 1.0, %v4608_v5  ;;  %4629 = vpow2.f32 %v3225_v43  ;;  %v3166_v61 = vsub.f32 0.0, %v3092_v51  ;;  %3127 = vst.msk [vmem:[%s5629_s20 + $0x108] sm:$0xff] %vm3093_vm8, %v3090_v29  ;;  %v3164_v54 = vsub.f32 0.0, %v3090_v29 }
 0x23a   : > { %3130 = vst.msk [vmem:[%s5629_s20 + $0x118] sm:$0x3f] %vm3129_vm9, %v3092_v51  ;;  %v4612_v49 = vpop.eup %4611  ;;  %v3263_v6 = vadd.f32 1.0, %v4610_v33  ;;  %v3235_v10 = vmul.f32 1.442695, %v3165_v34 }
 0x23b   : > { %v4614_v3 = vpop.eup %4613  ;;  %4631 = vrcp.f32 %v3265_v42  ;;  %v3266_v27 = vadd.f32 1.0, %v4612_v49  ;;  %v3231_v60 = vmul.f32 1.442695, %v3163_v24  ;;  %v3237_v4 = vmul.f32 1.442695, %v3166_v61 }
 0x23c   : > { %v4616_v37 = vpop.eup %4615  ;;  %4633 = vrcp.f32 %v3263_v6  ;;  %v3264_v16 = vadd.f32 1.0, %v4614_v3  ;;  %v3233_v26 = vmul.f32 1.442695, %v3164_v54 }
 0x23d   : > { %v4618_v13 = vpop.eup %4617  ;;  %3369 = vst.msk [vmem:[%s5687_s23 + $0xb0] sm:$0xff] %vm3093_vm8, %v4616_v37  ;;  %4635 = vrcp.f32 %v3266_v27 }
 0x23e   : > { %v4620_v63 = vpop.eup %4619  ;;  %3367 = vst.msk [vmem:[%s5687_s23 + $0xa0] sm:$0xff] %vm3093_vm8, %v4618_v13  ;;  %4637 = vrcp.f32 %v3264_v16 }
 0x23f   : > { %v4622_v0 = vpop.eup %4621  ;;  %3370 = vst.msk [vmem:[%s5687_s23 + $0xb8] sm:$0xff] %vm3093_vm8, %v4620_v63  ;;  %4639 = vpow2.f32 %v3235_v10 }
 0x240   : > { %v4624_v23 = vpop.eup %4623  ;;  %3368 = vst.msk [vmem:[%s5687_s23 + $0xa8] sm:$0xff] %vm3093_vm8, %v4622_v0  ;;  %4641 = vpow2.f32 %v3231_v60 }
 0x241   : > { %v4626_v44 = vpop.eup %4625  ;;  %v3269_v32 = vadd.f32 1.0, %v4624_v23  ;;  %4643 = vpow2.f32 %v3237_v4 }
 0x242   : > { %v4628_v53 = vpop.eup %4627  ;;  %v3267_v12 = vadd.f32 1.0, %v4626_v44  ;;  %4645 = vpow2.f32 %v3233_v26 }
 0x243   : > { %v4630_v57 = vpop.eup %4629  ;;  %4647 = vrcp.f32 %v3269_v32  ;;  %v3270_v35 = vadd.f32 1.0, %v4628_v53 }
 0x244   : > { %4649 = vrcp.f32 %v3267_v12  ;;  %v3268_v9 = vadd.f32 1.0, %v4630_v57 }
 0x245   : > { %v4632_v17 = vpop.eup %4631  ;;  %4651 = vrcp.f32 %v3270_v35 }
 0x246   : > { %v4634_v58 = vpop.eup %4633  ;;  %3373 = vst.msk [vmem:[%s5687_s23 + $0xd0] sm:$0xff] %vm3093_vm8, %v4632_v17  ;;  %4653 = vrcp.f32 %v3268_v9 }
 0x247   : > { %v4636_v46 = vpop.eup %4635  ;;  %3371 = vst.msk [vmem:[%s5687_s23 + $0xc0] sm:$0xff] %vm3093_vm8, %v4634_v58 }
 0x248   : > { %v4638_v15 = vpop.eup %4637  ;;  %3374 = vst.msk [vmem:[%s5687_s23 + $0xd8] sm:$0xff] %vm3093_vm8, %v4636_v46 }
 0x249   : > { %v4640_v45 = vpop.eup %4639  ;;  %3372 = vst.msk [vmem:[%s5687_s23 + $0xc8] sm:$0xff] %vm3093_vm8, %v4638_v15 }
 0x24a   : > { %v4642_v52 = vpop.eup %4641  ;;  %v3273_v18 = vadd.f32 1.0, %v4640_v45 }
 0x24b   : > { %v4644_v31 = vpop.eup %4643  ;;  %v3271_v20 = vadd.f32 1.0, %v4642_v52 }
 0x24c   : > { %v4646_v40 = vpop.eup %4645  ;;  %4655 = vrcp.f32 %v3273_v18  ;;  %v3274_v30 = vadd.f32 1.0, %v4644_v31 }
 0x24d   : > { %v4648_v11 = vpop.eup %4647  ;;  %4657 = vrcp.f32 %v3271_v20  ;;  %v3272_v41 = vadd.f32 1.0, %v4646_v40 }
 0x24e   : > { %v4650_v50 = vpop.eup %4649  ;;  %3377 = vst.msk [vmem:[%s5687_s23 + $0xf0] sm:$0xff] %vm3093_vm8, %v4648_v11  ;;  %4659 = vrcp.f32 %v3274_v30 }
 0x24f   : > { %v4652_v47 = vpop.eup %4651  ;;  %3375 = vst.msk [vmem:[%s5687_s23 + $0xe0] sm:$0xff] %vm3093_vm8, %v4650_v50  ;;  %4661 = vrcp.f32 %v3272_v41 }
 0x250   : > { %v4654_v55 = vpop.eup %4653  ;;  %3378 = vst.msk [vmem:[%s5687_s23 + $0xf8] sm:$0xff] %vm3093_vm8, %v4652_v47 }
 0x251   : > { %3376 = vst.msk [vmem:[%s5687_s23 + $0xe8] sm:$0xff] %vm3093_vm8, %v4654_v55 }
 0x256   : > { %v4656_v36 = vpop.eup %4655 }
 0x257   : > { %v4658_v1 = vpop.eup %4657  ;;  %3381 = vst.msk [vmem:[%s5687_s23 + $0x110] sm:$0xff] %vm3093_vm8, %v4656_v36 }
 0x258   : > { %v4660_v59 = vpop.eup %4659  ;;  %3379 = vst.msk [vmem:[%s5687_s23 + $0x100] sm:$0xff] %vm3093_vm8, %v4658_v1 }
 0x259   : > { %v4662_v28 = vpop.eup %4661  ;;  %3382 = vst.msk [vmem:[%s5687_s23 + $0x118] sm:$0x3f] %vm3129_vm9, %v4660_v59 }
 0x25a   : > { %3380 = vst.msk [vmem:[%s5687_s23 + $0x108] sm:$0xff] %vm3093_vm8, %v4662_v28 }
 0x25b PF: > { %s15_s15 = sadd.s32 1, %s4669_s15  }
 0x25c   : > { %p12_p4 = scmp.ge.s32.totalorder %s15_s15, 4  }
 0x25e   :  { %14 = sbr.rel (!%p12_p4) target bundleno = 1 (0x1), region = 82 }

</bundles_post_ra>
